<compile_context>
chip_gen: v5e
topology: v5e:2x2
jax: 0.10.0
libtpu: 0.0.40
codegen_flags: <defaults>
</compile_context>

<pallas_src>
import functools

import jax
import jax.numpy as jnp
from jax.experimental import pallas as pl
from jax.experimental.pallas import tpu as pltpu

SIGMA = 0.5
V = 1.0          # Student-t degrees of freedom (torch default v=1)
LANES = 128


# ---------------------------------------------------------------------------
# helpers
# ---------------------------------------------------------------------------
def _round_up(x, m):
    return ((x + m - 1) // m) * m


def _pad2(a, rows, cols):
    r0, c0 = a.shape
    if (r0, c0) == (rows, cols):
        return a
    return jnp.zeros((rows, cols), a.dtype).at[:r0, :c0].set(a)


def _tpu_vmem_capacity():
    try:
        return int(pltpu.get_tpu_info().vmem_capacity_bytes)
    except Exception:
        return None


def _vmem_budget(vmem_cap):
    if vmem_cap is None:
        return 32 << 20                      # conservative scoped default
    return min((vmem_cap * 3) // 4, 100 << 20)


def _compiler_params(dimension_semantics, vmem_cap):
    kwargs = dict(dimension_semantics=dimension_semantics)
    if vmem_cap is not None:
        kwargs["vmem_limit_bytes"] = _vmem_budget(vmem_cap)
    return pltpu.CompilerParams(**kwargs)


def _default_tile(vmem_cap):
    # 128-MiB-VMEM parts (v5e/v6e): bigger adj tiles (~85% of HBM roofline).
    # 64-MiB parts (v7x) or unknown: 256 keeps acc + buffers well inside budget.
    if vmem_cap is not None and vmem_cap >= (100 << 20):
        return 512
    return 256


# ---------------------------------------------------------------------------
# Kernel A: auto-encoder + Student-t q + first GNN support, row-tiled
# ---------------------------------------------------------------------------
def _ae_kernel(x_ref,
               ew1, eb1, ew2, eb2, ew3, eb3, zw, zb,
               dw1, db1, dw2, db2, dw3, db3, xw, xb,
               clT_ref, clsq_ref, gw1_ref,
               xbar_ref, tra1_ref, tra2_ref, tra3_ref, z_ref, q_ref, sup1_ref,
               *, n_clusters, v, compute_dtype):
    cd = compute_dtype
    f32 = jnp.float32

    def linear(h, w_r, b_r, act=True):
        h_cd = h if h.dtype == cd else h.astype(cd)
        y = jnp.dot(h_cd, w_r[...], preferred_element_type=f32) + b_r[...]
        return jnp.maximum(y, 0.0) if act else y

    x_cd = x_ref[...].astype(cd)
    tra1 = linear(x_cd, ew1, eb1)
    tra2 = linear(tra1, ew2, eb2)
    tra3 = linear(tra2, ew3, eb3)
    z = linear(tra3, zw, zb, act=False)
    d1 = linear(z, dw1, db1)
    d2 = linear(d1, dw2, db2)
    d3 = linear(d2, dw3, db3)
    x_bar = linear(d3, xw, xb, act=False)

    # Student-t soft assignment via the matmul identity (MXU, no (TM,K,n_z)
    # broadcast):  ||z_i - mu_j||^2 = ||z_i||^2 + ||mu_j||^2 - 2 <z_i, mu_j>
    z_sq = jnp.sum(z * z, axis=1, keepdims=True)                    # (TM, 1)
    cross = jnp.dot(z.astype(cd), clT_ref[...],
                    preferred_element_type=f32)                     # (TM, KPAD)
    dist2 = jnp.maximum(z_sq + clsq_ref[...] - 2.0 * cross, 0.0)

    if v == 1.0:                     # exponent (v+1)/2 == 1 -> skip the pow
        qu = 1.0 / (1.0 + dist2)     # exact divide (once per tile, off MXU path)
    else:
        qu = jnp.exp((-(v + 1.0) / 2.0) * jnp.log1p(dist2 / v))

    col = jax.lax.broadcasted_iota(jnp.int32, qu.shape, 1)
    qu = jnp.where(col < n_clusters, qu, 0.0)                       # mask pad lanes
    q = qu / jnp.sum(qu, axis=1, keepdims=True)

    # First GNN support, fused (x is already resident in VMEM).
    sup1 = jnp.dot(x_cd, gw1_ref[...], preferred_element_type=f32)

    xbar_ref[...] = x_bar
    tra1_ref[...] = tra1
    tra2_ref[...] = tra2
    tra3_ref[...] = tra3
    z_ref[...] = z
    q_ref[...] = q
    sup1_ref[...] = sup1.astype(sup1_ref.dtype)


def _ae_forward(x, w, *, row_tile, n_clusters, compute_dtype, adj_dtype, cp):
    n, n_input = x.shape
    tm = row_tile
    e1 = w["ew1"].shape[1]
    e2 = w["ew2"].shape[1]
    e3 = w["ew3"].shape[1]
    nz = w["zw"].shape[1]
    kp = w["clT"].shape[1]

    consts = (w["ew1"], w["eb1"], w["ew2"], w["eb2"], w["ew3"], w["eb3"],
              w["zw"], w["zb"], w["dw1"], w["db1"], w["dw2"], w["db2"],
              w["dw3"], w["db3"], w["xw"], w["xb"],
              w["clT"], w["clsq"], w["gw1"])

    def row_spec(f):
        return pl.BlockSpec((tm, f), lambda i: (i, 0))

    def full_spec(a):
        return pl.BlockSpec(a.shape, lambda i: (0, 0))

    out_shape = (
        jax.ShapeDtypeStruct((n, n_input), jnp.float32),   # x_bar
        jax.ShapeDtypeStruct((n, e1), jnp.float32),        # tra1
        jax.ShapeDtypeStruct((n, e2), jnp.float32),        # tra2
        jax.ShapeDtypeStruct((n, e3), jnp.float32),        # tra3
        jax.ShapeDtypeStruct((n, nz), jnp.float32),        # z (lane-padded)
        jax.ShapeDtypeStruct((n, kp), jnp.float32),        # q (lane-padded)
        jax.ShapeDtypeStruct((n, e1), adj_dtype),          # sup1 = x @ W1
    )
    out_specs = (row_spec(n_input), row_spec(e1), row_spec(e2), row_spec(e3),
                 row_spec(nz), row_spec(kp), row_spec(e1))

    kernel = functools.partial(_ae_kernel, n_clusters=n_clusters, v=V,
                               compute_dtype=compute_dtype)
    return pl.pallas_call(
        kernel,
        out_shape=out_shape,
        grid_spec=pltpu.PrefetchScalarGridSpec(
            num_scalar_prefetch=0, grid=(n // tm,),
            in_specs=[row_spec(n_input)] + [full_spec(a) for a in consts],
            out_specs=out_specs),
        compiler_params=cp,
    )(x, *consts)


# ---------------------------------------------------------------------------
# Kernel C: acc += adj @ sup ; finalize fuses ReLU + blend + next-layer support
# (or the final masked softmax).  Grid = (out row tiles, adj col tiles).
# ---------------------------------------------------------------------------
def _spmm_fuse_kernel(adj_ref, sup_ref, tra_ref, wn_ref, out_ref, acc_ref,
                      *, sigma, sup_resident, tk, compute_dtype):
    k = pl.program_id(1)

    @pl.when(k == 0)
    def _():
        acc_ref[...] = jnp.zeros_like(acc_ref)

    if sup_resident:   # full support resident in VMEM; slice the k-th row block
        sup = sup_ref[pl.ds(pl.multiple_of(k * tk, tk), tk), :]
    else:
        sup = sup_ref[...]
    acc_ref[...] += jnp.dot(adj_ref[...], sup, preferred_element_type=jnp.float32)

    @pl.when(k == pl.num_programs(1) - 1)
    def _():
        h = jnp.maximum(acc_ref[...], 0.0)                 # ReLU   (f32 VPU)
        mixed = (1.0 - sigma) * h + sigma * tra_ref[...]   # blend  (f32 VPU)
        sup_next = jnp.dot(mixed.astype(compute_dtype), wn_ref[...],
                           preferred_element_type=jnp.float32)
        out_ref[...] = sup_next.astype(out_ref.dtype)      # next layer's support


def _spmm_softmax_kernel(adj_ref, sup_ref, out_ref, acc_ref,
                         *, n_valid, sup_resident, tk):
    k = pl.program_id(1)

    @pl.when(k == 0)
    def _():
        acc_ref[...] = jnp.zeros_like(acc_ref)

    if sup_resident:
        sup = sup_ref[pl.ds(pl.multiple_of(k * tk, tk), tk), :]
    else:
        sup = sup_ref[...]
    acc_ref[...] += jnp.dot(adj_ref[...], sup, preferred_element_type=jnp.float32)

    @pl.when(k == pl.num_programs(1) - 1)
    def _():
        h = acc_ref[...]
        col = jax.lax.broadcasted_iota(jnp.int32, h.shape, 1)
        h = jnp.where(col < n_valid, h, -1e30)             # mask padded lanes
        m = jnp.max(h, axis=1, keepdims=True)
        e = jnp.exp(h - m)
        out_ref[...] = (e / jnp.sum(e, axis=1, keepdims=True)).astype(out_ref.dtype)


def _sup_spec(sup, tk, sup_resident):
    if sup_resident:
        return pl.BlockSpec(sup.shape, lambda i, k: (0, 0))   # fetched once
    return pl.BlockSpec((tk, sup.shape[1]), lambda i, k: (k, 0))


def _spmm_fused(adj, sup, tra, w_next, *, sigma, tm, tk, sup_resident,
                out_dtype, compute_dtype, cp):
    n = adj.shape[0]
    f_in = sup.shape[1]
    f_out = w_next.shape[1]
    kernel = functools.partial(_spmm_fuse_kernel, sigma=sigma,
                               sup_resident=sup_resident, tk=tk,
                               compute_dtype=compute_dtype)
    return pl.pallas_call(
        kernel,
        out_shape=jax.ShapeDtypeStruct((n, f_out), out_dtype),
        grid_spec=pltpu.PrefetchScalarGridSpec(
            num_scalar_prefetch=0, grid=(n // tm, n // tk),
            in_specs=[pl.BlockSpec((tm, tk), lambda i, k: (i, k)),
                      _sup_spec(sup, tk, sup_resident),
                      pl.BlockSpec((tm, f_in), lambda i, k: (i, 0)),
                      pl.BlockSpec(w_next.shape, lambda i, k: (0, 0))],
            out_specs=pl.BlockSpec((tm, f_out), lambda i, k: (i, 0)),
            scratch_shapes=[pltpu.VMEM((tm, f_in), jnp.float32)]),
        compiler_params=cp,
    )(adj, sup, tra, w_next)


def _spmm_softmax(adj, sup, *, n_valid, tm, tk, sup_resident, cp):
    n = adj.shape[0]
    f = sup.shape[1]
    kernel = functools.partial(_spmm_softmax_kernel, n_valid=n_valid,
                               sup_resident=sup_resident, tk=tk)
    return pl.pallas_call(
        kernel,
        out_shape=jax.ShapeDtypeStruct((n, f), jnp.float32),
        grid_spec=pltpu.PrefetchScalarGridSpec(
            num_scalar_prefetch=0, grid=(n // tm, n // tk),
            in_specs=[pl.BlockSpec((tm, tk), lambda i, k: (i, k)),
                      _sup_spec(sup, tk, sup_resident)],
            out_specs=pl.BlockSpec((tm, f), lambda i, k: (i, 0)),
            scratch_shapes=[pltpu.VMEM((tm, f), jnp.float32)]),
        compiler_params=cp,
    )(adj, sup)


# ---------------------------------------------------------------------------
# Full SDCN forward
# ---------------------------------------------------------------------------
def sdcn_forward(x, adj, params, *, tile=None, compute_dtype=jnp.float32,
                 adj_dtype=jnp.bfloat16):
    """SDCN forward. Returns (x_bar, q, predict, z) like the PyTorch module.

    compute_dtype : MXU operand dtype for the dense/GNN weight matmuls
                    (accumulation is always f32; VPU math stays f32).
    adj_dtype     : dtype of the streamed adjacency + support matrices
                    (bf16 by default: adj is the dominant HBM stream).
    """
    n, n_input = x.shape
    n_clusters, n_z = params["cluster"].shape
    cd = compute_dtype

    vmem_cap = _tpu_vmem_capacity()
    if tile is None:
        tile = _default_tile(vmem_cap)
    assert tile in (128, 256, 512, 1024), "tile must be 128/256/512/1024"
    tm = tk = tile
    ae_tile = min(256, tile)                     # caps Kernel A VMEM on v7x

    # --- pad node count to a tile multiple (real datasets: N % 128 != 0) ---
    n_pad = _round_up(n, tile)
    xp = x.astype(jnp.float32)
    if n_pad != n:
        xp = jnp.zeros((n_pad, n_input), jnp.float32).at[:n, :].set(xp)
        adj_p = jnp.zeros((n_pad, n_pad), jnp.float32).at[:n, :n].set(
            adj.astype(jnp.float32))
    else:
        adj_p = adj.astype(jnp.float32)
    adj_c = adj_p.astype(adj_dtype)              # zero pads stay exactly zero

    # --- pad feature widths to 128 lanes and pre-cast weights once ---------
    e1 = _round_up(params["ew1"].shape[1], LANES)
    e2 = _round_up(params["ew2"].shape[1], LANES)
    e3 = _round_up(params["ew3"].shape[1], LANES)
    zp = _round_up(n_z, LANES)
    d1 = _round_up(params["dw1"].shape[1], LANES)
    d2 = _round_up(params["dw2"].shape[1], LANES)
    d3 = _round_up(params["dw3"].shape[1], LANES)
    kpad = _round_up(max(n_clusters, 1), LANES)

    def wpad(a, r, c):
        return _pad2(jnp.asarray(a, jnp.float32), r, c).astype(cd)

    def bpad(b, c):                              # biases stay f32
        return _pad2(jnp.asarray(b, jnp.float32).reshape(1, -1), 1, c)

    w = {
        "ew1": wpad(params["ew1"], n_input, e1), "eb1": bpad(params["eb1"], e1),
        "ew2": wpad(params["ew2"], e1, e2),      "eb2": bpad(params["eb2"], e2),
        "ew3": wpad(params["ew3"], e2, e3),      "eb3": bpad(params["eb3"], e3),
        "zw":  wpad(params["zw"],  e3, zp),      "zb":  bpad(params["zb"],  zp),
        "dw1": wpad(params["dw1"], zp, d1),      "db1": bpad(params["db1"], d1),
        "dw2": wpad(params["dw2"], d1, d2),      "db2": bpad(params["db2"], d2),
        "dw3": wpad(params["dw3"], d2, d3),      "db3": bpad(params["db3"], d3),
        "xw":  wpad(params["xw"],  d3, n_input), "xb":  bpad(params["xb"],  n_input),
        "gw1": wpad(params["gw1"], n_input, e1),
    }
    gw2 = wpad(params["gw2"], e1, e2)
    gw3 = wpad(params["gw3"], e2, e3)
    gw4 = wpad(params["gw4"], e3, zp)
    gw5 = wpad(params["gw5"], zp, kpad)

    cl = jnp.asarray(params["cluster"], jnp.float32)               # (K, n_z)
    w["clT"] = _pad2(cl.T, zp, kpad).astype(cd)
    w["clsq"] = _pad2(jnp.sum(cl * cl, axis=1)[None, :], 1, kpad)  # f32

    cp_rows = _compiler_params(("parallel",), vmem_cap)
    cp_spmm = _compiler_params(("parallel", "arbitrary"), vmem_cap)
    budget = _vmem_budget(vmem_cap)

    def sup_is_resident(f):
        # Keep sup fully VMEM-resident (fetched once) when its two pipeline
        # buffers stay well under ~25% of the scoped VMEM budget.
        return 2 * n_pad * f * jnp.dtype(adj_dtype).itemsize <= budget // 4

    # --- Kernel A: AE + q + sup1 -------------------------------------------
    x_bar_p, tra1, tra2, tra3, z_p, q_pad, sup1 = _ae_forward(
        xp, w, row_tile=ae_tile, n_clusters=n_clusters,
        compute_dtype=cd, adj_dtype=adj_dtype, cp=cp_rows)

    # --- Kernel C x5: spmm with fused next-layer support / final softmax ---
    def gnn_step(sup, tra, w_next):
        return _spmm_fused(adj_c, sup, tra, w_next, sigma=SIGMA, tm=tm, tk=tk,
                           sup_resident=sup_is_resident(sup.shape[1]),
                           out_dtype=adj_dtype, compute_dtype=cd, cp=cp_spmm)

    sup2 = gnn_step(sup1, tra1, gw2)     # h1 = relu(adj@sup1); sup2 = mix@W2
    sup3 = gnn_step(sup2, tra2, gw3)
    sup4 = gnn_step(sup3, tra3, gw4)
    sup5 = gnn_step(sup4, z_p, gw5)
    pred_pad = _spmm_softmax(adj_c, sup5, n_valid=n_clusters, tm=tm, tk=tk,
                             sup_resident=sup_is_resident(sup5.shape[1]),
                             cp=cp_spmm)

    x_bar = x_bar_p[:n, :]
    q = q_pad[:n, :n_clusters]
    predict = pred_pad[:n, :n_clusters]
    z = z_p[:n, :n_z]
    return x_bar, q, predict, z


# ---------------------------------------------------------------------------
# parameters / pure-JAX reference / test
# ---------------------------------------------------------------------------
def init_params(key, dims):
    """Deterministic stand-in for the pretrained AE / GNN weights."""
    (n_enc_1, n_enc_2, n_enc_3, n_dec_1, n_dec_2, n_dec_3,
     n_input, n_z, n_clusters) = dims

    def lin(k, fin, fout):
        kw, kb = jax.random.split(k)
        scale = (2.0 / (fin + fout)) ** 0.5
        wgt = jax.random.normal(kw, (fin, fout), jnp.float32) * scale
        b = jax.random.normal(kb, (fout,), jnp.float32) * 0.01
        return wgt, b

    keys = jax.random.split(key, 16)
    p = {}
    p["ew1"], p["eb1"] = lin(keys[0], n_input, n_enc_1)
    p["ew2"], p["eb2"] = lin(keys[1], n_enc_1, n_enc_2)
    p["ew3"], p["eb3"] = lin(keys[2], n_enc_2, n_enc_3)
    p["zw"], p["zb"] = lin(keys[3], n_enc_3, n_z)
    p["dw1"], p["db1"] = lin(keys[4], n_z, n_dec_1)
    p["dw2"], p["db2"] = lin(keys[5], n_dec_1, n_dec_2)
    p["dw3"], p["db3"] = lin(keys[6], n_dec_2, n_dec_3)
    p["xw"], p["xb"] = lin(keys[7], n_dec_3, n_input)
    p["gw1"] = lin(keys[8], n_input, n_enc_1)[0]
    p["gw2"] = lin(keys[9], n_enc_1, n_enc_2)[0]
    p["gw3"] = lin(keys[10], n_enc_2, n_enc_3)[0]
    p["gw4"] = lin(keys[11], n_enc_3, n_z)[0]
    p["gw5"] = lin(keys[12], n_z, n_clusters)[0]
    p["cluster"] = jax.random.normal(keys[13], (n_clusters, n_z), jnp.float32) * \
        (2.0 / (n_clusters + n_z)) ** 0.5
    return p


def reference_forward(x, adj, p):
    """Pure-jnp reference mirroring the PyTorch forward, for verification."""
    relu = lambda a: jnp.maximum(a, 0.0)
    tra1 = relu(x @ p["ew1"] + p["eb1"])
    tra2 = relu(tra1 @ p["ew2"] + p["eb2"])
    tra3 = relu(tra2 @ p["ew3"] + p["eb3"])
    z = tra3 @ p["zw"] + p["zb"]
    d1 = relu(z @ p["dw1"] + p["db1"])
    d2 = relu(d1 @ p["dw2"] + p["db2"])
    d3 = relu(d2 @ p["dw3"] + p["db3"])
    x_bar = d3 @ p["xw"] + p["xb"]

    gnn = lambda h, w, act=True: (relu(adj @ (h @ w)) if act else adj @ (h @ w))
    h = gnn(x, p["gw1"])
    h = gnn((1 - SIGMA) * h + SIGMA * tra1, p["gw2"])
    h = gnn((1 - SIGMA) * h + SIGMA * tra2, p["gw3"])
    h = gnn((1 - SIGMA) * h + SIGMA * tra3, p["gw4"])
    h = gnn((1 - SIGMA) * h + SIGMA * z, p["gw5"], act=False)
    predict = jax.nn.softmax(h, axis=1)

    dist2 = jnp.sum((z[:, None, :] - p["cluster"][None, :, :]) ** 2, axis=2)
    q = 1.0 / (1.0 + dist2 / V)
    q = q ** ((V + 1.0) / 2.0)
    q = q / jnp.sum(q, axis=1, keepdims=True)
    return x_bar, q, predict, z


if __name__ == "__main__":
    # small sizes; n_nodes deliberately NOT a multiple of 128 to exercise the
    # node-padding path, and tile=256 forces a real (2, 2) spmm grid.
    n_nodes = 300
    n_input = 48
    n_enc_1, n_enc_2, n_enc_3 = 64, 32, 32
    n_dec_1, n_dec_2, n_dec_3 = 32, 32, 64
    n_z = 16
    n_clusters = 4

    key = jax.random.PRNGKey(0)
    kx, kadj, kparam = jax.random.split(key, 3)

    x = jax.random.normal(kx, (n_nodes, n_input), jnp.float32)
    # dense, row-normalized "adjacency" (torch.spmm on dense == matmul)
    a = jnp.abs(jax.random.normal(kadj, (n_nodes, n_nodes), jnp.float32))
    a = a + jnp.eye(n_nodes, dtype=jnp.float32)
    adj = a / jnp.sum(a, axis=1, keepdims=True)

    params = init_params(
        kparam,
        (n_enc_1, n_enc_2, n_enc_3, n_dec_1, n_dec_2, n_dec_3,
         n_input, n_z, n_clusters),
    )

    refs = reference_forward(x, adj, params)
    names = ("x_bar", "q", "predict", "z")

    # 1) strict f32 path: explicit 256 tiles (2x2 reduction grid), f32 adj
    outs = sdcn_forward(x, adj, params, tile=256,
                        compute_dtype=jnp.float32, adj_dtype=jnp.float32)
    outs = jax.block_until_ready(outs)
    for name, got, ref in zip(names, outs, refs):
        assert got.shape == ref.shape, (name, got.shape, ref.shape)
        assert jnp.allclose(got, ref, rtol=5e-3, atol=5e-3), \
            f"mismatch vs reference in {name}"

    # 2) default perf path: bf16 adj/support stream, device-chosen tiles
    outs_bf = sdcn_forward(x, adj, params)
    outs_bf = jax.block_until_ready(outs_bf)
    for name, got, ref in zip(names, outs_bf, refs):
        assert got.shape == ref.shape, (name, got.shape, ref.shape)
        assert bool(jnp.all(jnp.isfinite(got))), f"non-finite output in {name}"
    # AE-branch outputs are independent of adj_dtype -> still match tightly
    for name, got, ref in zip(("x_bar", "q", "z"),
                              (outs_bf[0], outs_bf[1], outs_bf[3]),
                              (refs[0], refs[1], refs[3])):
        assert jnp.allclose(got, ref, rtol=5e-3, atol=5e-3), \
            f"mismatch vs reference in {name} (default path)"

    print("KERNEL_OK")
</pallas_src>

<mosaic_0001>
module attributes {stable_mosaic.version = 11 : i64} {
  func.func @_ae_kernel(%arg0: i32, %arg1: memref<256x48xf32, #tpu.memory_space<vmem>>, %arg2: memref<48x128xf32, #tpu.memory_space<vmem>>, %arg3: memref<1x128xf32, #tpu.memory_space<vmem>>, %arg4: memref<128x128xf32, #tpu.memory_space<vmem>>, %arg5: memref<1x128xf32, #tpu.memory_space<vmem>>, %arg6: memref<128x128xf32, #tpu.memory_space<vmem>>, %arg7: memref<1x128xf32, #tpu.memory_space<vmem>>, %arg8: memref<128x128xf32, #tpu.memory_space<vmem>>, %arg9: memref<1x128xf32, #tpu.memory_space<vmem>>, %arg10: memref<128x128xf32, #tpu.memory_space<vmem>>, %arg11: memref<1x128xf32, #tpu.memory_space<vmem>>, %arg12: memref<128x128xf32, #tpu.memory_space<vmem>>, %arg13: memref<1x128xf32, #tpu.memory_space<vmem>>, %arg14: memref<128x128xf32, #tpu.memory_space<vmem>>, %arg15: memref<1x128xf32, #tpu.memory_space<vmem>>, %arg16: memref<128x48xf32, #tpu.memory_space<vmem>>, %arg17: memref<1x48xf32, #tpu.memory_space<vmem>>, %arg18: memref<128x128xf32, #tpu.memory_space<vmem>>, %arg19: memref<1x128xf32, #tpu.memory_space<vmem>>, %arg20: memref<48x128xf32, #tpu.memory_space<vmem>>, %arg21: memref<256x48xf32, #tpu.memory_space<vmem>>, %arg22: memref<256x128xf32, #tpu.memory_space<vmem>>, %arg23: memref<256x128xf32, #tpu.memory_space<vmem>>, %arg24: memref<256x128xf32, #tpu.memory_space<vmem>>, %arg25: memref<256x128xf32, #tpu.memory_space<vmem>>, %arg26: memref<256x128xf32, #tpu.memory_space<vmem>>, %arg27: memref<256x128xf32, #tpu.memory_space<vmem>>) attributes {dimension_semantics = [#tpu.dimension_semantics<parallel>], iteration_bounds = array<i64: 2>, scalar_prefetch = 0 : i64, scratch_operands = 0 : i64, tpu.core_type = #tpu.core_type<tc>, window_params = [{transform_indices = @transform_0, window_bounds = array<i64: 256, 48>}, {pipeline_mode = #tpu.pipeline_mode<synchronous>, transform_indices = @transform_1, window_bounds = array<i64: 48, 128>}, {pipeline_mode = #tpu.pipeline_mode<synchronous>, transform_indices = @transform_2, window_bounds = array<i64: 1, 128>}, {pipeline_mode = #tpu.pipeline_mode<synchronous>, transform_indices = @transform_3, window_bounds = array<i64: 128, 128>}, {pipeline_mode = #tpu.pipeline_mode<synchronous>, transform_indices = @transform_4, window_bounds = array<i64: 1, 128>}, {pipeline_mode = #tpu.pipeline_mode<synchronous>, transform_indices = @transform_5, window_bounds = array<i64: 128, 128>}, {pipeline_mode = #tpu.pipeline_mode<synchronous>, transform_indices = @transform_6, window_bounds = array<i64: 1, 128>}, {pipeline_mode = #tpu.pipeline_mode<synchronous>, transform_indices = @transform_7, window_bounds = array<i64: 128, 128>}, {pipeline_mode = #tpu.pipeline_mode<synchronous>, transform_indices = @transform_8, window_bounds = array<i64: 1, 128>}, {pipeline_mode = #tpu.pipeline_mode<synchronous>, transform_indices = @transform_9, window_bounds = array<i64: 128, 128>}, {pipeline_mode = #tpu.pipeline_mode<synchronous>, transform_indices = @transform_10, window_bounds = array<i64: 1, 128>}, {pipeline_mode = #tpu.pipeline_mode<synchronous>, transform_indices = @transform_11, window_bounds = array<i64: 128, 128>}, {pipeline_mode = #tpu.pipeline_mode<synchronous>, transform_indices = @transform_12, window_bounds = array<i64: 1, 128>}, {pipeline_mode = #tpu.pipeline_mode<synchronous>, transform_indices = @transform_13, window_bounds = array<i64: 128, 128>}, {pipeline_mode = #tpu.pipeline_mode<synchronous>, transform_indices = @transform_14, window_bounds = array<i64: 1, 128>}, {pipeline_mode = #tpu.pipeline_mode<synchronous>, transform_indices = @transform_15, window_bounds = array<i64: 128, 48>}, {pipeline_mode = #tpu.pipeline_mode<synchronous>, transform_indices = @transform_16, window_bounds = array<i64: 1, 48>}, {pipeline_mode = #tpu.pipeline_mode<synchronous>, transform_indices = @transform_17, window_bounds = array<i64: 128, 128>}, {pipeline_mode = #tpu.pipeline_mode<synchronous>, transform_indices = @transform_18, window_bounds = array<i64: 1, 128>}, {pipeline_mode = #tpu.pipeline_mode<synchronous>, transform_indices = @transform_19, window_bounds = array<i64: 48, 128>}, {transform_indices = @transform_20, window_bounds = array<i64: 256, 48>}, {transform_indices = @transform_21, window_bounds = array<i64: 256, 128>}, {transform_indices = @transform_22, window_bounds = array<i64: 256, 128>}, {transform_indices = @transform_23, window_bounds = array<i64: 256, 128>}, {transform_indices = @transform_24, window_bounds = array<i64: 256, 128>}, {transform_indices = @transform_25, window_bounds = array<i64: 256, 128>}, {transform_indices = @transform_26, window_bounds = array<i64: 256, 128>}]} {
    %c0 = arith.constant 0 : index
    %c0_0 = arith.constant 0 : index
    %0 = vector.load %arg1[%c0, %c0_0] : memref<256x48xf32, #tpu.memory_space<vmem>>, vector<256x48xf32>
    %c0_1 = arith.constant 0 : index
    %c0_2 = arith.constant 0 : index
    %1 = vector.load %arg2[%c0_1, %c0_2] : memref<48x128xf32, #tpu.memory_space<vmem>>, vector<48x128xf32>
    %cst = arith.constant dense<0.000000e+00> : vector<256x128xf32>
    %2 = tpu.matmul %0, %1, %cst {dimension_numbers = #tpu.dot_dimension_numbers<[1], [0], [0], [1], [0, 0, 1, 1], [], []>} : vector<256x48xf32>, vector<48x128xf32>, vector<256x128xf32> -> vector<256x128xf32>
    %c0_3 = arith.constant 0 : index
    %c0_4 = arith.constant 0 : index
    %3 = vector.load %arg3[%c0_3, %c0_4] : memref<1x128xf32, #tpu.memory_space<vmem>>, vector<1x128xf32>
    %4 = vector.broadcast %3 : vector<1x128xf32> to vector<256x128xf32>
    %5 = arith.addf %2, %4 : vector<256x128xf32>
    %cst_5 = arith.constant 0.000000e+00 : f32
    %6 = vector.broadcast %cst_5 : f32 to vector<256x128xf32>
    %7 = arith.maximumf %5, %6 : vector<256x128xf32>
    %c0_6 = arith.constant 0 : index
    %c0_7 = arith.constant 0 : index
    %8 = vector.load %arg4[%c0_6, %c0_7] : memref<128x128xf32, #tpu.memory_space<vmem>>, vector<128x128xf32>
    %cst_8 = arith.constant dense<0.000000e+00> : vector<256x128xf32>
    %9 = tpu.matmul %7, %8, %cst_8 {dimension_numbers = #tpu.dot_dimension_numbers<[1], [0], [0], [1], [0, 0, 1, 1], [], []>} : vector<256x128xf32>, vector<128x128xf32>, vector<256x128xf32> -> vector<256x128xf32>
    %c0_9 = arith.constant 0 : index
    %c0_10 = arith.constant 0 : index
    %10 = vector.load %arg5[%c0_9, %c0_10] : memref<1x128xf32, #tpu.memory_space<vmem>>, vector<1x128xf32>
    %11 = vector.broadcast %10 : vector<1x128xf32> to vector<256x128xf32>
    %12 = arith.addf %9, %11 : vector<256x128xf32>
    %cst_11 = arith.constant 0.000000e+00 : f32
    %13 = vector.broadcast %cst_11 : f32 to vector<256x128xf32>
    %14 = arith.maximumf %12, %13 : vector<256x128xf32>
    %c0_12 = arith.constant 0 : index
    %c0_13 = arith.constant 0 : index
    %15 = vector.load %arg6[%c0_12, %c0_13] : memref<128x128xf32, #tpu.memory_space<vmem>>, vector<128x128xf32>
    %cst_14 = arith.constant dense<0.000000e+00> : vector<256x128xf32>
    %16 = tpu.matmul %14, %15, %cst_14 {dimension_numbers = #tpu.dot_dimension_numbers<[1], [0], [0], [1], [0, 0, 1, 1], [], []>} : vector<256x128xf32>, vector<128x128xf32>, vector<256x128xf32> -> vector<256x128xf32>
    %c0_15 = arith.constant 0 : index
    %c0_16 = arith.constant 0 : index
    %17 = vector.load %arg7[%c0_15, %c0_16] : memref<1x128xf32, #tpu.memory_space<vmem>>, vector<1x128xf32>
    %18 = vector.broadcast %17 : vector<1x128xf32> to vector<256x128xf32>
    %19 = arith.addf %16, %18 : vector<256x128xf32>
    %cst_17 = arith.constant 0.000000e+00 : f32
    %20 = vector.broadcast %cst_17 : f32 to vector<256x128xf32>
    %21 = arith.maximumf %19, %20 : vector<256x128xf32>
    %c0_18 = arith.constant 0 : index
    %c0_19 = arith.constant 0 : index
    %22 = vector.load %arg8[%c0_18, %c0_19] : memref<128x128xf32, #tpu.memory_space<vmem>>, vector<128x128xf32>
    %cst_20 = arith.constant dense<0.000000e+00> : vector<256x128xf32>
    %23 = tpu.matmul %21, %22, %cst_20 {dimension_numbers = #tpu.dot_dimension_numbers<[1], [0], [0], [1], [0, 0, 1, 1], [], []>} : vector<256x128xf32>, vector<128x128xf32>, vector<256x128xf32> -> vector<256x128xf32>
    %c0_21 = arith.constant 0 : index
    %c0_22 = arith.constant 0 : index
    %24 = vector.load %arg9[%c0_21, %c0_22] : memref<1x128xf32, #tpu.memory_space<vmem>>, vector<1x128xf32>
    %25 = vector.broadcast %24 : vector<1x128xf32> to vector<256x128xf32>
    %26 = arith.addf %23, %25 : vector<256x128xf32>
    %c0_23 = arith.constant 0 : index
    %c0_24 = arith.constant 0 : index
    %27 = vector.load %arg10[%c0_23, %c0_24] : memref<128x128xf32, #tpu.memory_space<vmem>>, vector<128x128xf32>
    %cst_25 = arith.constant dense<0.000000e+00> : vector<256x128xf32>
    %28 = tpu.matmul %26, %27, %cst_25 {dimension_numbers = #tpu.dot_dimension_numbers<[1], [0], [0], [1], [0, 0, 1, 1], [], []>} : vector<256x128xf32>, vector<128x128xf32>, vector<256x128xf32> -> vector<256x128xf32>
    %c0_26 = arith.constant 0 : index
    %c0_27 = arith.constant 0 : index
    %29 = vector.load %arg11[%c0_26, %c0_27] : memref<1x128xf32, #tpu.memory_space<vmem>>, vector<1x128xf32>
    %30 = vector.broadcast %29 : vector<1x128xf32> to vector<256x128xf32>
    %31 = arith.addf %28, %30 : vector<256x128xf32>
    %cst_28 = arith.constant 0.000000e+00 : f32
    %32 = vector.broadcast %cst_28 : f32 to vector<256x128xf32>
    %33 = arith.maximumf %31, %32 : vector<256x128xf32>
    %c0_29 = arith.constant 0 : index
    %c0_30 = arith.constant 0 : index
    %34 = vector.load %arg12[%c0_29, %c0_30] : memref<128x128xf32, #tpu.memory_space<vmem>>, vector<128x128xf32>
    %cst_31 = arith.constant dense<0.000000e+00> : vector<256x128xf32>
    %35 = tpu.matmul %33, %34, %cst_31 {dimension_numbers = #tpu.dot_dimension_numbers<[1], [0], [0], [1], [0, 0, 1, 1], [], []>} : vector<256x128xf32>, vector<128x128xf32>, vector<256x128xf32> -> vector<256x128xf32>
    %c0_32 = arith.constant 0 : index
    %c0_33 = arith.constant 0 : index
    %36 = vector.load %arg13[%c0_32, %c0_33] : memref<1x128xf32, #tpu.memory_space<vmem>>, vector<1x128xf32>
    %37 = vector.broadcast %36 : vector<1x128xf32> to vector<256x128xf32>
    %38 = arith.addf %35, %37 : vector<256x128xf32>
    %cst_34 = arith.constant 0.000000e+00 : f32
    %39 = vector.broadcast %cst_34 : f32 to vector<256x128xf32>
    %40 = arith.maximumf %38, %39 : vector<256x128xf32>
    %c0_35 = arith.constant 0 : index
    %c0_36 = arith.constant 0 : index
    %41 = vector.load %arg14[%c0_35, %c0_36] : memref<128x128xf32, #tpu.memory_space<vmem>>, vector<128x128xf32>
    %cst_37 = arith.constant dense<0.000000e+00> : vector<256x128xf32>
    %42 = tpu.matmul %40, %41, %cst_37 {dimension_numbers = #tpu.dot_dimension_numbers<[1], [0], [0], [1], [0, 0, 1, 1], [], []>} : vector<256x128xf32>, vector<128x128xf32>, vector<256x128xf32> -> vector<256x128xf32>
    %c0_38 = arith.constant 0 : index
    %c0_39 = arith.constant 0 : index
    %43 = vector.load %arg15[%c0_38, %c0_39] : memref<1x128xf32, #tpu.memory_space<vmem>>, vector<1x128xf32>
    %44 = vector.broadcast %43 : vector<1x128xf32> to vector<256x128xf32>
    %45 = arith.addf %42, %44 : vector<256x128xf32>
    %cst_40 = arith.constant 0.000000e+00 : f32
    %46 = vector.broadcast %cst_40 : f32 to vector<256x128xf32>
    %47 = arith.maximumf %45, %46 : vector<256x128xf32>
    %c0_41 = arith.constant 0 : index
    %c0_42 = arith.constant 0 : index
    %48 = vector.load %arg16[%c0_41, %c0_42] : memref<128x48xf32, #tpu.memory_space<vmem>>, vector<128x48xf32>
    %cst_43 = arith.constant dense<0.000000e+00> : vector<256x48xf32>
    %49 = tpu.matmul %47, %48, %cst_43 {dimension_numbers = #tpu.dot_dimension_numbers<[1], [0], [0], [1], [0, 0, 1, 1], [], []>} : vector<256x128xf32>, vector<128x48xf32>, vector<256x48xf32> -> vector<256x48xf32>
    %c0_44 = arith.constant 0 : index
    %c0_45 = arith.constant 0 : index
    %50 = vector.load %arg17[%c0_44, %c0_45] : memref<1x48xf32, #tpu.memory_space<vmem>>, vector<1x48xf32>
    %51 = vector.broadcast %50 : vector<1x48xf32> to vector<256x48xf32>
    %52 = arith.addf %49, %51 : vector<256x48xf32>
    %53 = arith.mulf %26, %26 : vector<256x128xf32>
    %cst_46 = arith.constant dense<0.000000e+00> : vector<256xf32>
    %54 = vector.multi_reduction <add>, %53, %cst_46 [1] : vector<256x128xf32> to vector<256xf32>
    %55 = vector.shape_cast %54 : vector<256xf32> to vector<256x1xf32>
    %c0_47 = arith.constant 0 : index
    %c0_48 = arith.constant 0 : index
    %56 = vector.load %arg18[%c0_47, %c0_48] : memref<128x128xf32, #tpu.memory_space<vmem>>, vector<128x128xf32>
    %cst_49 = arith.constant dense<0.000000e+00> : vector<256x128xf32>
    %57 = tpu.matmul %26, %56, %cst_49 {dimension_numbers = #tpu.dot_dimension_numbers<[1], [0], [0], [1], [0, 0, 1, 1], [], []>} : vector<256x128xf32>, vector<128x128xf32>, vector<256x128xf32> -> vector<256x128xf32>
    %c0_50 = arith.constant 0 : index
    %c0_51 = arith.constant 0 : index
    %58 = vector.load %arg19[%c0_50, %c0_51] : memref<1x128xf32, #tpu.memory_space<vmem>>, vector<1x128xf32>
    %59 = vector.broadcast %55 : vector<256x1xf32> to vector<256x128xf32>
    %60 = vector.broadcast %58 : vector<1x128xf32> to vector<256x128xf32>
    %61 = arith.addf %59, %60 : vector<256x128xf32>
    %cst_52 = arith.constant 2.000000e+00 : f32
    %62 = vector.broadcast %cst_52 : f32 to vector<256x128xf32>
    %63 = arith.mulf %62, %57 : vector<256x128xf32>
    %64 = arith.subf %61, %63 : vector<256x128xf32>
    %cst_53 = arith.constant 0.000000e+00 : f32
    %65 = vector.broadcast %cst_53 : f32 to vector<256x128xf32>
    %66 = arith.maximumf %64, %65 : vector<256x128xf32>
    %cst_54 = arith.constant 1.000000e+00 : f32
    %67 = vector.broadcast %cst_54 : f32 to vector<256x128xf32>
    %68 = arith.addf %67, %66 : vector<256x128xf32>
    %cst_55 = arith.constant 1.000000e+00 : f32
    %69 = vector.broadcast %cst_55 : f32 to vector<256x128xf32>
    %70 = arith.divf %69, %68 : vector<256x128xf32>
    %71 = tpu.iota {dimensions = array<i32: 1>} : vector<256x128xi32>
    %c4_i32 = arith.constant 4 : i32
    %72 = vector.broadcast %c4_i32 : i32 to vector<256x128xi32>
    %73 = arith.cmpi slt, %71, %72 : vector<256x128xi32>
    %cst_56 = arith.constant 0.000000e+00 : f32
    %74 = vector.broadcast %cst_56 : f32 to vector<256x128xf32>
    %75 = arith.select %73, %70, %74 : vector<256x128xi1>, vector<256x128xf32>
    %cst_57 = arith.constant dense<0.000000e+00> : vector<256xf32>
    %76 = vector.multi_reduction <add>, %75, %cst_57 [1] : vector<256x128xf32> to vector<256xf32>
    %77 = vector.shape_cast %76 : vector<256xf32> to vector<256x1xf32>
    %78 = vector.broadcast %77 : vector<256x1xf32> to vector<256x128xf32>
    %79 = arith.divf %75, %78 : vector<256x128xf32>
    %c0_58 = arith.constant 0 : index
    %c0_59 = arith.constant 0 : index
    %80 = vector.load %arg20[%c0_58, %c0_59] : memref<48x128xf32, #tpu.memory_space<vmem>>, vector<48x128xf32>
    %cst_60 = arith.constant dense<0.000000e+00> : vector<256x128xf32>
    %81 = tpu.matmul %0, %80, %cst_60 {dimension_numbers = #tpu.dot_dimension_numbers<[1], [0], [0], [1], [0, 0, 1, 1], [], []>} : vector<256x48xf32>, vector<48x128xf32>, vector<256x128xf32> -> vector<256x128xf32>
    %c0_61 = arith.constant 0 : index
    %c0_62 = arith.constant 0 : index
    %82 = vector.load %arg21[%c0_61, %c0_62] : memref<256x48xf32, #tpu.memory_space<vmem>>, vector<256x48xf32>
    tpu.vector_store %arg21[%c0_61, %c0_62], %52 {strides = array<i32>} : memref<256x48xf32, #tpu.memory_space<vmem>>, vector<256x48xf32>,
    %c0_63 = arith.constant 0 : index
    %c0_64 = arith.constant 0 : index
    %83 = vector.load %arg22[%c0_63, %c0_64] : memref<256x128xf32, #tpu.memory_space<vmem>>, vector<256x128xf32>
    tpu.vector_store %arg22[%c0_63, %c0_64], %7 {strides = array<i32>} : memref<256x128xf32, #tpu.memory_space<vmem>>, vector<256x128xf32>,
    %c0_65 = arith.constant 0 : index
    %c0_66 = arith.constant 0 : index
    %84 = vector.load %arg23[%c0_65, %c0_66] : memref<256x128xf32, #tpu.memory_space<vmem>>, vector<256x128xf32>
    tpu.vector_store %arg23[%c0_65, %c0_66], %14 {strides = array<i32>} : memref<256x128xf32, #tpu.memory_space<vmem>>, vector<256x128xf32>,
    %c0_67 = arith.constant 0 : index
    %c0_68 = arith.constant 0 : index
    %85 = vector.load %arg24[%c0_67, %c0_68] : memref<256x128xf32, #tpu.memory_space<vmem>>, vector<256x128xf32>
    tpu.vector_store %arg24[%c0_67, %c0_68], %21 {strides = array<i32>} : memref<256x128xf32, #tpu.memory_space<vmem>>, vector<256x128xf32>,
    %c0_69 = arith.constant 0 : index
    %c0_70 = arith.constant 0 : index
    %86 = vector.load %arg25[%c0_69, %c0_70] : memref<256x128xf32, #tpu.memory_space<vmem>>, vector<256x128xf32>
    tpu.vector_store %arg25[%c0_69, %c0_70], %26 {strides = array<i32>} : memref<256x128xf32, #tpu.memory_space<vmem>>, vector<256x128xf32>,
    %c0_71 = arith.constant 0 : index
    %c0_72 = arith.constant 0 : index
    %87 = vector.load %arg26[%c0_71, %c0_72] : memref<256x128xf32, #tpu.memory_space<vmem>>, vector<256x128xf32>
    tpu.vector_store %arg26[%c0_71, %c0_72], %79 {strides = array<i32>} : memref<256x128xf32, #tpu.memory_space<vmem>>, vector<256x128xf32>,
    %c0_73 = arith.constant 0 : index
    %c0_74 = arith.constant 0 : index
    %88 = vector.load %arg27[%c0_73, %c0_74] : memref<256x128xf32, #tpu.memory_space<vmem>>, vector<256x128xf32>
    tpu.vector_store %arg27[%c0_73, %c0_74], %81 {strides = array<i32>} : memref<256x128xf32, #tpu.memory_space<vmem>>, vector<256x128xf32>,
    return
  }
  func.func @transform_0(%arg0: i32) -> (i32, i32) {
    %c0_i32 = arith.constant 0 : i32
    %c0_i32_0 = arith.constant 0 : i32
    return %arg0, %c0_i32 : i32, i32
  }
  func.func @transform_1(%arg0: i32) -> (i32, i32) {
    %c0_i32 = arith.constant 0 : i32
    %c0_i32_0 = arith.constant 0 : i32
    %c0_i32_1 = arith.constant 0 : i32
    return %c0_i32, %c0_i32_0 : i32, i32
  }
  func.func @transform_2(%arg0: i32) -> (i32, i32) {
    %c0_i32 = arith.constant 0 : i32
    %c0_i32_0 = arith.constant 0 : i32
    %c0_i32_1 = arith.constant 0 : i32
    return %c0_i32, %c0_i32_0 : i32, i32
  }
  func.func @transform_3(%arg0: i32) -> (i32, i32) {
    %c0_i32 = arith.constant 0 : i32
    %c0_i32_0 = arith.constant 0 : i32
    %c0_i32_1 = arith.constant 0 : i32
    return %c0_i32, %c0_i32_0 : i32, i32
  }
  func.func @transform_4(%arg0: i32) -> (i32, i32) {
    %c0_i32 = arith.constant 0 : i32
    %c0_i32_0 = arith.constant 0 : i32
    %c0_i32_1 = arith.constant 0 : i32
    return %c0_i32, %c0_i32_0 : i32, i32
  }
  func.func @transform_5(%arg0: i32) -> (i32, i32) {
    %c0_i32 = arith.constant 0 : i32
    %c0_i32_0 = arith.constant 0 : i32
    %c0_i32_1 = arith.constant 0 : i32
    return %c0_i32, %c0_i32_0 : i32, i32
  }
  func.func @transform_6(%arg0: i32) -> (i32, i32) {
    %c0_i32 = arith.constant 0 : i32
    %c0_i32_0 = arith.constant 0 : i32
    %c0_i32_1 = arith.constant 0 : i32
    return %c0_i32, %c0_i32_0 : i32, i32
  }
  func.func @transform_7(%arg0: i32) -> (i32, i32) {
    %c0_i32 = arith.constant 0 : i32
    %c0_i32_0 = arith.constant 0 : i32
    %c0_i32_1 = arith.constant 0 : i32
    return %c0_i32, %c0_i32_0 : i32, i32
  }
  func.func @transform_8(%arg0: i32) -> (i32, i32) {
    %c0_i32 = arith.constant 0 : i32
    %c0_i32_0 = arith.constant 0 : i32
    %c0_i32_1 = arith.constant 0 : i32
    return %c0_i32, %c0_i32_0 : i32, i32
  }
  func.func @transform_9(%arg0: i32) -> (i32, i32) {
    %c0_i32 = arith.constant 0 : i32
    %c0_i32_0 = arith.constant 0 : i32
    %c0_i32_1 = arith.constant 0 : i32
    return %c0_i32, %c0_i32_0 : i32, i32
  }
  func.func @transform_10(%arg0: i32) -> (i32, i32) {
    %c0_i32 = arith.constant 0 : i32
    %c0_i32_0 = arith.constant 0 : i32
    %c0_i32_1 = arith.constant 0 : i32
    return %c0_i32, %c0_i32_0 : i32, i32
  }
  func.func @transform_11(%arg0: i32) -> (i32, i32) {
    %c0_i32 = arith.constant 0 : i32
    %c0_i32_0 = arith.constant 0 : i32
    %c0_i32_1 = arith.constant 0 : i32
    return %c0_i32, %c0_i32_0 : i32, i32
  }
  func.func @transform_12(%arg0: i32) -> (i32, i32) {
    %c0_i32 = arith.constant 0 : i32
    %c0_i32_0 = arith.constant 0 : i32
    %c0_i32_1 = arith.constant 0 : i32
    return %c0_i32, %c0_i32_0 : i32, i32
  }
  func.func @transform_13(%arg0: i32) -> (i32, i32) {
    %c0_i32 = arith.constant 0 : i32
    %c0_i32_0 = arith.constant 0 : i32
    %c0_i32_1 = arith.constant 0 : i32
    return %c0_i32, %c0_i32_0 : i32, i32
  }
  func.func @transform_14(%arg0: i32) -> (i32, i32) {
    %c0_i32 = arith.constant 0 : i32
    %c0_i32_0 = arith.constant 0 : i32
    %c0_i32_1 = arith.constant 0 : i32
    return %c0_i32, %c0_i32_0 : i32, i32
  }
  func.func @transform_15(%arg0: i32) -> (i32, i32) {
    %c0_i32 = arith.constant 0 : i32
    %c0_i32_0 = arith.constant 0 : i32
    %c0_i32_1 = arith.constant 0 : i32
    return %c0_i32, %c0_i32_0 : i32, i32
  }
  func.func @transform_16(%arg0: i32) -> (i32, i32) {
    %c0_i32 = arith.constant 0 : i32
    %c0_i32_0 = arith.constant 0 : i32
    %c0_i32_1 = arith.constant 0 : i32
    return %c0_i32, %c0_i32_0 : i32, i32
  }
  func.func @transform_17(%arg0: i32) -> (i32, i32) {
    %c0_i32 = arith.constant 0 : i32
    %c0_i32_0 = arith.constant 0 : i32
    %c0_i32_1 = arith.constant 0 : i32
    return %c0_i32, %c0_i32_0 : i32, i32
  }
  func.func @transform_18(%arg0: i32) -> (i32, i32) {
    %c0_i32 = arith.constant 0 : i32
    %c0_i32_0 = arith.constant 0 : i32
    %c0_i32_1 = arith.constant 0 : i32
    return %c0_i32, %c0_i32_0 : i32, i32
  }
  func.func @transform_19(%arg0: i32) -> (i32, i32) {
    %c0_i32 = arith.constant 0 : i32
    %c0_i32_0 = arith.constant 0 : i32
    %c0_i32_1 = arith.constant 0 : i32
    return %c0_i32, %c0_i32_0 : i32, i32
  }
  func.func @transform_20(%arg0: i32) -> (i32, i32) {
    %c0_i32 = arith.constant 0 : i32
    %c0_i32_0 = arith.constant 0 : i32
    return %arg0, %c0_i32 : i32, i32
  }
  func.func @transform_21(%arg0: i32) -> (i32, i32) {
    %c0_i32 = arith.constant 0 : i32
    %c0_i32_0 = arith.constant 0 : i32
    return %arg0, %c0_i32 : i32, i32
  }
  func.func @transform_22(%arg0: i32) -> (i32, i32) {
    %c0_i32 = arith.constant 0 : i32
    %c0_i32_0 = arith.constant 0 : i32
    return %arg0, %c0_i32 : i32, i32
  }
  func.func @transform_23(%arg0: i32) -> (i32, i32) {
    %c0_i32 = arith.constant 0 : i32
    %c0_i32_0 = arith.constant 0 : i32
    return %arg0, %c0_i32 : i32, i32
  }
  func.func @transform_24(%arg0: i32) -> (i32, i32) {
    %c0_i32 = arith.constant 0 : i32
    %c0_i32_0 = arith.constant 0 : i32
    return %arg0, %c0_i32 : i32, i32
  }
  func.func @transform_25(%arg0: i32) -> (i32, i32) {
    %c0_i32 = arith.constant 0 : i32
    %c0_i32_0 = arith.constant 0 : i32
    return %arg0, %c0_i32 : i32, i32
  }
  func.func @transform_26(%arg0: i32) -> (i32, i32) {
    %c0_i32 = arith.constant 0 : i32
    %c0_i32_0 = arith.constant 0 : i32
    return %arg0, %c0_i32 : i32, i32
  }
}

</mosaic_0001>

<bundles_post_ra>
// kernel: tpu_custom_call.1
= control target key start
LH: loop header
LB: loop body
LE: loop exit
PB: predicated region body
PF: predicated region fallthrough
CT: control target
= control target key end

     0   :  { %s8139_s0 = inlined_call_operand.vmem [shape: f32[512,48], index: 0, kind: input, shape index: {}]   ;;  %s8140_s1 = inlined_call_operand.vmem [shape: f32[48,128], index: 1, kind: input, shape index: {}]   ;;  %s8141_s2 = inlined_call_operand.vmem [shape: f32[1,128], index: 2, kind: input, shape index: {}]   ;;  %s8142_s3 = inlined_call_operand.vmem [shape: f32[128,128], index: 3, kind: input, shape index: {}]   ;;  %s8143_s4 = inlined_call_operand.vmem [shape: f32[1,128], index: 4, kind: input, shape index: {}]   ;;  %s8144_s5 = inlined_call_operand.vmem [shape: f32[128,128], index: 5, kind: input, shape index: {}]   ;;  %s8145_s6 = inlined_call_operand.vmem [shape: f32[1,128], index: 6, kind: input, shape index: {}]   ;;  %s8146_s7 = inlined_call_operand.vmem [shape: f32[128,128], index: 7, kind: input, shape index: {}]   ;;  %s8147_s8 = inlined_call_operand.vmem [shape: f32[1,128], index: 8, kind: input, shape index: {}]   ;;  %s8148_s9 = inlined_call_operand.vmem [shape: f32[128,128], index: 9, kind: input, shape index: {}]   ;;  %s8149_s10 = inlined_call_operand.vmem [shape: f32[1,128], index: 10, kind: input, shape index: {}]   ;;  %s8150_s11 = inlined_call_operand.vmem [shape: f32[128,128], index: 11, kind: input, shape index: {}]   ;;  %s8151_s12 = inlined_call_operand.vmem [shape: f32[1,128], index: 12, kind: input, shape index: {}]   ;;  %s8152_s13 = inlined_call_operand.vmem [shape: f32[128,128], index: 13, kind: input, shape index: {}]   ;;  %s8153_s14 = inlined_call_operand.vmem [shape: f32[1,128], index: 14, kind: input, shape index: {}]   ;;  %s8154_s15 = inlined_call_operand.vmem [shape: f32[128,48], index: 15, kind: input, shape index: {}]   ;;  %s8155_s16 = inlined_call_operand.vmem [shape: f32[1,48], index: 16, kind: input, shape index: {}]   ;;  %s8156_s17 = inlined_call_operand.hbm [shape: f32[128,128], index: 17, kind: input, shape index: {}]   ;;  %s8157_s18 = inlined_call_operand.vmem [shape: f32[1,128], index: 18, kind: input, shape index: {}]   ;;  %s8158_s19 = inlined_call_operand.vmem [shape: f32[48,128], index: 19, kind: input, shape index: {}]   ;;  %s8159_s20 = inlined_call_operand.vmem [shape: f32[512,48], index: 20, kind: output, shape index: {0}]   ;;  %s8160_s21 = inlined_call_operand.hbm [shape: f32[512,128], index: 21, kind: output, shape index: {1}]   ;;  %s8161_s22 = inlined_call_operand.hbm [shape: f32[512,128], index: 22, kind: output, shape index: {2}]   ;;  %s8162_s23 = inlined_call_operand.hbm [shape: f32[512,128], index: 23, kind: output, shape index: {3}]   ;;  %s8163_s24 = inlined_call_operand.hbm [shape: f32[512,128], index: 24, kind: output, shape index: {4}]   ;;  %s8164_s25 = inlined_call_operand.hbm [shape: f32[512,128], index: 25, kind: output, shape index: {5}]   ;;  %s8165_s26 = inlined_call_operand.hbm [shape: f32[512,128], index: 26, kind: output, shape index: {6}]  }
   0x1   :  { %8190 = sst [smem:[#allocation26_spill]] %s8139_s0 }
   0x2   :  { %8191 = sst [smem:[#allocation27_spill]] %s8140_s1 }
   0x3   :  { %8192 = sst [smem:[#allocation28_spill]] %s8141_s2 }
   0x4   :  { %8193 = sst [smem:[#allocation29_spill]] %s8142_s3 }
   0x5   :  { %8194 = sst [smem:[#allocation30_spill]] %s8143_s4 }
   0x6   :  { %8195 = sst [smem:[#allocation31_spill]] %s8144_s5 }
   0x7   :  { %8196 = sst [smem:[#allocation32_spill]] %s8145_s6 }
   0x8   :  { %8197 = sst [smem:[#allocation33_spill]] %s8146_s7 }
   0x9   :  { %8198 = sst [smem:[#allocation34_spill]] %s8147_s8 }
   0xa   :  { %8199 = sst [smem:[#allocation35_spill]] %s8148_s9 }
   0xb   :  { %8200 = sst [smem:[#allocation36_spill]] %s8149_s10 }
   0xc   :  { %8201 = sst [smem:[#allocation37_spill]] %s8150_s11 }
   0xd   :  { %8202 = sst [smem:[#allocation38_spill]] %s8151_s12 }
   0xe   :  { %8203 = sst [smem:[#allocation39_spill]] %s8152_s13 }
   0xf   :  { %8204 = sst [smem:[#allocation40_spill]] %s8153_s14 }
  0x10   :  { %8205 = sst [smem:[#allocation41_spill]] %s8154_s15 }
  0x11   :  { %8206 = sst [smem:[#allocation42_spill]] %s8156_s17 }
  0x12   :  { %8207 = sst [smem:[#allocation43_spill]] %s8157_s18 }
  0x13   :  { %8208 = sst [smem:[#allocation44_spill]] %s8158_s19 }
  0x14   :  { %32 = vsyncpa [#allocation3], 0 }
  0x15   :  { %33 = vsyncpa [#allocation4], 0 }
  0x16   :  { %35 = vsyncpa [#allocation4 + $0x1], 0 }
  0x17   :  { %36 = vsyncpa [#allocation7], 0 }
  0x18   :  { %38 = vsyncpa [#allocation7 + $0x1], 0 }
  0x19   :  { %39 = vsyncpa [#allocation10], 0 }
  0x1a   :  { %41 = vsyncpa [#allocation10 + $0x1], 0 }
  0x1b   :  { %42 = vsyncpa [#allocation13], 0 }
  0x1c   :  { %44 = vsyncpa [#allocation13 + $0x1], 0  ;;  %s5219_s27 = smov 0   ;;  %s5221_s3 = smov 0  }
  0x1d   :  { %s5223_s7 = smov 0   ;;  %s5225_s28 = smov 0  }
  0x1e LB: > { %8209 = sst [smem:[#allocation19_spill]] %s5065_s27  ;;  %s5240_s8 = sadd.s32 4294967295, %s5077_s28   ;;  %s5077_s28 = sphi %s5225_s28, %s8294_s28   ;;  %s5073_s7 = sphi %s5223_s7, %s8297_s7   ;;  %s5069_s3 = sphi %s5221_s3, %s8296_s3   ;;  %s5065_s27 = sphi %s5219_s27, %s8295_s27  }
  0x1f   : > { %8210 = sst [smem:[#allocation20_spill]] %s5069_s3  ;;  %s8171_s4 = sadd.s32 4294967294, %s5077_s28  }
  0x20   : > { %8211 = sst [smem:[#allocation21_spill]] %s5073_s7  ;;  %s5244_s29 = sadd.s32 1, %s5077_s28  }
  0x21   : > { %8212 = sst [smem:[#allocation22_spill]] %s5077_s28  ;;  %s508_s0 = sadd.s32 1, %s5073_s7 }
  0x22   : > { %8213 = sst [smem:[#allocation23_spill]] %s5244_s29  ;;  %s505_s9 = ssub.s32 %s5077_s28, %s5244_s29 }
  0x23   : > { %p518_p0 = scmp.ne.s32.totalorder %s5073_s7, %s5069_s3  ;;  %p506_p1 = scmp.eq.s32.totalorder %s505_s9, 0 }
  0x24   : > { %p519_p2 = scmp.eq.s32.totalorder %s5240_s8, 1  ;;  %p524_p3 = scmp.ne.s32.totalorder %s5069_s3, %s5065_s27 }
  0x25   : > { %p525_p4 = scmp.eq.s32.totalorder %s8171_s4, 1  ;;  %p4433_p7 = scmp.ge.s32.totalorder %s5077_s28, 1 }
  0x26   : > { %s5257_s30 = scalar_select %p506_p1, %s5073_s7, %s508_s0  }
  0x27   : > { %p5259_p5 = por %p519_p2, %p518_p0  ;;  %p5263_p6 = por %p525_p4, %p524_p3 }
  0x28   : > { %8214 = sst [smem:[#allocation24_spill]] %s5257_s30  ;;  %p662_p8 = scmp.lt.s32.totalorder %s5077_s28, 3 }
  0x29   : > { %s8216_s5 = scalar_select %p5263_p6, 1, 0 }
  0x2a   : > { %p4605_p9 = scmp.eq.s32.totalorder %s5240_s8, 0  ;;  %p663_p10 = pnand %p4433_p7, %p662_p8 }
  0x2b   : > { %8217 = sst [smem:[#allocation25_spill]] %s8216_s5  ;;  %s5079_s0 = smov [#allocation2]  }
  0x2c   : > { %s8218_s17 = sld [smem:[#allocation42_spill]]  ;;  %p4582_p11 = pneg %p663_p10 }
  0x2d   : > { %s723_s9 = sshll.u32 %s5079_s0, 4  ;;  %s5080_s4 = smov 128   ;;  %s724_s9 = int_to_ptr.vmem [resolvable:$true] %s723_s9 }
  0x2e   : > { %p4583_p12 = pnand %p4605_p9, %p4582_p11  ;;  %s5081_s30 = smov 8  }
  0x2f   : > { %754 = sbr.rel (%p663_p10) target bundleno = 1560 (0x618), region = 100 }
  0x32   : > { %s721_s1 = sshll.u32 %s8218_s17, 4  ;;  %s722_s1 = int_to_ptr.hbm [resolvable:$true] %s721_s1 }
  0x33   : > { %4585 = dma.hbm_to_vmem [thread:$0]  (!%p4583_p12), %s722_s1, 2048, %s724_s9, [#allocation3], %s5080_s4, %s5080_s4, %s5081_s30  }
  0x34   : > { %5044 = dma.done.wait (%p4605_p9), [#allocation3], 2048  }
  0x35   : > { %5046 = vsyncadd (%p4605_p9), [#allocation3], 4294965248  ;;  %s4444_s10 = sshll.u32 %s5240_s8, 5  ;;  %s8219_s17 = sld [smem:[#allocation27_spill]]  ;;  %vm915_vm0 = vcmask 392192  }
  0x36   : > { %p856_p13 = scmp.lt.s32.totalorder %s4444_s10, 63  ;;  %s8220_s27 = sld [smem:[#allocation26_spill]] }
  0x37   : > { %s8221_s1 = sld [smem:[#allocation29_spill]] }
  0x38   : > { %s8299_s10 = smov (!%p856_p13, %s4444_s10), 63  ;;  %s8222_s0 = sld [smem:[#allocation28_spill]] }
  0x39   : > { %s8179_s9 = sshll.u32 %s8299_s10, 3  ;;  %s8223_s30 = sld [smem:[#allocation31_spill]] }
  0x3a   : > { %s8225_s29 = sld [smem:[#allocation33_spill]] }
  0x3b   : > { %v910_v0 = vld [vmem:[%s8219_s17 + $0x28] sm:$0xff]  ;;  %v909_v1 = vld [vmem:[%s8219_s17 + $0x20] sm:$0xff]  ;;  %v908_v2 = vld [vmem:[%s8219_s17 + $0x18] sm:$0xff]  ;;  %s8228_s11 = sld [smem:[#allocation37_spill]] }
  0x3c   : > { %1022 = vmatpush.msra.mxu0 %v910_v0  ;;  %4538 = vmatpush.msra.mxu3 %v910_v0  ;;  %v907_v3 = vld [vmem:[%s8219_s17 + $0x10] sm:$0xff]  ;;  %v906_v4 = vld [vmem:[%s8219_s17 + $0x8] sm:$0xff]  ;;  %s5303_s28 = scalar_lea.vmem %s8220_s27, %s8179_s9  ;;  %v905_v5 = vld [vmem:[%s8219_s17] sm:$0xff]  ;;  %s5394_s27 = sand.u32 1, %s5069_s3  }
  0x3d   : > { %v873_v6 = vld [vmem:[%s5303_s28] sm:$0xff]  ;;  %v874_v7 = vld [vmem:[%s5303_s28 + $0x8] sm:$0xff]  ;;  %v875_v8 = vld [vmem:[%s5303_s28 + $0x10] sm:$0xff]  ;;  %s5403_s7 = sshll.u32 %s5394_s27, 8  ;;  %s8224_s9 = sld [smem:[#allocation30_spill]] }
  0x3e   : > { %1023 = vmatpush.msra.mxu0 %v909_v1  ;;  %4539 = vmatpush.msra.mxu3 %v909_v1  ;;  %v876_v9 = vld [vmem:[%s5303_s28 + $0x18] sm:$0xff]  ;;  %v877_v10 = vld [vmem:[%s5303_s28 + $0x20] sm:$0xff]  ;;  %v878_v11 = vld [vmem:[%s5303_s28 + $0x28] sm:$0xff]  ;;  %s5411_s4 = scalar_lea.vmem [#allocation5], %s5403_s7  ;;  %s8226_s17 = sld [smem:[#allocation35_spill]] }
  0x3f   : > { %v879_v12 = vld [vmem:[%s5303_s28 + $0x30] sm:$0xff]  ;;  %v880_v13 = vld [vmem:[%s5303_s28 + $0x38] sm:$0xff]  ;;  %v881_v14 = vld [vmem:[%s5303_s28 + $0x40] sm:$0xff]  ;;  %s8229_s13 = sld [smem:[#allocation39_spill]]  ;;  %s6005_s6 = scalar_lea.vmem [#allocation9], %s5403_s7 }
  0x40   : > { %1024 = vmatpush.msra.mxu0 %v908_v2  ;;  %4540 = vmatpush.msra.mxu3 %v908_v2  ;;  %v1172_v15 = vld [vmem:[%s8221_s1 + $0x78] sm:$0xff]  ;;  %v1171_v16 = vld [vmem:[%s8221_s1 + $0x70] sm:$0xff]  ;;  %v1170_v17 = vld [vmem:[%s8221_s1 + $0x68] sm:$0xff]  ;;  %s8231_s15 = sld [smem:[#allocation41_spill]]  ;;  %s6851_s5 = scalar_lea.vmem [#allocation12], %s5403_s7 }
  0x41   : > { %1177 = vmatpush.msra.mxu1 %v1172_v15  ;;  %4544 = vmatpush.msra.mxu2 %v1172_v15  ;;  %v882_v18 = vld [vmem:[%s5303_s28 + $0x48] sm:$0xff]  ;;  %v1169_v19 = vld [vmem:[%s8221_s1 + $0x60] sm:$0xff]  ;;  %v1168_v20 = vld [vmem:[%s8221_s1 + $0x58] sm:$0xff]  ;;  %s8233_s19 = sld [smem:[#allocation44_spill]] }
  0x42   : > { %1025 = vmatpush.msra.mxu0 %v907_v3  ;;  %4541 = vmatpush.msra.mxu3 %v907_v3  ;;  %v1167_v21 = vld [vmem:[%s8221_s1 + $0x50] sm:$0xff]  ;;  %v1166_v22 = vld [vmem:[%s8221_s1 + $0x48] sm:$0xff]  ;;  %v1165_v24 = vld [vmem:[%s8221_s1 + $0x40] sm:$0xff]  ;;  %s8234_s12 = sld [smem:[#allocation38_spill]] }
  0x43   : > { %1178 = vmatpush.msra.mxu1 %v1171_v16  ;;  %4545 = vmatpush.msra.mxu2 %v1171_v16  ;;  %v883_v23 = vld [vmem:[%s5303_s28 + $0x50] sm:$0xff]  ;;  %v1164_v25 = vld [vmem:[%s8221_s1 + $0x38] sm:$0xff]  ;;  %v1162_v27 = vld [vmem:[%s8221_s1 + $0x28] sm:$0xff]  ;;  %s8235_s18 = sld [smem:[#allocation43_spill]] }
  0x44   : > { %1026 = vmatpush.msra.mxu0 %v906_v4  ;;  %4542 = vmatpush.msra.mxu3 %v906_v4  ;;  %v1163_v26 = vld [vmem:[%s8221_s1 + $0x30] sm:$0xff]  ;;  %v884_v28 = vld [vmem:[%s5303_s28 + $0x58] sm:$0xff]  ;;  %v1161_v29 = vld [vmem:[%s8221_s1 + $0x20] sm:$0xff]  ;;  %s8236_s14 = sld [smem:[#allocation40_spill]] }
  0x45   : > { %1179 = vmatpush.msra.mxu1 %v1170_v17  ;;  %4546 = vmatpush.msra.mxu2 %v1170_v17  ;;  %v1160_v30 = vld [vmem:[%s8221_s1 + $0x18] sm:$0xff]  ;;  %v1159_v31 = vld [vmem:[%s8221_s1 + $0x10] sm:$0xff]  ;;  %v885_v32 = vld [vmem:[%s5303_s28 + $0x60] sm:$0xff] }
  0x46   : > { %1027 = vmatpush.msra.mxu0 %v905_v5  ;;  %4543 = vmatpush.msra.mxu3 %v905_v5  ;;  %v1158_v33 = vld [vmem:[%s8221_s1 + $0x8] sm:$0xff]  ;;  %v1157_v34 = vld [vmem:[%s8221_s1] sm:$0xff]  ;;  %v891_v36 = vld [vmem:[%s5303_s28 + $0x90] sm:$0xff]  ;;  %s8230_s1 = sld [smem:[#allocation34_spill]] }
  0x47   : > { %4448 = vmatmul.msk.f32.vlgmr.msra.gmra.mxu0 %vm915_vm0, %v873_v6  ;;  %1180 = vmatpush.msra.mxu1 %v1169_v19  ;;  %v886_v35 = vld [vmem:[%s5303_s28 + $0x68] sm:$0xff]  ;;  %v887_v37 = vld [vmem:[%s5303_s28 + $0x70] sm:$0xff]  ;;  %v892_v38 = vld [vmem:[%s5303_s28 + $0x98] sm:$0xff] }
  0x48   : > { %4547 = vmatpush.msra.mxu2 %v1169_v19  ;;  %4466 = vmatmul.msk.f32.vlgmr.msra.gmra.mxu3 %vm915_vm0, %v891_v36  ;;  %v888_v39 = vld [vmem:[%s5303_s28 + $0x78] sm:$0xff]  ;;  %v893_v40 = vld [vmem:[%s5303_s28 + $0xa0] sm:$0xff]  ;;  %v894_v45 = vld [vmem:[%s5303_s28 + $0xa8] sm:$0xff] }
  0x49   : > { %1181 = vmatpush.msra.mxu1 %v1168_v20  ;;  %v5400_v41 = vld [vmem:[%s8222_s0] ss:$0 sm:$0xff]  ;;  %v890_v48 = vld [vmem:[%s5303_s28 + $0x88] sm:$0xff]  ;;  %v895_v50 = vld [vmem:[%s5303_s28 + $0xb0] sm:$0xff]  ;;  %s5499_s0 = scalar_lea.vmem [#allocation6], %s5403_s7 }
  0x4a   : > { %4548 = vmatpush.msra.mxu2 %v1168_v20  ;;  %v889_v43 = vld [vmem:[%s5303_s28 + $0x80] sm:$0xff]  ;;  %v896_v54 = vld [vmem:[%s5303_s28 + $0xb8] sm:$0xff]  ;;  %v898_v62 = vld [vmem:[%s5303_s28 + $0xc8] sm:$0xff] }
  0x4b   : > { %1182 = vmatpush.msra.mxu1 %v1167_v21  ;;  %v897_v58 = vld [vmem:[%s5303_s28 + $0xc0] sm:$0xff]  ;;  %v899_v2 = vld [vmem:[%s5303_s28 + $0xd0] sm:$0xff]  ;;  %v900_v6 = vld [vmem:[%s5303_s28 + $0xd8] sm:$0xff] }
  0x4c   : > { %4549 = vmatpush.msra.mxu2 %v1167_v21 }
  0x4d   : > { %1183 = vmatpush.msra.mxu1 %v1166_v22 }
  0x4e   : > { %4550 = vmatpush.msra.mxu2 %v1166_v22  ;;  %v904_v22 = vld [vmem:[%s5303_s28 + $0xf8] sm:$0xff] }
  0x4f   : > { %4449 = vmatmul.msk.f32.gmra.mxu0 %vm915_vm0, %v874_v7  ;;  %1184 = vmatpush.msra.mxu1 %v1165_v24 }
  0x50   : > { %4551 = vmatpush.msra.mxu2 %v1165_v24  ;;  %4467 = vmatmul.msk.f32.gmra.mxu3 %vm915_vm0, %v892_v38 }
  0x51   : > { %1185 = vmatpush.msra.mxu1 %v1164_v25 }
  0x52   : > { %4552 = vmatpush.msra.mxu2 %v1164_v25 }
  0x53   : > { %1186 = vmatpush.msra.mxu1 %v1163_v26 }
  0x54   : > { %4553 = vmatpush.msra.mxu2 %v1163_v26 }
  0x55   : > { %1187 = vmatpush.msra.mxu1 %v1162_v27 }
  0x56   : > { %4554 = vmatpush.msra.mxu2 %v1162_v27 }
  0x57   : > { %4450 = vmatmul.msk.f32.gmra.mxu0 %vm915_vm0, %v875_v8  ;;  %1188 = vmatpush.msra.mxu1 %v1161_v29 }
  0x58   : > { %4555 = vmatpush.msra.mxu2 %v1161_v29  ;;  %4468 = vmatmul.msk.f32.gmra.mxu3 %vm915_vm0, %v893_v40 }
  0x59   : > { %1189 = vmatpush.msra.mxu1 %v1160_v30 }
  0x5a   : > { %4556 = vmatpush.msra.mxu2 %v1160_v30  ;;  %v1337_v30 = vld [vmem:[%s8223_s30 + $0x78] sm:$0xff] }
  0x5b   : > { %1190 = vmatpush.msra.mxu1 %v1159_v31 }
  0x5c   : > { %4557 = vmatpush.msra.mxu2 %v1159_v31 }
  0x5d   : > { %1191 = vmatpush.msra.mxu1 %v1158_v33 }
  0x5e   : > { %4558 = vmatpush.msra.mxu2 %v1158_v33 }
  0x5f   : > { %4451 = vmatmul.msk.f32.gmra.mxu0 %vm915_vm0, %v876_v9  ;;  %1192 = vmatpush.msra.mxu1 %v1157_v34 }
  0x60   : > { %4559 = vmatpush.msra.mxu2 %v1157_v34  ;;  %4469 = vmatmul.msk.f32.gmra.mxu3 %vm915_vm0, %v894_v45  ;;  %v1336_v34 = vld [vmem:[%s8223_s30 + $0x70] sm:$0xff] }
  0x62   : > { %1342 = vmatpush.msrb.mxu2 %v1337_v30 }
  0x64   : > { %1343 = vmatpush.msrb.mxu2 %v1336_v34  ;;  %v1328_v34 = vld [vmem:[%s8223_s30 + $0x30] sm:$0xff] }
  0x67   : > { %4452 = vmatmul.msk.f32.gmra.mxu0 %vm915_vm0, %v877_v10  ;;  %v901_v10 = vld [vmem:[%s5303_s28 + $0xe0] sm:$0xff] }
  0x68   : > { %4470 = vmatmul.msk.f32.gmra.mxu3 %vm915_vm0, %v895_v50  ;;  %v5485_v50 = vld [vmem:[%s8224_s9] ss:$0 sm:$0xff]  ;;  %s7845_s9 = sshll.u32 %s5240_s8, 8 }
  0x6f   : > { %4453 = vmatmul.msk.f32.gmra.mxu0 %vm915_vm0, %v878_v11 }
  0x70   : > { %4471 = vmatmul.msk.f32.gmra.mxu3 %vm915_vm0, %v896_v54 }
  0x77   : > { %4454 = vmatmul.msk.f32.gmra.mxu0 %vm915_vm0, %v879_v12 }
  0x78   : > { %4472 = vmatmul.msk.f32.gmra.mxu3 %vm915_vm0, %v897_v58 }
  0x7f   : > { %4455 = vmatmul.msk.f32.gmra.mxu0 %vm915_vm0, %v880_v13 }
  0x80   : > { %4473 = vmatmul.msk.f32.gmra.mxu3 %vm915_vm0, %v898_v62 }
  0x87   : > { %4456 = vmatmul.msk.f32.gmra.mxu0 %vm915_vm0, %v881_v14  ;;  %v902_v14 = vld [vmem:[%s5303_s28 + $0xe8] sm:$0xff] }
  0x88   : > { %4474 = vmatmul.msk.f32.gmra.mxu3 %vm915_vm0, %v899_v2 }
  0x8f   : > { %4457 = vmatmul.msk.f32.gmra.mxu0 %vm915_vm0, %v882_v18  ;;  %v903_v18 = vld [vmem:[%s5303_s28 + $0xf0] sm:$0xff] }
  0x90   : > { %4475 = vmatmul.msk.f32.gmra.mxu3 %vm915_vm0, %v900_v6 }
  0x97   : > { %4458 = vmatmul.msk.f32.gmra.mxu0 %vm915_vm0, %v883_v23 }
  0x98   : > { %4476 = vmatmul.msk.f32.gmra.mxu3 %vm915_vm0, %v901_v10 }
  0x9f   : > { %4459 = vmatmul.msk.f32.gmra.mxu0 %vm915_vm0, %v884_v28 }
  0xa0   : > { %4477 = vmatmul.msk.f32.gmra.mxu3 %vm915_vm0, %v902_v14 }
  0xa7   : > { %4460 = vmatmul.msk.f32.gmra.mxu0 %vm915_vm0, %v885_v32 }
  0xa8   : > { %4478 = vmatmul.msk.f32.gmra.mxu3 %vm915_vm0, %v903_v18 }
  0xaf   : > { %4461 = vmatmul.msk.f32.gmra.mxu0 %vm915_vm0, %v886_v35 }
  0xb0   : > { %4479 = vmatmul.msk.f32.gmra.mxu3 %vm915_vm0, %v904_v22 }
  0xb7   : > { %4462 = vmatmul.msk.f32.gmra.mxu0 %vm915_vm0, %v887_v37 }
  0xbf   : > { %4463 = vmatmul.msk.f32.gmra.mxu0 %vm915_vm0, %v888_v39 }
  0xc4   : > { %v1029_v42 = vpop.f32.mrf.mxu0 }
  0xc5   : > { %v1030_v44 = vadd.f32 %v5400_v41, %v1029_v42  ;;  %v1335_v42 = vld [vmem:[%s8223_s30 + $0x68] sm:$0xff] }
  0xc6   : > { %1344 = vmatpush.msrb.mxu2 %v1335_v42  ;;  %v1327_v42 = vld [vmem:[%s8223_s30 + $0x28] sm:$0xff] }
  0xc7   : > { %4464 = vmatmul.msk.f32.gmra.mxu0 %vm915_vm0, %v889_v43  ;;  %v1125_v46 = vmax.f32 %v1030_v44, 0.0 }
  0xc9   : > { %1193 = vmatmul.f32.vlgmr.msra.gmra.mxu1 %v1125_v46  ;;  %3847 = vst [vmem:[%s5411_s4] sm:$0xff] %v1125_v46 }
  0xcb   : > { %v1083_v35 = vpop.f32.mrf.mxu3 }
  0xcc   : > { %v1032_v47 = vpop.f32.mrf.mxu0  ;;  %v1084_v37 = vadd.f32 %v5400_v41, %v1083_v35 }
  0xcd   : > { %v1033_v49 = vadd.f32 %v5400_v41, %v1032_v47 }
  0xce   : > { %v1143_v40 = vmax.f32 %v1084_v37, 0.0 }
  0xcf   : > { %4465 = vmatmul.msk.f32.gmra.mxu0 %vm915_vm0, %v890_v48  ;;  %v1126_v51 = vmax.f32 %v1033_v49, 0.0  ;;  %v1334_v49 = vld [vmem:[%s8223_s30 + $0x60] sm:$0xff] }
  0xd0   : > { %3865 = vst [vmem:[%s5411_s4 + $0x90] sm:$0xff] %v1143_v40  ;;  %1345 = vmatpush.msrb.mxu2 %v1334_v49  ;;  %v1326_v49 = vld [vmem:[%s8223_s30 + $0x20] sm:$0xff] }
  0xd1   : > { %1196 = vmatmul.f32.gmra.mxu1 %v1126_v51  ;;  %3848 = vst [vmem:[%s5411_s4 + $0x8] sm:$0xff] %v1126_v51 }
  0xd3   : > { %v1086_v43 = vpop.f32.mrf.mxu3 }
  0xd4   : > { %v1035_v52 = vpop.f32.mrf.mxu0  ;;  %v1087_v45 = vadd.f32 %v5400_v41, %v1086_v43 }
  0xd5   : > { %v1036_v53 = vadd.f32 %v5400_v41, %v1035_v52 }
  0xd6   : > { %v1144_v48 = vmax.f32 %v1087_v45, 0.0 }
  0xd7   : > { %v1127_v55 = vmax.f32 %v1036_v53, 0.0 }
  0xd8   : > { %3866 = vst [vmem:[%s5411_s4 + $0x98] sm:$0xff] %v1144_v48 }
  0xd9   : > { %1199 = vmatmul.f32.gmra.mxu1 %v1127_v55  ;;  %3849 = vst [vmem:[%s5411_s4 + $0x10] sm:$0xff] %v1127_v55 }
  0xdb   : > { %v1089_v51 = vpop.f32.mrf.mxu3 }
  0xdc   : > { %v1038_v56 = vpop.f32.mrf.mxu0  ;;  %v1090_v53 = vadd.f32 %v5400_v41, %v1089_v51 }
  0xdd   : > { %v1039_v57 = vadd.f32 %v5400_v41, %v1038_v56 }
  0xde   : > { %v1145_v58 = vmax.f32 %v1090_v53, 0.0 }
  0xdf   : > { %v1128_v59 = vmax.f32 %v1039_v57, 0.0 }
  0xe0   : > { %3867 = vst [vmem:[%s5411_s4 + $0xa0] sm:$0xff] %v1145_v58 }
  0xe1   : > { %1202 = vmatmul.f32.gmra.mxu1 %v1128_v59  ;;  %3850 = vst [vmem:[%s5411_s4 + $0x18] sm:$0xff] %v1128_v59 }
  0xe4   : > { %v1041_v60 = vpop.f32.mrf.mxu0 }
  0xe5   : > { %v1042_v61 = vadd.f32 %v5400_v41, %v1041_v60  ;;  %v1333_v60 = vld [vmem:[%s8223_s30 + $0x58] sm:$0xff] }
  0xe6   : > { %1346 = vmatpush.msrb.mxu2 %v1333_v60 }
  0xe7   : > { %v1129_v63 = vmax.f32 %v1042_v61, 0.0  ;;  %v1092_v61 = vpop.f32.mrf.mxu3 }
  0xe9   : > { %1205 = vmatmul.f32.gmra.mxu1 %v1129_v63  ;;  %3851 = vst [vmem:[%s5411_s4 + $0x20] sm:$0xff] %v1129_v63  ;;  %v1093_v63 = vadd.f32 %v5400_v41, %v1092_v61 }
  0xec   : > { %v1044_v0 = vpop.f32.mrf.mxu0 }
  0xed   : > { %v1045_v1 = vadd.f32 %v5400_v41, %v1044_v0 }
  0xef   : > { %v1130_v3 = vmax.f32 %v1045_v1, 0.0 }
  0xf1   : > { %1208 = vmatmul.f32.gmra.mxu1 %v1130_v3  ;;  %3852 = vst [vmem:[%s5411_s4 + $0x28] sm:$0xff] %v1130_v3 }
  0xf4   : > { %v1047_v4 = vpop.f32.mrf.mxu0 }
  0xf5   : > { %v1048_v5 = vadd.f32 %v5400_v41, %v1047_v4  ;;  %v1146_v4 = vmax.f32 %v1093_v63, 0.0 }
  0xf7   : > { %v1131_v7 = vmax.f32 %v1048_v5, 0.0  ;;  %v1332_v5 = vld [vmem:[%s8223_s30 + $0x50] sm:$0xff]  ;;  %3868 = vst [vmem:[%s5411_s4 + $0xa8] sm:$0xff] %v1146_v4 }
  0xf8   : > { %1347 = vmatpush.msrb.mxu2 %v1332_v5 }
  0xf9   : > { %1211 = vmatmul.f32.gmra.mxu1 %v1131_v7  ;;  %3853 = vst [vmem:[%s5411_s4 + $0x30] sm:$0xff] %v1131_v7  ;;  %v1095_v7 = vpop.f32.mrf.mxu3 }
  0xfc   : > { %v1050_v8 = vpop.f32.mrf.mxu0 }
  0xfd   : > { %v1051_v9 = vadd.f32 %v5400_v41, %v1050_v8  ;;  %v1096_v8 = vadd.f32 %v5400_v41, %v1095_v7 }
  0xff   : > { %v1132_v11 = vmax.f32 %v1051_v9, 0.0 }
 0x101   : > { %1214 = vmatmul.f32.gmra.mxu1 %v1132_v11  ;;  %3854 = vst [vmem:[%s5411_s4 + $0x38] sm:$0xff] %v1132_v11  ;;  %v1147_v11 = vmax.f32 %v1096_v8, 0.0  ;;  %v1098_v14 = vpop.f32.mrf.mxu3 }
 0x103   : > { %3869 = vst [vmem:[%s5411_s4 + $0xb0] sm:$0xff] %v1147_v11 }
 0x104   : > { %v1053_v12 = vpop.f32.mrf.mxu0 }
 0x105   : > { %v1054_v13 = vadd.f32 %v5400_v41, %v1053_v12  ;;  %v1331_v12 = vld [vmem:[%s8223_s30 + $0x48] sm:$0xff] }
 0x106   : > { %1348 = vmatpush.msrb.mxu2 %v1331_v12  ;;  %v1323_v12 = vld [vmem:[%s8223_s30 + $0x8] sm:$0xff] }
 0x107   : > { %v1133_v15 = vmax.f32 %v1054_v13, 0.0 }
 0x109   : > { %1217 = vmatmul.f32.gmra.mxu1 %v1133_v15  ;;  %3855 = vst [vmem:[%s5411_s4 + $0x40] sm:$0xff] %v1133_v15  ;;  %v1099_v15 = vadd.f32 %v5400_v41, %v1098_v14 }
 0x10b   : > { %v1148_v18 = vmax.f32 %v1099_v15, 0.0 }
 0x10c   : > { %v1056_v16 = vpop.f32.mrf.mxu0 }
 0x10d   : > { %v1057_v17 = vadd.f32 %v5400_v41, %v1056_v16  ;;  %3870 = vst [vmem:[%s5411_s4 + $0xb8] sm:$0xff] %v1148_v18 }
 0x10f   : > { %v1134_v19 = vmax.f32 %v1057_v17, 0.0 }
 0x111   : > { %1220 = vmatmul.f32.gmra.mxu1 %v1134_v19  ;;  %3856 = vst [vmem:[%s5411_s4 + $0x48] sm:$0xff] %v1134_v19  ;;  %v1330_v19 = vld [vmem:[%s8223_s30 + $0x40] sm:$0xff] }
 0x112   : > { %1349 = vmatpush.msrb.mxu2 %v1330_v19 }
 0x114   : > { %v1059_v20 = vpop.f32.mrf.mxu0 }
 0x115   : > { %v1060_v21 = vadd.f32 %v5400_v41, %v1059_v20 }
 0x117   : > { %v1135_v23 = vmax.f32 %v1060_v21, 0.0  ;;  %v1101_v21 = vpop.f32.mrf.mxu3 }
 0x118   : > { %v1102_v22 = vadd.f32 %v5400_v41, %v1101_v21 }
 0x119   : > { %1223 = vmatmul.f32.gmra.mxu1 %v1135_v23  ;;  %3857 = vst [vmem:[%s5411_s4 + $0x50] sm:$0xff] %v1135_v23 }
 0x11c   : > { %v1062_v24 = vpop.f32.mrf.mxu0 }
 0x11d   : > { %v1063_v25 = vadd.f32 %v5400_v41, %v1062_v24 }
 0x11f   : > { %v1136_v26 = vmax.f32 %v1063_v25, 0.0  ;;  %v1149_v25 = vmax.f32 %v1102_v22, 0.0  ;;  %v1322_v22 = vld [vmem:[%s8223_s30] sm:$0xff] }
 0x121   : > { %1226 = vmatmul.f32.gmra.mxu1 %v1136_v26  ;;  %3858 = vst [vmem:[%s5411_s4 + $0x58] sm:$0xff] %v1136_v26 }
 0x122   : > { %3871 = vst [vmem:[%s5411_s4 + $0xc0] sm:$0xff] %v1149_v25 }
 0x124   : > { %v1065_v27 = vpop.f32.mrf.mxu0 }
 0x125   : > { %v1066_v28 = vadd.f32 %v5400_v41, %v1065_v27  ;;  %v1329_v27 = vld [vmem:[%s8223_s30 + $0x38] sm:$0xff] }
 0x126   : > { %1350 = vmatpush.msrb.mxu2 %v1329_v27 }
 0x127   : > { %v1137_v29 = vmax.f32 %v1066_v28, 0.0  ;;  %v1104_v28 = vpop.f32.mrf.mxu3 }
 0x128   : > { %1351 = vmatpush.msrb.mxu2 %v1328_v34 }
 0x129   : > { %1229 = vmatmul.f32.gmra.mxu1 %v1137_v29  ;;  %3859 = vst [vmem:[%s5411_s4 + $0x60] sm:$0xff] %v1137_v29  ;;  %v1105_v29 = vadd.f32 %v5400_v41, %v1104_v28 }
 0x12a   : > { %1352 = vmatpush.msrb.mxu2 %v1327_v42  ;;  %v1501_v42 = vld [vmem:[%s8225_s29 + $0x70] sm:$0xff] }
 0x12c   : > { %v1068_v31 = vpop.f32.mrf.mxu0  ;;  %1353 = vmatpush.msrb.mxu2 %v1326_v49 }
 0x12d   : > { %v1069_v32 = vadd.f32 %v5400_v41, %v1068_v31 }
 0x12f   : > { %v1138_v33 = vmax.f32 %v1069_v32, 0.0  ;;  %v1150_v32 = vmax.f32 %v1105_v29, 0.0  ;;  %v1107_v35 = vpop.f32.mrf.mxu3 }
 0x131   : > { %1232 = vmatmul.f32.gmra.mxu1 %v1138_v33  ;;  %3860 = vst [vmem:[%s5411_s4 + $0x68] sm:$0xff] %v1138_v33 }
 0x132   : > { %3872 = vst [vmem:[%s5411_s4 + $0xc8] sm:$0xff] %v1150_v32 }
 0x134   : > { %v1071_v36 = vpop.f32.mrf.mxu0 }
 0x135   : > { %v1072_v38 = vadd.f32 %v5400_v41, %v1071_v36  ;;  %v1108_v36 = vadd.f32 %v5400_v41, %v1107_v35 }
 0x137   : > { %v1139_v39 = vmax.f32 %v1072_v38, 0.0  ;;  %v1110_v43 = vpop.f32.mrf.mxu3 }
 0x139   : > { %1235 = vmatmul.f32.gmra.mxu1 %v1139_v39  ;;  %3861 = vst [vmem:[%s5411_s4 + $0x70] sm:$0xff] %v1139_v39  ;;  %v1151_v39 = vmax.f32 %v1108_v36, 0.0 }
 0x13b   : > { %3873 = vst [vmem:[%s5411_s4 + $0xd0] sm:$0xff] %v1151_v39 }
 0x13c   : > { %v1074_v44 = vpop.f32.mrf.mxu0 }
 0x13d   : > { %v1075_v46 = vadd.f32 %v5400_v41, %v1074_v44  ;;  %v1111_v44 = vadd.f32 %v5400_v41, %v1110_v43 }
 0x13f   : > { %v1140_v47 = vmax.f32 %v1075_v46, 0.0  ;;  %v1113_v51 = vpop.f32.mrf.mxu3 }
 0x141   : > { %1238 = vmatmul.f32.gmra.mxu1 %v1140_v47  ;;  %3862 = vst [vmem:[%s5411_s4 + $0x78] sm:$0xff] %v1140_v47  ;;  %v1152_v47 = vmax.f32 %v1111_v44, 0.0 }
 0x143   : > { %3874 = vst [vmem:[%s5411_s4 + $0xd8] sm:$0xff] %v1152_v47 }
 0x144   : > { %v1077_v52 = vpop.f32.mrf.mxu0 }
 0x145   : > { %v1078_v54 = vadd.f32 %v5400_v41, %v1077_v52  ;;  %v1114_v52 = vadd.f32 %v5400_v41, %v1113_v51 }
 0x146   : > { %v1194_v55 = vpop.f32.mrf.mxu1 }
 0x147   : > { %v5490_v56 = vadd.f32 %v5485_v50, %v1194_v55  ;;  %v1141_v57 = vmax.f32 %v1078_v54, 0.0  ;;  %v1153_v55 = vmax.f32 %v1114_v52, 0.0  ;;  %v1116_v60 = vpop.f32.mrf.mxu3 }
 0x148   : > { %v1117_v61 = vadd.f32 %v5400_v41, %v1116_v60 }
 0x149   : > { %v1290_v59 = vmax.f32 %v5490_v56, 0.0  ;;  %1241 = vmatmul.f32.vlgmr.msra.gmra.mxu2 %v1141_v57  ;;  %3863 = vst [vmem:[%s5411_s4 + $0x80] sm:$0xff] %v1141_v57  ;;  %v1500_v56 = vld [vmem:[%s8225_s29 + $0x68] sm:$0xff] }
 0x14a   : > { %3875 = vst [vmem:[%s5411_s4 + $0xe0] sm:$0xff] %v1153_v55 }
 0x14b   : > { %3879 = vst [vmem:[%s5499_s0] sm:$0xff] %v1290_v59 }
 0x14c   : > { %v1080_v62 = vpop.f32.mrf.mxu0 }
 0x14d   : > { %v1081_v0 = vadd.f32 %v5400_v41, %v1080_v62 }
 0x14e   : > { %v1197_v1 = vpop.f32.mrf.mxu1 }
 0x14f   : > { %v5507_v2 = vadd.f32 %v5485_v50, %v1197_v1  ;;  %v1142_v3 = vmax.f32 %v1081_v0, 0.0  ;;  %v1154_v0 = vmax.f32 %v1117_v61, 0.0 }
 0x151   : > { %1244 = vmatmul.f32.gmra.mxu2 %v1142_v3  ;;  %3864 = vst [vmem:[%s5411_s4 + $0x88] sm:$0xff] %v1142_v3  ;;  %v1291_v6 = vmax.f32 %v5507_v2, 0.0  ;;  %v1324_v3 = vld [vmem:[%s8223_s30 + $0x10] sm:$0xff]  ;;  %v1499_v2 = vld [vmem:[%s8225_s29 + $0x60] sm:$0xff] }
 0x152   : > { %3876 = vst [vmem:[%s5411_s4 + $0xe8] sm:$0xff] %v1154_v0 }
 0x153   : > { %3880 = vst [vmem:[%s5499_s0 + $0x8] sm:$0xff] %v1291_v6 }
 0x156   : > { %v1200_v9 = vpop.f32.mrf.mxu1 }
 0x157   : > { %v5520_v10 = vadd.f32 %v5485_v50, %v1200_v9 }
 0x159   : > { %1247 = vmatmul.f32.gmra.mxu2 %v1143_v40  ;;  %v1292_v13 = vmax.f32 %v5520_v10, 0.0  ;;  %v1498_v10 = vld [vmem:[%s8225_s29 + $0x58] sm:$0xff] }
 0x15b   : > { %3881 = vst [vmem:[%s5499_s0 + $0x10] sm:$0xff] %v1292_v13 }
 0x15e   : > { %v1203_v16 = vpop.f32.mrf.mxu1 }
 0x15f   : > { %v5532_v17 = vadd.f32 %v5485_v50, %v1203_v16 }
 0x161   : > { %1250 = vmatmul.f32.gmra.mxu2 %v1144_v48  ;;  %v1293_v20 = vmax.f32 %v5532_v17, 0.0  ;;  %v1497_v17 = vld [vmem:[%s8225_s29 + $0x50] sm:$0xff] }
 0x163   : > { %3882 = vst [vmem:[%s5499_s0 + $0x18] sm:$0xff] %v1293_v20 }
 0x166   : > { %v1206_v23 = vpop.f32.mrf.mxu1 }
 0x167   : > { %v5544_v24 = vadd.f32 %v5485_v50, %v1206_v23 }
 0x169   : > { %1253 = vmatmul.f32.gmra.mxu2 %v1145_v58  ;;  %v1294_v26 = vmax.f32 %v5544_v24, 0.0  ;;  %v1325_v58 = vld [vmem:[%s8223_s30 + $0x18] sm:$0xff]  ;;  %v1495_v24 = vld [vmem:[%s8225_s29 + $0x40] sm:$0xff]  ;;  %s5882_s30 = scalar_lea.vmem [#allocation8], %s5403_s7 }
 0x16a   : > { %1354 = vmatpush.msrb.mxu2 %v1325_v58 }
 0x16b   : > { %3883 = vst [vmem:[%s5499_s0 + $0x20] sm:$0xff] %v1294_v26 }
 0x16c   : > { %1355 = vmatpush.msrb.mxu2 %v1324_v3 }
 0x16e   : > { %v1209_v30 = vpop.f32.mrf.mxu1  ;;  %1356 = vmatpush.msrb.mxu2 %v1323_v12 }
 0x16f   : > { %v5556_v31 = vadd.f32 %v5485_v50, %v1209_v30 }
 0x170   : > { %1357 = vmatpush.msrb.mxu2 %v1322_v22 }
 0x171   : > { %1256 = vmatmul.f32.gmra.mxu2 %v1146_v4  ;;  %v1295_v33 = vmax.f32 %v5556_v31, 0.0  ;;  %v1119_v4 = vpop.f32.mrf.mxu3  ;;  %v1494_v31 = vld [vmem:[%s8225_s29 + $0x38] sm:$0xff] }
 0x172   : > { %v1120_v5 = vadd.f32 %v5400_v41, %v1119_v4 }
 0x173   : > { %3884 = vst [vmem:[%s5499_s0 + $0x28] sm:$0xff] %v1295_v33 }
 0x174   : > { %v1155_v9 = vmax.f32 %v1120_v5, 0.0 }
 0x176   : > { %v1212_v37 = vpop.f32.mrf.mxu1  ;;  %3877 = vst [vmem:[%s5411_s4 + $0xf0] sm:$0xff] %v1155_v9 }
 0x177   : > { %v5568_v38 = vadd.f32 %v5485_v50, %v1212_v37 }
 0x179   : > { %1259 = vmatmul.f32.gmra.mxu2 %v1147_v11  ;;  %v1296_v40 = vmax.f32 %v5568_v38, 0.0  ;;  %v1122_v14 = vpop.f32.mrf.mxu3  ;;  %v1493_v38 = vld [vmem:[%s8225_s29 + $0x30] sm:$0xff] }
 0x17a   : > { %v1123_v15 = vadd.f32 %v5400_v41, %v1122_v14 }
 0x17b   : > { %3885 = vst [vmem:[%s5499_s0 + $0x30] sm:$0xff] %v1296_v40 }
 0x17c   : > { %v1156_v19 = vmax.f32 %v1123_v15, 0.0 }
 0x17e   : > { %v1215_v45 = vpop.f32.mrf.mxu1  ;;  %3878 = vst [vmem:[%s5411_s4 + $0xf8] sm:$0xff] %v1156_v19 }
 0x17f   : > { %v5580_v46 = vadd.f32 %v5485_v50, %v1215_v45 }
 0x181   : > { %1262 = vmatmul.f32.gmra.mxu2 %v1148_v18  ;;  %v1297_v48 = vmax.f32 %v5580_v46, 0.0  ;;  %v1492_v46 = vld [vmem:[%s8225_s29 + $0x28] sm:$0xff] }
 0x183   : > { %3886 = vst [vmem:[%s5499_s0 + $0x38] sm:$0xff] %v1297_v48 }
 0x186   : > { %v1218_v53 = vpop.f32.mrf.mxu1 }
 0x187   : > { %v5592_v54 = vadd.f32 %v5485_v50, %v1218_v53 }
 0x189   : > { %v1298_v57 = vmax.f32 %v5592_v54, 0.0  ;;  %1265 = vmatmul.f32.gmra.mxu2 %v1149_v25  ;;  %v1491_v54 = vld [vmem:[%s8225_s29 + $0x20] sm:$0xff] }
 0x18b   : > { %3887 = vst [vmem:[%s5499_s0 + $0x40] sm:$0xff] %v1298_v57 }
 0x18e   : > { %v1221_v62 = vpop.f32.mrf.mxu1 }
 0x18f   : > { %v5604_v63 = vadd.f32 %v5485_v50, %v1221_v62 }
 0x191   : > { %v1299_v1 = vmax.f32 %v5604_v63, 0.0  ;;  %1268 = vmatmul.f32.gmra.mxu2 %v1150_v32  ;;  %v1490_v63 = vld [vmem:[%s8225_s29 + $0x18] sm:$0xff] }
 0x193   : > { %3888 = vst [vmem:[%s5499_s0 + $0x48] sm:$0xff] %v1299_v1 }
 0x196   : > { %v1224_v7 = vpop.f32.mrf.mxu1 }
 0x197   : > { %v5616_v8 = vadd.f32 %v5485_v50, %v1224_v7 }
 0x199   : > { %v1300_v11 = vmax.f32 %v5616_v8, 0.0  ;;  %1271 = vmatmul.f32.gmra.mxu2 %v1151_v39  ;;  %v1502_v39 = vld [vmem:[%s8225_s29 + $0x78] sm:$0xff]  ;;  %v1489_v8 = vld [vmem:[%s8225_s29 + $0x10] sm:$0xff] }
 0x19a   : > { %1507 = vmatpush.msrb.mxu3 %v1502_v39 }
 0x19b   : > { %3889 = vst [vmem:[%s5499_s0 + $0x50] sm:$0xff] %v1300_v11 }
 0x19c   : > { %1508 = vmatpush.msrb.mxu3 %v1501_v42 }
 0x19e   : > { %v1227_v16 = vpop.f32.mrf.mxu1  ;;  %1509 = vmatpush.msrb.mxu3 %v1500_v56 }
 0x19f   : > { %v5628_v18 = vadd.f32 %v5485_v50, %v1227_v16 }
 0x1a0   : > { %1510 = vmatpush.msrb.mxu3 %v1499_v2 }
 0x1a1   : > { %v1301_v21 = vmax.f32 %v5628_v18, 0.0  ;;  %1274 = vmatmul.f32.gmra.mxu2 %v1152_v47  ;;  %v1635_v18 = vld [vmem:[%s8226_s17 + $0x78] sm:$0xff] }
 0x1a2   : > { %1511 = vmatpush.msrb.mxu3 %v1498_v10  ;;  %1640 = vmatpush.msrb.mxu0 %v1635_v18  ;;  %v1622_v18 = vld [vmem:[%s8226_s17 + $0x10] sm:$0xff] }
 0x1a3   : > { %3890 = vst [vmem:[%s5499_s0 + $0x58] sm:$0xff] %v1301_v21 }
 0x1a4   : > { %1512 = vmatpush.msrb.mxu3 %v1497_v17  ;;  %v1630_v17 = vld [vmem:[%s8226_s17 + $0x50] sm:$0xff] }
 0x1a6   : > { %v1230_v41 = vpop.f32.mrf.mxu1 }
 0x1a7   : > { %v5639_v23 = vadd.f32 %v5485_v50, %v1230_v41 }
 0x1a9   : > { %v1302_v25 = vmax.f32 %v5639_v23, 0.0  ;;  %1277 = vmatmul.f32.gmra.mxu2 %v1153_v55  ;;  %v1634_v23 = vld [vmem:[%s8226_s17 + $0x70] sm:$0xff] }
 0x1aa   : > { %1641 = vmatpush.msrb.mxu0 %v1634_v23 }
 0x1ab   : > { %3891 = vst [vmem:[%s5499_s0 + $0x60] sm:$0xff] %v1302_v25 }
 0x1ae   : > { %v1233_v27 = vpop.f32.mrf.mxu1 }
 0x1af   : > { %v5646_v28 = vadd.f32 %v5485_v50, %v1233_v27 }
 0x1b1   : > { %v1303_v29 = vmax.f32 %v5646_v28, 0.0  ;;  %1280 = vmatmul.f32.gmra.mxu2 %v1154_v0  ;;  %v1633_v28 = vld [vmem:[%s8226_s17 + $0x68] sm:$0xff] }
 0x1b2   : > { %1642 = vmatpush.msrb.mxu0 %v1633_v28 }
 0x1b3   : > { %3892 = vst [vmem:[%s5499_s0 + $0x68] sm:$0xff] %v1303_v29 }
 0x1b6   : > { %v1236_v30 = vpop.f32.mrf.mxu1 }
 0x1b7   : > { %v5653_v32 = vadd.f32 %v5485_v50, %v1236_v30 }
 0x1b9   : > { %v1304_v34 = vmax.f32 %v5653_v32, 0.0  ;;  %1283 = vmatmul.f32.gmra.mxu2 %v1155_v9  ;;  %v1632_v32 = vld [vmem:[%s8226_s17 + $0x60] sm:$0xff] }
 0x1ba   : > { %1643 = vmatpush.msrb.mxu0 %v1632_v32 }
 0x1bb   : > { %3893 = vst [vmem:[%s5499_s0 + $0x70] sm:$0xff] %v1304_v34 }
 0x1be   : > { %v1239_v35 = vpop.f32.mrf.mxu1 }
 0x1bf   : > { %v5660_v36 = vadd.f32 %v5485_v50, %v1239_v35 }
 0x1c1   : > { %v1305_v37 = vmax.f32 %v5660_v36, 0.0  ;;  %1286 = vmatmul.f32.gmra.mxu2 %v1156_v19 }
 0x1c3   : > { %3894 = vst [vmem:[%s5499_s0 + $0x78] sm:$0xff] %v1305_v37 }
 0x1c9   : > { %1358 = vmatmul.f32.vlgmr.msrb.gmra.mxu2 %v1290_v59 }
 0x1cc   : > { %v1242_v43 = vpop.f32.mrf.mxu2 }
 0x1cd   : > { %v5675_v44 = vadd.f32 %v5485_v50, %v1242_v43 }
 0x1cf   : > { %v1306_v45 = vmax.f32 %v5675_v44, 0.0 }
 0x1d1   : > { %3895 = vst [vmem:[%s5499_s0 + $0x80] sm:$0xff] %v1306_v45  ;;  %1361 = vmatmul.f32.gmra.mxu2 %v1291_v6 }
 0x1d4   : > { %v1245_v59 = vpop.f32.mrf.mxu2 }
 0x1d5   : > { %v5687_v47 = vadd.f32 %v5485_v50, %v1245_v59 }
 0x1d7   : > { %v1307_v49 = vmax.f32 %v5687_v47, 0.0 }
 0x1d9   : > { %3896 = vst [vmem:[%s5499_s0 + $0x88] sm:$0xff] %v1307_v49  ;;  %1364 = vmatmul.f32.gmra.mxu2 %v1292_v13 }
 0x1dc   : > { %v1248_v6 = vpop.f32.mrf.mxu2 }
 0x1dd   : > { %v5699_v51 = vadd.f32 %v5485_v50, %v1248_v6 }
 0x1df   : > { %v1308_v52 = vmax.f32 %v5699_v51, 0.0 }
 0x1e1   : > { %3897 = vst [vmem:[%s5499_s0 + $0x90] sm:$0xff] %v1308_v52  ;;  %1367 = vmatmul.f32.gmra.mxu2 %v1293_v20  ;;  %v1496_v20 = vld [vmem:[%s8225_s29 + $0x48] sm:$0xff] }
 0x1e2   : > { %1513 = vmatpush.msrb.mxu3 %v1496_v20 }
 0x1e4   : > { %v1251_v13 = vpop.f32.mrf.mxu2  ;;  %1514 = vmatpush.msrb.mxu3 %v1495_v24 }
 0x1e5   : > { %v5711_v53 = vadd.f32 %v5485_v50, %v1251_v13 }
 0x1e6   : > { %1515 = vmatpush.msrb.mxu3 %v1494_v31 }
 0x1e7   : > { %v1309_v55 = vmax.f32 %v5711_v53, 0.0 }
 0x1e8   : > { %1516 = vmatpush.msrb.mxu3 %v1493_v38 }
 0x1e9   : > { %3898 = vst [vmem:[%s5499_s0 + $0x98] sm:$0xff] %v1309_v55  ;;  %1370 = vmatmul.f32.gmra.mxu2 %v1294_v26 }
 0x1ea   : > { %1517 = vmatpush.msrb.mxu3 %v1492_v46 }
 0x1ec   : > { %v1254_v58 = vpop.f32.mrf.mxu2  ;;  %1518 = vmatpush.msrb.mxu3 %v1491_v54  ;;  %v1625_v54 = vld [vmem:[%s8226_s17 + $0x28] sm:$0xff] }
 0x1ed   : > { %v5726_v60 = vadd.f32 %v5485_v50, %v1254_v58 }
 0x1ee   : > { %1519 = vmatpush.msrb.mxu3 %v1490_v63 }
 0x1ef   : > { %v1310_v61 = vmax.f32 %v5726_v60, 0.0 }
 0x1f0   : > { %1520 = vmatpush.msrb.mxu3 %v1489_v8 }
 0x1f1   : > { %3899 = vst [vmem:[%s5499_s0 + $0xa0] sm:$0xff] %v1310_v61  ;;  %1373 = vmatmul.f32.gmra.mxu2 %v1295_v33 }
 0x1f4   : > { %v1257_v26 = vpop.f32.mrf.mxu2 }
 0x1f5   : > { %v5738_v62 = vadd.f32 %v5485_v50, %v1257_v26  ;;  %v1628_v26 = vld [vmem:[%s8226_s17 + $0x40] sm:$0xff] }
 0x1f7   : > { %v1311_v0 = vmax.f32 %v5738_v62, 0.0 }
 0x1f9   : > { %3900 = vst [vmem:[%s5499_s0 + $0xa8] sm:$0xff] %v1311_v0  ;;  %1376 = vmatmul.f32.gmra.mxu2 %v1296_v40 }
 0x1fc   : > { %v1260_v33 = vpop.f32.mrf.mxu2 }
 0x1fd   : > { %v5750_v3 = vadd.f32 %v5485_v50, %v1260_v33  ;;  %v1627_v33 = vld [vmem:[%s8226_s17 + $0x38] sm:$0xff] }
 0x1ff   : > { %v1312_v4 = vmax.f32 %v5750_v3, 0.0 }
 0x201   : > { %3901 = vst [vmem:[%s5499_s0 + $0xb0] sm:$0xff] %v1312_v4  ;;  %1379 = vmatmul.f32.gmra.mxu2 %v1297_v48 }
 0x204   : > { %v1263_v40 = vpop.f32.mrf.mxu2 }
 0x205   : > { %v5762_v5 = vadd.f32 %v5485_v50, %v1263_v40  ;;  %v1626_v40 = vld [vmem:[%s8226_s17 + $0x30] sm:$0xff] }
 0x207   : > { %v1313_v7 = vmax.f32 %v5762_v5, 0.0  ;;  %v1624_v5 = vld [vmem:[%s8226_s17 + $0x20] sm:$0xff] }
 0x209   : > { %3902 = vst [vmem:[%s5499_s0 + $0xb8] sm:$0xff] %v1313_v7  ;;  %1382 = vmatmul.f32.gmra.mxu2 %v1298_v57 }
 0x20c   : > { %v1266_v48 = vpop.f32.mrf.mxu2 }
 0x20d   : > { %v5774_v9 = vadd.f32 %v5485_v50, %v1266_v48 }
 0x20f   : > { %v1314_v12 = vmax.f32 %v5774_v9, 0.0  ;;  %v1623_v9 = vld [vmem:[%s8226_s17 + $0x18] sm:$0xff] }
 0x211   : > { %3903 = vst [vmem:[%s5499_s0 + $0xc0] sm:$0xff] %v1314_v12  ;;  %1385 = vmatmul.f32.gmra.mxu2 %v1299_v1 }
 0x214   : > { %v1269_v57 = vpop.f32.mrf.mxu2 }
 0x215   : > { %v5786_v14 = vadd.f32 %v5485_v50, %v1269_v57 }
 0x217   : > { %v1315_v15 = vmax.f32 %v5786_v14, 0.0 }
 0x219   : > { %3904 = vst [vmem:[%s5499_s0 + $0xc8] sm:$0xff] %v1315_v15  ;;  %1388 = vmatmul.f32.gmra.mxu2 %v1300_v11  ;;  %v1488_v11 = vld [vmem:[%s8225_s29 + $0x8] sm:$0xff] }
 0x21a   : > { %1521 = vmatpush.msrb.mxu3 %v1488_v11 }
 0x21c   : > { %v1272_v1 = vpop.f32.mrf.mxu2 }
 0x21d   : > { %v5798_v16 = vadd.f32 %v5485_v50, %v1272_v1 }
 0x21f   : > { %v1316_v19 = vmax.f32 %v5798_v16, 0.0 }
 0x221   : > { %3905 = vst [vmem:[%s5499_s0 + $0xd0] sm:$0xff] %v1316_v19  ;;  %1391 = vmatmul.f32.gmra.mxu2 %v1301_v21  ;;  %v1487_v21 = vld [vmem:[%s8225_s29] sm:$0xff]  ;;  %s8227_s29 = sld [smem:[#allocation32_spill]] }
 0x222   : > { %1522 = vmatpush.msrb.mxu3 %v1487_v21 }
 0x224   : > { %v1275_v22 = vpop.f32.mrf.mxu2 }
 0x225   : > { %v5813_v41 = vadd.f32 %v5485_v50, %v1275_v22 }
 0x227   : > { %v1317_v27 = vmax.f32 %v5813_v41, 0.0  ;;  %v5875_v36 = vld [vmem:[%s8227_s29] ss:$0 sm:$0xff]  ;;  %v1621_v41 = vld [vmem:[%s8226_s17 + $0x8] sm:$0xff] }
 0x229   : > { %3906 = vst [vmem:[%s5499_s0 + $0xd8] sm:$0xff] %v1317_v27  ;;  %1394 = vmatmul.f32.gmra.mxu2 %v1302_v25 }
 0x22c   : > { %v1278_v30 = vpop.f32.mrf.mxu2 }
 0x22d   : > { %v5828_v35 = vadd.f32 %v5485_v50, %v1278_v30 }
 0x22f   : > { %v1318_v39 = vmax.f32 %v5828_v35, 0.0  ;;  %v1620_v35 = vld [vmem:[%s8226_s17] sm:$0xff] }
 0x231   : > { %3907 = vst [vmem:[%s5499_s0 + $0xe0] sm:$0xff] %v1318_v39  ;;  %1397 = vmatmul.f32.gmra.mxu2 %v1303_v29 }
 0x234   : > { %v1281_v25 = vpop.f32.mrf.mxu2 }
 0x235   : > { %v5840_v42 = vadd.f32 %v5485_v50, %v1281_v25 }
 0x237   : > { %v1319_v43 = vmax.f32 %v5840_v42, 0.0 }
 0x239   : > { %3908 = vst [vmem:[%s5499_s0 + $0xe8] sm:$0xff] %v1319_v43  ;;  %1400 = vmatmul.f32.gmra.mxu2 %v1304_v34 }
 0x23c   : > { %v1284_v29 = vpop.f32.mrf.mxu2 }
 0x23d   : > { %v5852_v56 = vadd.f32 %v5485_v50, %v1284_v29  ;;  %v2359_v29 = vld [vmem:[#allocation2 + $0x78] sm:$0xff] }
 0x23f   : > { %v1320_v59 = vmax.f32 %v5852_v56, 0.0  ;;  %v1965_v56 = vld [vmem:[%s8229_s13 + $0x78] sm:$0xff] }
 0x240   : > { %1970 = vmatpush.msra.mxu2 %v1965_v56 }
 0x241   : > { %3909 = vst [vmem:[%s5499_s0 + $0xf0] sm:$0xff] %v1320_v59  ;;  %1403 = vmatmul.f32.gmra.mxu2 %v1305_v37  ;;  %v1631_v37 = vld [vmem:[%s8226_s17 + $0x58] sm:$0xff] }
 0x242   : > { %1644 = vmatpush.msrb.mxu0 %v1631_v37 }
 0x244   : > { %v1287_v34 = vpop.f32.mrf.mxu2  ;;  %1645 = vmatpush.msrb.mxu0 %v1630_v17  ;;  %v1798_v17 = vld [vmem:[%s8228_s11 + $0x68] sm:$0xff] }
 0x245   : > { %v5864_v2 = vadd.f32 %v5485_v50, %v1287_v34  ;;  %v1800_v34 = vld [vmem:[%s8228_s11 + $0x78] sm:$0xff] }
 0x246   : > { %1805 = vmatpush.msrb.mxu1 %v1800_v34 }
 0x247   : > { %v1321_v6 = vmax.f32 %v5864_v2, 0.0  ;;  %v2358_v2 = vld [vmem:[#allocation2 + $0x70] sm:$0xff] }
 0x249   : > { %3910 = vst [vmem:[%s5499_s0 + $0xf8] sm:$0xff] %v1321_v6  ;;  %1406 = vmatmul.f32.gmra.mxu2 %v1306_v45 }
 0x24c   : > { %v1359_v50 = vpop.f32.mrf.mxu2 }
 0x24d   : > { %v1360_v10 = vadd.f32 %v5875_v36, %v1359_v50 }
 0x24f   : > { %v1455_v13 = vmax.f32 %v1360_v10, 0.0 }
 0x251   : > { %3911 = vst [vmem:[%s5882_s30] sm:$0xff] %v1455_v13  ;;  %1409 = vmatmul.f32.gmra.mxu2 %v1307_v49  ;;  %1523 = vmatmul.f32.vlgmr.msrb.gmra.mxu3 %v1455_v13  ;;  %v1629_v49 = vld [vmem:[%s8226_s17 + $0x48] sm:$0xff]  ;;  %s4102_s17 = scalar_lea.hbm %s8161_s22, %s7845_s9 }
 0x252   : > { %1646 = vmatpush.msrb.mxu0 %v1629_v49 }
 0x254   : > { %v1362_v44 = vpop.f32.mrf.mxu2  ;;  %1647 = vmatpush.msrb.mxu0 %v1628_v26  ;;  %v2357_v26 = vld [vmem:[#allocation2 + $0x68] sm:$0xff] }
 0x255   : > { %v1363_v45 = vadd.f32 %v5875_v36, %v1362_v44 }
 0x256   : > { %1648 = vmatpush.msrb.mxu0 %v1627_v33 }
 0x257   : > { %v1456_v20 = vmax.f32 %v1363_v45, 0.0  ;;  %v5992_v45 = vld [vmem:[%s8230_s1] ss:$0 sm:$0xff]  ;;  %s8232_s1 = sld [smem:[#allocation36_spill]] }
 0x258   : > { %1649 = vmatpush.msrb.mxu0 %v1626_v40  ;;  %v1796_v40 = vld [vmem:[%s8228_s11 + $0x58] sm:$0xff] }
 0x259   : > { %1412 = vmatmul.f32.gmra.mxu2 %v1308_v52  ;;  %1526 = vmatmul.f32.gmra.mxu3 %v1456_v20  ;;  %3912 = vst [vmem:[%s5882_s30 + $0x8] sm:$0xff] %v1456_v20  ;;  %v1964_v20 = vld [vmem:[%s8229_s13 + $0x70] sm:$0xff] }
 0x25a   : > { %1650 = vmatpush.msrb.mxu0 %v1625_v54  ;;  %1971 = vmatpush.msra.mxu2 %v1964_v20 }
 0x25c   : > { %v1365_v58 = vpop.f32.mrf.mxu2  ;;  %1651 = vmatpush.msrb.mxu0 %v1624_v5  ;;  %v1795_v5 = vld [vmem:[%s8228_s11 + $0x50] sm:$0xff] }
 0x25d   : > { %v1366_v47 = vadd.f32 %v5875_v36, %v1365_v58 }
 0x25e   : > { %1652 = vmatpush.msrb.mxu0 %v1623_v9 }
 0x25f   : > { %v1457_v24 = vmax.f32 %v1366_v47, 0.0 }
 0x260   : > { %1653 = vmatpush.msrb.mxu0 %v1622_v18 }
 0x261   : > { %1415 = vmatmul.f32.gmra.mxu2 %v1309_v55  ;;  %1529 = vmatmul.f32.gmra.mxu3 %v1457_v24  ;;  %3913 = vst [vmem:[%s5882_s30 + $0x10] sm:$0xff] %v1457_v24 }
 0x262   : > { %1654 = vmatpush.msrb.mxu0 %v1621_v41  ;;  %v2355_v41 = vld [vmem:[#allocation2 + $0x58] sm:$0xff] }
 0x264   : > { %v1368_v51 = vpop.f32.mrf.mxu2  ;;  %1655 = vmatpush.msrb.mxu0 %v1620_v35 }
 0x265   : > { %v1369_v52 = vadd.f32 %v5875_v36, %v1368_v51 }
 0x266   : > { %2360 = vmatpush.msra.mxu0 %v2359_v29  ;;  %v1792_v29 = vld [vmem:[%s8228_s11 + $0x38] sm:$0xff] }
 0x267   : > { %v1458_v31 = vmax.f32 %v1369_v52, 0.0 }
 0x268   : > { %2361 = vmatpush.msra.mxu0 %v2358_v2  ;;  %v1791_v2 = vld [vmem:[%s8228_s11 + $0x30] sm:$0xff] }
 0x269   : > { %1418 = vmatmul.f32.gmra.mxu2 %v1310_v61  ;;  %1532 = vmatmul.f32.gmra.mxu3 %v1458_v31  ;;  %3914 = vst [vmem:[%s5882_s30 + $0x18] sm:$0xff] %v1458_v31  ;;  %v1797_v31 = vld [vmem:[%s8228_s11 + $0x60] sm:$0xff] }
 0x26a   : > { %2362 = vmatpush.msra.mxu0 %v2357_v26 }
 0x26c   : > { %v1371_v53 = vpop.f32.mrf.mxu2 }
 0x26d   : > { %v1372_v55 = vadd.f32 %v5875_v36, %v1371_v53 }
 0x26f   : > { %v1459_v38 = vmax.f32 %v1372_v55, 0.0 }
 0x271   : > { %1421 = vmatmul.f32.gmra.mxu2 %v1311_v0  ;;  %1535 = vmatmul.f32.gmra.mxu3 %v1459_v38  ;;  %3915 = vst [vmem:[%s5882_s30 + $0x20] sm:$0xff] %v1459_v38 }
 0x274   : > { %v1374_v60 = vpop.f32.mrf.mxu2 }
 0x275   : > { %v1375_v61 = vadd.f32 %v5875_v36, %v1374_v60 }
 0x277   : > { %v1460_v46 = vmax.f32 %v1375_v61, 0.0 }
 0x279   : > { %1424 = vmatmul.f32.gmra.mxu2 %v1312_v4  ;;  %1538 = vmatmul.f32.gmra.mxu3 %v1460_v46  ;;  %3916 = vst [vmem:[%s5882_s30 + $0x28] sm:$0xff] %v1460_v46  ;;  %v1963_v46 = vld [vmem:[%s8229_s13 + $0x68] sm:$0xff] }
 0x27a   : > { %1972 = vmatpush.msra.mxu2 %v1963_v46 }
 0x27c   : > { %v1377_v62 = vpop.f32.mrf.mxu2 }
 0x27d   : > { %v1378_v0 = vadd.f32 %v5875_v36, %v1377_v62 }
 0x27f   : > { %v1461_v48 = vmax.f32 %v1378_v0, 0.0 }
 0x281   : > { %1427 = vmatmul.f32.gmra.mxu2 %v1313_v7  ;;  %1541 = vmatmul.f32.gmra.mxu3 %v1461_v48  ;;  %3917 = vst [vmem:[%s5882_s30 + $0x30] sm:$0xff] %v1461_v48 }
 0x284   : > { %v1380_v3 = vpop.f32.mrf.mxu2 }
 0x285   : > { %v1381_v4 = vadd.f32 %v5875_v36, %v1380_v3 }
 0x287   : > { %v1462_v57 = vmax.f32 %v1381_v4, 0.0 }
 0x289   : > { %1430 = vmatmul.f32.gmra.mxu2 %v1314_v12  ;;  %1544 = vmatmul.f32.gmra.mxu3 %v1462_v57  ;;  %3918 = vst [vmem:[%s5882_s30 + $0x38] sm:$0xff] %v1462_v57  ;;  %v2356_v57 = vld [vmem:[#allocation2 + $0x60] sm:$0xff] }
 0x28a   : > { %2363 = vmatpush.msra.mxu0 %v2356_v57 }
 0x28c   : > { %v1383_v7 = vpop.f32.mrf.mxu2  ;;  %2364 = vmatpush.msra.mxu0 %v2355_v41  ;;  %v1958_v41 = vld [vmem:[%s8229_s13 + $0x40] sm:$0xff] }
 0x28d   : > { %v1384_v63 = vadd.f32 %v5875_v36, %v1383_v7 }
 0x28f   : > { %v1463_v1 = vmax.f32 %v1384_v63, 0.0 }
 0x291   : > { %1433 = vmatmul.f32.gmra.mxu2 %v1315_v15  ;;  %1547 = vmatmul.f32.gmra.mxu3 %v1463_v1  ;;  %3919 = vst [vmem:[%s5882_s30 + $0x40] sm:$0xff] %v1463_v1 }
 0x294   : > { %v1386_v12 = vpop.f32.mrf.mxu2 }
 0x295   : > { %v1387_v8 = vadd.f32 %v5875_v36, %v1386_v12 }
 0x297   : > { %v1464_v11 = vmax.f32 %v1387_v8, 0.0 }
 0x299   : > { %1436 = vmatmul.f32.gmra.mxu2 %v1316_v19  ;;  %1550 = vmatmul.f32.gmra.mxu3 %v1464_v11  ;;  %3920 = vst [vmem:[%s5882_s30 + $0x48] sm:$0xff] %v1464_v11  ;;  %v1794_v11 = vld [vmem:[%s8228_s11 + $0x48] sm:$0xff] }
 0x29c   : > { %v1389_v22 = vpop.f32.mrf.mxu2 }
 0x29d   : > { %v1390_v14 = vadd.f32 %v5875_v36, %v1389_v22  ;;  %v1962_v22 = vld [vmem:[%s8229_s13 + $0x60] sm:$0xff] }
 0x29e   : > { %1973 = vmatpush.msra.mxu2 %v1962_v22 }
 0x29f   : > { %v1465_v15 = vmax.f32 %v1390_v14, 0.0 }
 0x2a1   : > { %3921 = vst [vmem:[%s5882_s30 + $0x50] sm:$0xff] %v1465_v15  ;;  %1439 = vmatmul.f32.gmra.mxu2 %v1317_v27  ;;  %1553 = vmatmul.f32.gmra.mxu3 %v1465_v15 }
 0x2a4   : > { %v1392_v21 = vpop.f32.mrf.mxu2 }
 0x2a5   : > { %v1393_v16 = vadd.f32 %v5875_v36, %v1392_v21 }
 0x2a7   : > { %v1466_v19 = vmax.f32 %v1393_v16, 0.0 }
 0x2a9   : > { %3922 = vst [vmem:[%s5882_s30 + $0x58] sm:$0xff] %v1466_v19  ;;  %1442 = vmatmul.f32.gmra.mxu2 %v1318_v39  ;;  %1556 = vmatmul.f32.gmra.mxu3 %v1466_v19 }
 0x2ac   : > { %v1395_v27 = vpop.f32.mrf.mxu2 }
 0x2ad   : > { %v1396_v30 = vadd.f32 %v5875_v36, %v1395_v27  ;;  %v1793_v27 = vld [vmem:[%s8228_s11 + $0x40] sm:$0xff] }
 0x2af   : > { %v1467_v23 = vmax.f32 %v1396_v30, 0.0 }
 0x2b1   : > { %3923 = vst [vmem:[%s5882_s30 + $0x60] sm:$0xff] %v1467_v23  ;;  %1445 = vmatmul.f32.gmra.mxu2 %v1319_v43  ;;  %1559 = vmatmul.f32.gmra.mxu3 %v1467_v23 }
 0x2b4   : > { %v1398_v39 = vpop.f32.mrf.mxu2 }
 0x2b5   : > { %v1399_v25 = vadd.f32 %v5875_v36, %v1398_v39 }
 0x2b7   : > { %v1468_v28 = vmax.f32 %v1399_v25, 0.0 }
 0x2b9   : > { %3924 = vst [vmem:[%s5882_s30 + $0x68] sm:$0xff] %v1468_v28  ;;  %1448 = vmatmul.f32.gmra.mxu2 %v1320_v59  ;;  %1562 = vmatmul.f32.gmra.mxu3 %v1468_v28 }
 0x2bc   : > { %v1401_v42 = vpop.f32.mrf.mxu2 }
 0x2bd   : > { %v1402_v43 = vadd.f32 %v5875_v36, %v1401_v42  ;;  %v1961_v42 = vld [vmem:[%s8229_s13 + $0x58] sm:$0xff] }
 0x2be   : > { %1974 = vmatpush.msra.mxu2 %v1961_v42  ;;  %v1785_v42 = vld [vmem:[%s8228_s11] sm:$0xff] }
 0x2bf   : > { %v1469_v32 = vmax.f32 %v1402_v43, 0.0 }
 0x2c1   : > { %3925 = vst [vmem:[%s5882_s30 + $0x70] sm:$0xff] %v1469_v32  ;;  %1451 = vmatmul.f32.gmra.mxu2 %v1321_v6  ;;  %1565 = vmatmul.f32.gmra.mxu3 %v1469_v32  ;;  %v1799_v6 = vld [vmem:[%s8228_s11 + $0x70] sm:$0xff] }
 0x2c2   : > { %1806 = vmatpush.msrb.mxu1 %v1799_v6 }
 0x2c4   : > { %v1404_v59 = vpop.f32.mrf.mxu2  ;;  %1807 = vmatpush.msrb.mxu1 %v1798_v17 }
 0x2c5   : > { %v1405_v37 = vadd.f32 %v5875_v36, %v1404_v59 }
 0x2c6   : > { %1808 = vmatpush.msrb.mxu1 %v1797_v31 }
 0x2c7   : > { %v1470_v50 = vmax.f32 %v1405_v37, 0.0 }
 0x2c8   : > { %1809 = vmatpush.msrb.mxu1 %v1796_v40 }
 0x2c9   : > { %3926 = vst [vmem:[%s5882_s30 + $0x78] sm:$0xff] %v1470_v50  ;;  %1568 = vmatmul.f32.gmra.mxu3 %v1470_v50  ;;  %v2354_v50 = vld [vmem:[#allocation2 + $0x50] sm:$0xff] }
 0x2ca   : > { %1810 = vmatpush.msrb.mxu1 %v1795_v5  ;;  %2365 = vmatpush.msra.mxu0 %v2354_v50 }
 0x2cc   : > { %v1407_v10 = vpop.f32.mrf.mxu2  ;;  %1811 = vmatpush.msrb.mxu1 %v1794_v11 }
 0x2cd   : > { %v1408_v13 = vadd.f32 %v5875_v36, %v1407_v10 }
 0x2ce   : > { %1812 = vmatpush.msrb.mxu1 %v1793_v27 }
 0x2cf   : > { %v1471_v44 = vmax.f32 %v1408_v13, 0.0 }
 0x2d0   : > { %1813 = vmatpush.msrb.mxu1 %v1792_v29  ;;  %v2351_v29 = vld [vmem:[#allocation2 + $0x38] sm:$0xff] }
 0x2d1   : > { %3927 = vst [vmem:[%s5882_s30 + $0x80] sm:$0xff] %v1471_v44  ;;  %1571 = vmatmul.f32.gmra.mxu3 %v1471_v44 }
 0x2d2   : > { %1814 = vmatpush.msrb.mxu1 %v1791_v2  ;;  %v1957_v2 = vld [vmem:[%s8229_s13 + $0x38] sm:$0xff] }
 0x2d4   : > { %v1410_v58 = vpop.f32.mrf.mxu2  ;;  %v1524_v47 = vpop.f32.mrf.mxu3 }
 0x2d5   : > { %v1411_v49 = vadd.f32 %v5875_v36, %v1410_v58  ;;  %v6002_v24 = vadd.f32 %v5992_v45, %v1524_v47  ;;  %v1790_v58 = vld [vmem:[%s8228_s11 + $0x28] sm:$0xff]  ;;  %v1960_v47 = vld [vmem:[%s8229_s13 + $0x50] sm:$0xff] }
 0x2d6   : > { %1815 = vmatpush.msrb.mxu1 %v1790_v58  ;;  %1975 = vmatpush.msra.mxu2 %v1960_v47  ;;  %v2350_v47 = vld [vmem:[#allocation2 + $0x30] sm:$0xff] }
 0x2d7   : > { %v1472_v51 = vmax.f32 %v1411_v49, 0.0  ;;  %3943 = vst [vmem:[%s6005_s6] sm:$0xff] %v6002_v24  ;;  %1656 = vmatmul.f32.vlgmr.msrb.gmra.mxu0 %v6002_v24  ;;  %v2248_v52 = vmul.f32 %v6002_v24, %v6002_v24 }
 0x2d9   : > { %3928 = vst [vmem:[%s5882_s30 + $0x88] sm:$0xff] %v1472_v51  ;;  %1574 = vmatmul.f32.gmra.mxu3 %v1472_v51  ;;  %2280 = vadd.xlane.f32.xlu0 %v2248_v52 }
 0x2dc   : > { %v1413_v53 = vpop.f32.mrf.mxu2  ;;  %v1527_v55 = vpop.f32.mrf.mxu3 }
 0x2dd   : > { %v1414_v33 = vadd.f32 %v5875_v36, %v1413_v53  ;;  %v6018_v38 = vadd.f32 %v5992_v45, %v1527_v55  ;;  %v2353_v55 = vld [vmem:[#allocation2 + $0x48] sm:$0xff] }
 0x2de   : > { %2366 = vmatpush.msra.mxu0 %v2353_v55 }
 0x2df   : > { %v1473_v60 = vmax.f32 %v1414_v33, 0.0  ;;  %3944 = vst [vmem:[%s6005_s6 + $0x8] sm:$0xff] %v6018_v38  ;;  %1659 = vmatmul.f32.gmra.mxu0 %v6018_v38  ;;  %v2249_v61 = vmul.f32 %v6018_v38, %v6018_v38  ;;  %v1789_v33 = vld [vmem:[%s8228_s11 + $0x20] sm:$0xff] }
 0x2e0   : > { %1816 = vmatpush.msrb.mxu1 %v1789_v33 }
 0x2e1   : > { %3929 = vst [vmem:[%s5882_s30 + $0x90] sm:$0xff] %v1473_v60  ;;  %1577 = vmatmul.f32.gmra.mxu3 %v1473_v60  ;;  %2282 = vadd.xlane.f32.xlu0 %v2249_v61 }
 0x2e4   : > { %v1416_v62 = vpop.f32.mrf.mxu2  ;;  %v1530_v0 = vpop.f32.mrf.mxu3 }
 0x2e5   : > { %v1417_v48 = vadd.f32 %v5875_v36, %v1416_v62  ;;  %v6034_v54 = vadd.f32 %v5992_v45, %v1530_v0 }
 0x2e7   : > { %v1474_v3 = vmax.f32 %v1417_v48, 0.0  ;;  %3945 = vst [vmem:[%s6005_s6 + $0x10] sm:$0xff] %v6034_v54  ;;  %1662 = vmatmul.f32.gmra.mxu0 %v6034_v54  ;;  %v2250_v4 = vmul.f32 %v6034_v54, %v6034_v54  ;;  %v1788_v48 = vld [vmem:[%s8228_s11 + $0x18] sm:$0xff] }
 0x2e8   : > { %1817 = vmatpush.msrb.mxu1 %v1788_v48  ;;  %v2129_v48 = vld [vmem:[%s8231_s15 + $0x70] sm:$0xff] }
 0x2e9   : > { %3930 = vst [vmem:[%s5882_s30 + $0x98] sm:$0xff] %v1474_v3  ;;  %1580 = vmatmul.f32.gmra.mxu3 %v1474_v3  ;;  %2284 = vadd.xlane.f32.xlu1 %v2250_v4  ;;  %v1959_v3 = vld [vmem:[%s8229_s13 + $0x48] sm:$0xff] }
 0x2ea   : > { %1976 = vmatpush.msra.mxu2 %v1959_v3 }
 0x2ec   : > { %v1419_v7 = vpop.f32.mrf.mxu2  ;;  %v1533_v63 = vpop.f32.mrf.mxu3  ;;  %1977 = vmatpush.msra.mxu2 %v1958_v41 }
 0x2ed   : > { %v1420_v1 = vadd.f32 %v5875_v36, %v1419_v7  ;;  %v6047_v9 = vadd.f32 %v5992_v45, %v1533_v63 }
 0x2ee   : > { %1978 = vmatpush.msra.mxu2 %v1957_v2 }
 0x2ef   : > { %v1475_v12 = vmax.f32 %v1420_v1, 0.0  ;;  %3946 = vst [vmem:[%s6005_s6 + $0x18] sm:$0xff] %v6047_v9  ;;  %1665 = vmatmul.f32.gmra.mxu0 %v6047_v9  ;;  %v2251_v8 = vmul.f32 %v6047_v9, %v6047_v9 }
 0x2f1   : > { %3931 = vst [vmem:[%s5882_s30 + $0xa0] sm:$0xff] %v1475_v12  ;;  %1583 = vmatmul.f32.gmra.mxu3 %v1475_v12  ;;  %2286 = vadd.xlane.f32.xlu1 %v2251_v8  ;;  %v2352_v12 = vld [vmem:[#allocation2 + $0x40] sm:$0xff]  ;;  %v1787_v8 = vld [vmem:[%s8228_s11 + $0x10] sm:$0xff] }
 0x2f2   : > { %2367 = vmatpush.msra.mxu0 %v2352_v12  ;;  %1818 = vmatpush.msrb.mxu1 %v1787_v8  ;;  %v1955_v8 = vld [vmem:[%s8229_s13 + $0x28] sm:$0xff] }
 0x2f4   : > { %v1422_v14 = vpop.f32.mrf.mxu2  ;;  %v1536_v15 = vpop.f32.mrf.mxu3  ;;  %2368 = vmatpush.msra.mxu0 %v2351_v29 }
 0x2f5   : > { %v1423_v18 = vadd.f32 %v5875_v36, %v1422_v14  ;;  %v6063_v21 = vadd.f32 %v5992_v45, %v1536_v15 }
 0x2f6   : > { %2369 = vmatpush.msra.mxu0 %v2350_v47 }
 0x2f7   : > { %v1476_v16 = vmax.f32 %v1423_v18, 0.0  ;;  %3947 = vst [vmem:[%s6005_s6 + $0x20] sm:$0xff] %v6063_v21  ;;  %1668 = vmatmul.f32.gmra.mxu0 %v6063_v21  ;;  %v2252_v19 = vmul.f32 %v6063_v21, %v6063_v21 }
 0x2f9   : > { %3932 = vst [vmem:[%s5882_s30 + $0xa8] sm:$0xff] %v1476_v16  ;;  %1586 = vmatmul.f32.gmra.mxu3 %v1476_v16  ;;  %2288 = vadd.xlane.f32.xlu2 %v2252_v19  ;;  %v1786_v19 = vld [vmem:[%s8228_s11 + $0x8] sm:$0xff] }
 0x2fa   : > { %1819 = vmatpush.msrb.mxu1 %v1786_v19  ;;  %v2348_v19 = vld [vmem:[#allocation2 + $0x20] sm:$0xff] }
 0x2fc   : > { %v1425_v30 = vpop.f32.mrf.mxu2  ;;  %v1539_v23 = vpop.f32.mrf.mxu3  ;;  %1820 = vmatpush.msrb.mxu1 %v1785_v42 }
 0x2fd   : > { %v1426_v35 = vadd.f32 %v5875_v36, %v1425_v30  ;;  %v6076_v39 = vadd.f32 %v5992_v45, %v1539_v23 }
 0x2ff   : > { %v1477_v25 = vmax.f32 %v1426_v35, 0.0  ;;  %3948 = vst [vmem:[%s6005_s6 + $0x28] sm:$0xff] %v6076_v39  ;;  %1671 = vmatmul.f32.gmra.mxu0 %v6076_v39  ;;  %v2253_v28 = vmul.f32 %v6076_v39, %v6076_v39 }
 0x301   : > { %3933 = vst [vmem:[%s5882_s30 + $0xb0] sm:$0xff] %v1477_v25  ;;  %1589 = vmatmul.f32.gmra.mxu3 %v1477_v25  ;;  %2290 = vadd.xlane.f32.xlu2 %v2253_v28 }
 0x304   : > { %v1428_v43 = vpop.f32.mrf.mxu2  ;;  %v1542_v32 = vpop.f32.mrf.mxu3 }
 0x305   : > { %v1429_v34 = vadd.f32 %v5875_v36, %v1428_v43  ;;  %v6092_v56 = vadd.f32 %v5992_v45, %v1542_v32 }
 0x307   : > { %v1478_v59 = vmax.f32 %v1429_v34, 0.0  ;;  %3949 = vst [vmem:[%s6005_s6 + $0x30] sm:$0xff] %v6092_v56  ;;  %1674 = vmatmul.f32.gmra.mxu0 %v6092_v56  ;;  %v2254_v37 = vmul.f32 %v6092_v56, %v6092_v56 }
 0x309   : > { %3934 = vst [vmem:[%s5882_s30 + $0xb8] sm:$0xff] %v1478_v59  ;;  %1592 = vmatmul.f32.gmra.mxu3 %v1478_v59  ;;  %2292 = vadd.xlane.f32.xlu0 %v2254_v37 }
 0x30c   : > { %v1431_v6 = vpop.f32.mrf.mxu2  ;;  %v1545_v10 = vpop.f32.mrf.mxu3 }
 0x30d   : > { %v1432_v13 = vadd.f32 %v5875_v36, %v1431_v6  ;;  %v6105_v44 = vadd.f32 %v5992_v45, %v1545_v10 }
 0x30f   : > { %v1479_v17 = vmax.f32 %v1432_v13, 0.0  ;;  %3950 = vst [vmem:[%s6005_s6 + $0x38] sm:$0xff] %v6105_v44  ;;  %1677 = vmatmul.f32.gmra.mxu0 %v6105_v44  ;;  %v2255_v20 = vmul.f32 %v6105_v44, %v6105_v44 }
 0x311   : > { %3935 = vst [vmem:[%s5882_s30 + $0xc0] sm:$0xff] %v1479_v17  ;;  %1595 = vmatmul.f32.gmra.mxu3 %v1479_v17  ;;  %2294 = vadd.xlane.f32.xlu1 %v2255_v20 }
 0x314   : > { %v1434_v49 = vpop.f32.mrf.mxu2  ;;  %v1548_v51 = vpop.f32.mrf.mxu3 }
 0x315   : > { %v1435_v52 = vadd.f32 %v5875_v36, %v1434_v49  ;;  %v6121_v26 = vadd.f32 %v5992_v45, %v1548_v51 }
 0x317   : > { %v1480_v31 = vmax.f32 %v1435_v52, 0.0  ;;  %3951 = vst [vmem:[%s6005_s6 + $0x40] sm:$0xff] %v6121_v26  ;;  %1680 = vmatmul.f32.gmra.mxu0 %v6121_v26  ;;  %v2256_v53 = vmul.f32 %v6121_v26, %v6121_v26 }
 0x319   : > { %3936 = vst [vmem:[%s5882_s30 + $0xc8] sm:$0xff] %v1480_v31  ;;  %1598 = vmatmul.f32.gmra.mxu3 %v1480_v31  ;;  %2296 = vadd.xlane.f32.xlu2 %v2256_v53  ;;  %v6227_v31 = vld [vmem:[%s8232_s1] ss:$0 sm:$0xff]  ;;  %v1956_v53 = vld [vmem:[%s8229_s13 + $0x30] sm:$0xff]  ;;  %s8237_s1 = sshll.u32 %s8299_s10, 3  ;;  %s7018_s10 = scalar_lea.vmem [#allocation11], %s5403_s7 }
 0x31a   : > { %1979 = vmatpush.msra.mxu2 %v1956_v53  ;;  %v1953_v53 = vld [vmem:[%s8229_s13 + $0x18] sm:$0xff]  ;;  %s6897_s3 = scalar_lea.vmem %s8159_s20, %s8237_s1  ;;  %s4103_s7 = sshll.u32 %s5499_s0, 4  ;;  %s4104_s7 = int_to_ptr.vmem [resolvable:$true] %s4103_s7 }
 0x31b   : > { %s8284_s1 = sand.u32 1, %s5240_s8  }
 0x31c   : > { %v1437_v60 = vpop.f32.mrf.mxu2  ;;  %v1551_v61 = vpop.f32.mrf.mxu3  ;;  %1980 = vmatpush.msra.mxu2 %v1955_v8  ;;  %s7861_s29 = scalar_lea.sflag [#allocation7], %s8284_s1 }
 0x31d   : > { %v1438_v40 = vadd.f32 %v5875_v36, %v1437_v60  ;;  %v6134_v46 = vadd.f32 %v5992_v45, %v1551_v61 }
 0x31f   : > { %v1481_v62 = vmax.f32 %v1438_v40, 0.0  ;;  %3952 = vst [vmem:[%s6005_s6 + $0x48] sm:$0xff] %v6134_v46  ;;  %1683 = vmatmul.f32.gmra.mxu0 %v6134_v46  ;;  %v2257_v0 = vmul.f32 %v6134_v46, %v6134_v46 }
 0x321   : > { %3937 = vst [vmem:[%s5882_s30 + $0xd0] sm:$0xff] %v1481_v62  ;;  %1601 = vmatmul.f32.gmra.mxu3 %v1481_v62  ;;  %2298 = vadd.xlane.f32.xlu0 %v2257_v0  ;;  %v2349_v62 = vld [vmem:[#allocation2 + $0x28] sm:$0xff] }
 0x322   : > { %2370 = vmatpush.msra.mxu0 %v2349_v62 }
 0x324   : > { %v1440_v4 = vpop.f32.mrf.mxu2  ;;  %v1554_v57 = vpop.f32.mrf.mxu3  ;;  %2371 = vmatpush.msra.mxu0 %v2348_v19 }
 0x325   : > { %v1441_v5 = vadd.f32 %v5875_v36, %v1440_v4  ;;  %v6150_v7 = vadd.f32 %v5992_v45, %v1554_v57 }
 0x327   : > { %v1482_v63 = vmax.f32 %v1441_v5, 0.0  ;;  %3953 = vst [vmem:[%s6005_s6 + $0x50] sm:$0xff] %v6150_v7  ;;  %1686 = vmatmul.f32.gmra.mxu0 %v6150_v7  ;;  %v2258_v1 = vmul.f32 %v6150_v7, %v6150_v7 }
 0x329   : > { %3938 = vst [vmem:[%s5882_s30 + $0xd8] sm:$0xff] %v1482_v63  ;;  %1604 = vmatmul.f32.gmra.mxu3 %v1482_v63  ;;  %2300 = vadd.xlane.f32.xlu1 %v2258_v1  ;;  %v6256_v1 = vld [vmem:[%s8233_s19 + $0x28] sm:$0xff] }
 0x32a   : > { %3712 = vmatpush.msra.mxu1 %v6256_v1 }
 0x32c   : > { %v1443_v11 = vpop.f32.mrf.mxu2  ;;  %v1557_v22 = vpop.f32.mrf.mxu3 }
 0x32d   : > { %v1444_v14 = vadd.f32 %v5875_v36, %v1443_v11  ;;  %v6163_v15 = vadd.f32 %v5992_v45, %v1557_v22 }
 0x32f   : > { %v1483_v18 = vmax.f32 %v1444_v14, 0.0  ;;  %3954 = vst [vmem:[%s6005_s6 + $0x58] sm:$0xff] %v6163_v15  ;;  %1689 = vmatmul.f32.gmra.mxu0 %v6163_v15  ;;  %v2259_v16 = vmul.f32 %v6163_v15, %v6163_v15 }
 0x331   : > { %3939 = vst [vmem:[%s5882_s30 + $0xe0] sm:$0xff] %v1483_v18  ;;  %1607 = vmatmul.f32.gmra.mxu3 %v1483_v18  ;;  %2302 = vadd.xlane.f32.xlu2 %v2259_v16 }
 0x334   : > { %v1446_v27 = vpop.f32.mrf.mxu2  ;;  %v1560_v30 = vpop.f32.mrf.mxu3 }
 0x335   : > { %v1447_v23 = vadd.f32 %v5875_v36, %v1446_v27  ;;  %v6179_v35 = vadd.f32 %v5992_v45, %v1560_v30  ;;  %v2128_v27 = vld [vmem:[%s8231_s15 + $0x68] sm:$0xff] }
 0x337   : > { %v1484_v25 = vmax.f32 %v1447_v23, 0.0  ;;  %3955 = vst [vmem:[%s6005_s6 + $0x60] sm:$0xff] %v6179_v35  ;;  %1692 = vmatmul.f32.gmra.mxu0 %v6179_v35  ;;  %v2260_v28 = vmul.f32 %v6179_v35, %v6179_v35 }
 0x339   : > { %3940 = vst [vmem:[%s5882_s30 + $0xe8] sm:$0xff] %v1484_v25  ;;  %1610 = vmatmul.f32.gmra.mxu3 %v1484_v25  ;;  %2304 = vadd.xlane.f32.xlu0 %v2260_v28 }
 0x33c   : > { %v1449_v43 = vpop.f32.mrf.mxu2  ;;  %v1563_v32 = vpop.f32.mrf.mxu3 }
 0x33d   : > { %v1450_v34 = vadd.f32 %v5875_v36, %v1449_v43  ;;  %v6192_v59 = vadd.f32 %v5992_v45, %v1563_v32  ;;  %v1954_v43 = vld [vmem:[%s8229_s13 + $0x20] sm:$0xff] }
 0x33e   : > { %1981 = vmatpush.msra.mxu2 %v1954_v43 }
 0x33f   : > { %v1485_v37 = vmax.f32 %v1450_v34, 0.0  ;;  %3956 = vst [vmem:[%s6005_s6 + $0x68] sm:$0xff] %v6192_v59  ;;  %1695 = vmatmul.f32.gmra.mxu0 %v6192_v59  ;;  %v2261_v50 = vmul.f32 %v6192_v59, %v6192_v59 }
 0x340   : > { %1982 = vmatpush.msra.mxu2 %v1953_v53  ;;  %v2124_v53 = vld [vmem:[%s8231_s15 + $0x48] sm:$0xff] }
 0x341   : > { %3941 = vst [vmem:[%s5882_s30 + $0xf0] sm:$0xff] %v1485_v37  ;;  %1613 = vmatmul.f32.gmra.mxu3 %v1485_v37  ;;  %2306 = vadd.xlane.f32.xlu1 %v2261_v50 }
 0x344   : > { %v1452_v6 = vpop.f32.mrf.mxu2  ;;  %v1566_v10 = vpop.f32.mrf.mxu3 }
 0x345   : > { %v1453_v13 = vadd.f32 %v5875_v36, %v1452_v6  ;;  %v6205_v17 = vadd.f32 %v5992_v45, %v1566_v10  ;;  %v2130_v36 = vld [vmem:[%s8231_s15 + $0x78] sm:$0xff] }
 0x346   : > { %2135 = vmatpush.msra.mxu3 %v2130_v36  ;;  %v2347_v10 = vld [vmem:[#allocation2 + $0x18] sm:$0xff] }
 0x347   : > { %v1486_v20 = vmax.f32 %v1453_v13, 0.0  ;;  %3957 = vst [vmem:[%s6005_s6 + $0x70] sm:$0xff] %v6205_v17  ;;  %1698 = vmatmul.f32.gmra.mxu0 %v6205_v17  ;;  %v2262_v58 = vmul.f32 %v6205_v17, %v6205_v17  ;;  %v2127_v13 = vld [vmem:[%s8231_s15 + $0x60] sm:$0xff] }
 0x348   : > { %2136 = vmatpush.msra.mxu3 %v2129_v48  ;;  %2372 = vmatpush.msra.mxu0 %v2347_v10  ;;  %v2346_v48 = vld [vmem:[#allocation2 + $0x10] sm:$0xff] }
 0x349   : > { %3942 = vst [vmem:[%s5882_s30 + $0xf8] sm:$0xff] %v1486_v20  ;;  %1616 = vmatmul.f32.gmra.mxu3 %v1486_v20  ;;  %2308 = vadd.xlane.f32.xlu2 %v2262_v58 }
 0x34a   : > { %2137 = vmatpush.msra.mxu3 %v2128_v27  ;;  %2373 = vmatpush.msra.mxu0 %v2346_v48 }
 0x34c   : > { %v1569_v49 = vpop.f32.mrf.mxu3  ;;  %2138 = vmatpush.msra.mxu3 %v2127_v13 }
 0x34d   : > { %v6217_v51 = vadd.f32 %v5992_v45, %v1569_v49 }
 0x34f   : > { %3958 = vst [vmem:[%s6005_s6 + $0x78] sm:$0xff] %v6217_v51  ;;  %1701 = vmatmul.f32.gmra.mxu0 %v6217_v51  ;;  %v2263_v52 = vmul.f32 %v6217_v51, %v6217_v51 }
 0x351   : > { %2310 = vadd.xlane.f32.xlu0 %v2263_v52 }
 0x354   : > { %v1572_v55 = vpop.f32.mrf.mxu3  ;;  %v1657_v60 = vpop.f32.mrf.mxu0 }
 0x355   : > { %v6233_v33 = vadd.f32 %v5992_v45, %v1572_v55  ;;  %v1658_v61 = vadd.f32 %v6227_v31, %v1657_v60 }
 0x357   : > { %3959 = vst [vmem:[%s6005_s6 + $0x80] sm:$0xff] %v6233_v33  ;;  %1704 = vmatmul.f32.gmra.mxu0 %v6233_v33  ;;  %v2264_v40 = vmul.f32 %v6233_v33, %v6233_v33  ;;  %v1753_v0 = vmax.f32 %v1658_v61, 0.0 }
 0x359   : > { %2312 = vadd.xlane.f32.xlu1 %v2264_v40  ;;  %1821 = vmatmul.f32.vlgmr.msrb.gmra.mxu1 %v1753_v0 }
 0x35c   : > { %v1575_v3 = vpop.f32.mrf.mxu3  ;;  %v1660_v57 = vpop.f32.mrf.mxu0 }
 0x35d   : > { %v6245_v4 = vadd.f32 %v5992_v45, %v1575_v3  ;;  %v1661_v5 = vadd.f32 %v6227_v31, %v1660_v57  ;;  %v2126_v3 = vld [vmem:[%s8231_s15 + $0x58] sm:$0xff]  ;;  %v6325_v57 = vld [vmem:[%s8233_s19 + $0x20] sm:$0xff] }
 0x35e   : > { %2139 = vmatpush.msra.mxu3 %v2126_v3  ;;  %3713 = vmatpush.msra.mxu1 %v6325_v57  ;;  %v1950_v3 = vld [vmem:[%s8229_s13] sm:$0xff] }
 0x35f   : > { %3960 = vst [vmem:[%s6005_s6 + $0x88] sm:$0xff] %v6245_v4  ;;  %1707 = vmatmul.f32.gmra.mxu0 %v6245_v4  ;;  %v2265_v63 = vmul.f32 %v6245_v4, %v6245_v4  ;;  %v1754_v12 = vmax.f32 %v1661_v5, 0.0 }
 0x361   : > { %2314 = vadd.xlane.f32.xlu2 %v2265_v63  ;;  %1824 = vmatmul.f32.gmra.mxu1 %v1754_v12 }
 0x364   : > { %v1578_v11 = vpop.f32.mrf.mxu3  ;;  %v1663_v14 = vpop.f32.mrf.mxu0 }
 0x365   : > { %v6263_v22 = vadd.f32 %v5992_v45, %v1578_v11  ;;  %v1664_v18 = vadd.f32 %v6227_v31, %v1663_v14 }
 0x367   : > { %3961 = vst [vmem:[%s6005_s6 + $0x90] sm:$0xff] %v6263_v22  ;;  %1710 = vmatmul.f32.gmra.mxu0 %v6263_v22  ;;  %v2266_v16 = vmul.f32 %v6263_v22, %v6263_v22  ;;  %v1755_v41 = vmax.f32 %v1664_v18, 0.0  ;;  %v1952_v18 = vld [vmem:[%s8229_s13 + $0x10] sm:$0xff] }
 0x368   : > { %1983 = vmatpush.msra.mxu2 %v1952_v18 }
 0x369   : > { %2316 = vadd.xlane.f32.xlu0 %v2266_v16  ;;  %1827 = vmatmul.f32.gmra.mxu1 %v1755_v41 }
 0x36c   : > { %v1581_v30 = vpop.f32.mrf.mxu3  ;;  %v1666_v25 = vpop.f32.mrf.mxu0 }
 0x36d   : > { %v6275_v23 = vadd.f32 %v5992_v45, %v1581_v30  ;;  %v1667_v28 = vadd.f32 %v6227_v31, %v1666_v25 }
 0x36f   : > { %3962 = vst [vmem:[%s6005_s6 + $0x98] sm:$0xff] %v6275_v23  ;;  %1713 = vmatmul.f32.gmra.mxu0 %v6275_v23  ;;  %v2267_v29 = vmul.f32 %v6275_v23, %v6275_v23  ;;  %v1756_v42 = vmax.f32 %v1667_v28, 0.0  ;;  %v2345_v28 = vld [vmem:[#allocation2 + $0x8] sm:$0xff] }
 0x370   : > { %2374 = vmatpush.msra.mxu0 %v2345_v28 }
 0x371   : > { %2318 = vadd.xlane.f32.xlu1 %v2267_v29  ;;  %1830 = vmatmul.f32.gmra.mxu1 %v1756_v42  ;;  %v2125_v29 = vld [vmem:[%s8231_s15 + $0x50] sm:$0xff] }
 0x372   : > { %2140 = vmatpush.msra.mxu3 %v2125_v29 }
 0x374   : > { %v1584_v32 = vpop.f32.mrf.mxu3  ;;  %v1669_v37 = vpop.f32.mrf.mxu0  ;;  %2141 = vmatpush.msra.mxu3 %v2124_v53 }
 0x375   : > { %v6287_v34 = vadd.f32 %v5992_v45, %v1584_v32  ;;  %v1670_v50 = vadd.f32 %v6227_v31, %v1669_v37 }
 0x377   : > { %3963 = vst [vmem:[%s6005_s6 + $0xa0] sm:$0xff] %v6287_v34  ;;  %1716 = vmatmul.f32.gmra.mxu0 %v6287_v34  ;;  %v2268_v2 = vmul.f32 %v6287_v34, %v6287_v34  ;;  %v1757_v6 = vmax.f32 %v1670_v50, 0.0 }
 0x379   : > { %2320 = vadd.xlane.f32.xlu2 %v2268_v2  ;;  %1833 = vmatmul.f32.gmra.mxu1 %v1757_v6  ;;  %v1951_v6 = vld [vmem:[%s8229_s13 + $0x8] sm:$0xff]  ;;  %s4879_s13 = scalar_lea.hbm %s8161_s22, 512 }
 0x37a   : > { %1984 = vmatpush.msra.mxu2 %v1951_v6  ;;  %v2122_v6 = vld [vmem:[%s8231_s15 + $0x38] sm:$0xff] }
 0x37c   : > { %v1587_v20 = vpop.f32.mrf.mxu3  ;;  %v1672_v47 = vpop.f32.mrf.mxu0  ;;  %1985 = vmatpush.msra.mxu2 %v1950_v3 }
 0x37d   : > { %v6299_v58 = vadd.f32 %v5992_v45, %v1587_v20  ;;  %v1673_v36 = vadd.f32 %v6227_v31, %v1672_v47 }
 0x37f   : > { %3964 = vst [vmem:[%s6005_s6 + $0xa8] sm:$0xff] %v6299_v58  ;;  %1719 = vmatmul.f32.gmra.mxu0 %v6299_v58  ;;  %v2269_v49 = vmul.f32 %v6299_v58, %v6299_v58  ;;  %v1758_v52 = vmax.f32 %v1673_v36, 0.0 }
 0x381   : > { %2322 = vadd.xlane.f32.xlu0 %v2269_v49  ;;  %1836 = vmatmul.f32.gmra.mxu1 %v1758_v52  ;;  %v2344_v52 = vld [vmem:[#allocation2] sm:$0xff] }
 0x382   : > { %2375 = vmatpush.msra.mxu0 %v2344_v52  ;;  %v6391_v52 = vld [vmem:[%s8234_s12] ss:$0 sm:$0xff] }
 0x384   : > { %v1590_v55 = vpop.f32.mrf.mxu3  ;;  %v1675_v61 = vpop.f32.mrf.mxu0 }
 0x385   : > { %v6311_v60 = vadd.f32 %v5992_v45, %v1590_v55  ;;  %v1676_v40 = vadd.f32 %v6227_v31, %v1675_v61 }
 0x387   : > { %3965 = vst [vmem:[%s6005_s6 + $0xb0] sm:$0xff] %v6311_v60  ;;  %1722 = vmatmul.f32.gmra.mxu0 %v6311_v60  ;;  %v2270_v62 = vmul.f32 %v6311_v60, %v6311_v60  ;;  %v1759_v0 = vmax.f32 %v1676_v40, 0.0 }
 0x389   : > { %2324 = vadd.xlane.f32.xlu1 %v2270_v62  ;;  %1839 = vmatmul.f32.gmra.mxu1 %v1759_v0 }
 0x38c   : > { %v1593_v5 = vpop.f32.mrf.mxu3  ;;  %v1678_v12 = vpop.f32.mrf.mxu0 }
 0x38d   : > { %v6329_v63 = vadd.f32 %v5992_v45, %v1593_v5  ;;  %v1679_v8 = vadd.f32 %v6227_v31, %v1678_v12 }
 0x38f   : > { %3966 = vst [vmem:[%s6005_s6 + $0xb8] sm:$0xff] %v6329_v63  ;;  %1725 = vmatmul.f32.gmra.mxu0 %v6329_v63  ;;  %v2271_v11 = vmul.f32 %v6329_v63, %v6329_v63  ;;  %v1760_v14 = vmax.f32 %v1679_v8, 0.0 }
 0x391   : > { %2326 = vadd.xlane.f32.xlu2 %v2271_v11  ;;  %1842 = vmatmul.f32.gmra.mxu1 %v1760_v14 }
 0x394   : > { %v1596_v16 = vpop.f32.mrf.mxu3  ;;  %v1681_v41 = vpop.f32.mrf.mxu0 }
 0x395   : > { %v1597_v19 = vadd.f32 %v5992_v45, %v1596_v16  ;;  %v1682_v27 = vadd.f32 %v6227_v31, %v1681_v41  ;;  %v6370_v16 = vld [vmem:[%s8233_s19 + $0x18] sm:$0xff] }
 0x396   : > { %3714 = vmatpush.msra.mxu1 %v6370_v16 }
 0x397   : > { %3967 = vst [vmem:[%s6005_s6 + $0xc0] sm:$0xff] %v1597_v19  ;;  %1728 = vmatmul.f32.gmra.mxu0 %v1597_v19  ;;  %v2272_v30 = vmul.f32 %v1597_v19, %v1597_v19  ;;  %v1761_v25 = vmax.f32 %v1682_v27, 0.0  ;;  %v2123_v19 = vld [vmem:[%s8231_s15 + $0x40] sm:$0xff] }
 0x398   : > { %2142 = vmatpush.msra.mxu3 %v2123_v19 }
 0x399   : > { %2328 = vadd.xlane.f32.xlu0 %v2272_v30  ;;  %1845 = vmatmul.f32.gmra.mxu1 %v1761_v25 }
 0x39a   : > { %2143 = vmatpush.msra.mxu3 %v2122_v6 }
 0x39c   : > { %v1599_v42 = vpop.f32.mrf.mxu3  ;;  %v1684_v32 = vpop.f32.mrf.mxu0 }
 0x39d   : > { %v1600_v43 = vadd.f32 %v5992_v45, %v1599_v42  ;;  %v1685_v37 = vadd.f32 %v6227_v31, %v1684_v32 }
 0x39f   : > { %3968 = vst [vmem:[%s6005_s6 + $0xc8] sm:$0xff] %v1600_v43  ;;  %1731 = vmatmul.f32.gmra.mxu0 %v1600_v43  ;;  %v2273_v50 = vmul.f32 %v1600_v43, %v1600_v43  ;;  %v1762_v2 = vmax.f32 %v1685_v37, 0.0 }
 0x3a1   : > { %2330 = vadd.xlane.f32.xlu1 %v2273_v50  ;;  %1848 = vmatmul.f32.gmra.mxu1 %v1762_v2 }
 0x3a4   : > { %v1602_v10 = vpop.f32.mrf.mxu3  ;;  %v1687_v20 = vpop.f32.mrf.mxu0 }
 0x3a5   : > { %v1603_v13 = vadd.f32 %v5992_v45, %v1602_v10  ;;  %v1688_v47 = vadd.f32 %v6227_v31, %v1687_v20 }
 0x3a7   : > { %3969 = vst [vmem:[%s6005_s6 + $0xd0] sm:$0xff] %v1603_v13  ;;  %1734 = vmatmul.f32.gmra.mxu0 %v1603_v13  ;;  %v2274_v36 = vmul.f32 %v1603_v13, %v1603_v13  ;;  %v1763_v49 = vmax.f32 %v1688_v47, 0.0 }
 0x3a9   : > { %2332 = vadd.xlane.f32.xlu2 %v2274_v36  ;;  %1851 = vmatmul.f32.gmra.mxu1 %v1763_v49 }
 0x3ac   : > { %v1605_v55 = vpop.f32.mrf.mxu3  ;;  %v1690_v40 = vpop.f32.mrf.mxu0 }
 0x3ad   : > { %v1606_v61 = vadd.f32 %v5992_v45, %v1605_v55  ;;  %v1691_v62 = vadd.f32 %v6227_v31, %v1690_v40 }
 0x3af   : > { %3970 = vst [vmem:[%s6005_s6 + $0xd8] sm:$0xff] %v1606_v61  ;;  %1737 = vmatmul.f32.gmra.mxu0 %v1606_v61  ;;  %v2275_v0 = vmul.f32 %v1606_v61, %v1606_v61  ;;  %v1764_v48 = vmax.f32 %v1691_v62, 0.0 }
 0x3b1   : > { %2334 = vadd.xlane.f32.xlu0 %v2275_v0  ;;  %1854 = vmatmul.f32.gmra.mxu1 %v1764_v48  ;;  %v2121_v0 = vld [vmem:[%s8231_s15 + $0x30] sm:$0xff] }
 0x3b2   : > { %2144 = vmatpush.msra.mxu3 %v2121_v0  ;;  %v6435_v0 = vld [vmem:[%s8233_s19 + $0x8] sm:$0xff] }
 0x3b4   : > { %v1608_v5 = vpop.f32.mrf.mxu3  ;;  %v1693_v8 = vpop.f32.mrf.mxu0 }
 0x3b5   : > { %v1609_v12 = vadd.f32 %v5992_v45, %v1608_v5  ;;  %v1694_v11 = vadd.f32 %v6227_v31, %v1693_v8 }
 0x3b7   : > { %3971 = vst [vmem:[%s6005_s6 + $0xe0] sm:$0xff] %v1609_v12  ;;  %1740 = vmatmul.f32.gmra.mxu0 %v1609_v12  ;;  %v2276_v14 = vmul.f32 %v1609_v12, %v1609_v12  ;;  %v1765_v18 = vmax.f32 %v1694_v11, 0.0  ;;  %v6405_v11 = vld [vmem:[%s8233_s19 + $0x10] sm:$0xff] }
 0x3b8   : > { %3715 = vmatpush.msra.mxu1 %v6405_v11 }
 0x3b9   : > { %2336 = vadd.xlane.f32.xlu1 %v2276_v14  ;;  %1857 = vmatmul.f32.gmra.mxu1 %v1765_v18 }
 0x3ba   : > { %3716 = vmatpush.msra.mxu1 %v6435_v0 }
 0x3bc   : > { %v1611_v41 = vpop.f32.mrf.mxu3  ;;  %v1696_v30 = vpop.f32.mrf.mxu0 }
 0x3bd   : > { %v1612_v27 = vadd.f32 %v5992_v45, %v1611_v41  ;;  %v1697_v25 = vadd.f32 %v6227_v31, %v1696_v30  ;;  %v2120_v30 = vld [vmem:[%s8231_s15 + $0x28] sm:$0xff] }
 0x3be   : > { %2145 = vmatpush.msra.mxu3 %v2120_v30 }
 0x3bf   : > { %3972 = vst [vmem:[%s6005_s6 + $0xe8] sm:$0xff] %v1612_v27  ;;  %1743 = vmatmul.f32.gmra.mxu0 %v1612_v27  ;;  %v2277_v28 = vmul.f32 %v1612_v27, %v1612_v27  ;;  %v1766_v29 = vmax.f32 %v1697_v25, 0.0 }
 0x3c1   : > { %2338 = vadd.xlane.f32.xlu2 %v2277_v28  ;;  %1860 = vmatmul.f32.gmra.mxu1 %v1766_v29 }
 0x3c4   : > { %v1614_v42 = vpop.f32.mrf.mxu3  ;;  %v1699_v32 = vpop.f32.mrf.mxu0 }
 0x3c5   : > { %v1615_v43 = vadd.f32 %v5992_v45, %v1614_v42  ;;  %v1700_v37 = vadd.f32 %v6227_v31, %v1699_v32 }
 0x3c7   : > { %3973 = vst [vmem:[%s6005_s6 + $0xf0] sm:$0xff] %v1615_v43  ;;  %1746 = vmatmul.f32.gmra.mxu0 %v1615_v43  ;;  %v2278_v50 = vmul.f32 %v1615_v43, %v1615_v43  ;;  %v1767_v2 = vmax.f32 %v1700_v37, 0.0 }
 0x3c9   : > { %2340 = vadd.xlane.f32.xlu0 %v2278_v50  ;;  %1863 = vmatmul.f32.gmra.mxu1 %v1767_v2 }
 0x3cc   : > { %v1617_v10 = vpop.f32.mrf.mxu3  ;;  %v1702_v20 = vpop.f32.mrf.mxu0 }
 0x3cd   : > { %v1618_v13 = vadd.f32 %v5992_v45, %v1617_v10  ;;  %v1703_v47 = vadd.f32 %v6227_v31, %v1702_v20 }
 0x3cf   : > { %3974 = vst [vmem:[%s6005_s6 + $0xf8] sm:$0xff] %v1618_v13  ;;  %1749 = vmatmul.f32.gmra.mxu0 %v1618_v13  ;;  %v2279_v36 = vmul.f32 %v1618_v13, %v1618_v13  ;;  %v1768_v49 = vmax.f32 %v1703_v47, 0.0 }
 0x3d1   : > { %2342 = vadd.xlane.f32.xlu1 %v2279_v36  ;;  %1866 = vmatmul.f32.gmra.mxu1 %v1768_v49 }
 0x3d4   : > { %v1705_v53 = vpop.f32.mrf.mxu0 }
 0x3d5   : > { %v1706_v55 = vadd.f32 %v6227_v31, %v1705_v53 }
 0x3d6   : > { %v1822_v61 = vpop.f32.mrf.mxu1 }
 0x3d7   : > { %2376 = vmatmul.f32.vlgmr.msra.gmra.mxu0 %v6002_v24  ;;  %v1769_v45 = vmax.f32 %v1706_v55, 0.0  ;;  %v1823_v40 = vadd.f32 %v6391_v52, %v1822_v61 }
 0x3d9   : > { %v1918_v62 = vmax.f32 %v1823_v40, 0.0  ;;  %1869 = vmatmul.f32.gmra.mxu1 %v1769_v45 }
 0x3db   : > { %1986 = vmatmul.f32.vlgmr.msra.gmra.mxu2 %v1918_v62 }
 0x3dc   : > { %v1708_v48 = vpop.f32.mrf.mxu0 }
 0x3dd   : > { %v1709_v3 = vadd.f32 %v6227_v31, %v1708_v48 }
 0x3de   : > { %v1825_v5 = vpop.f32.mrf.mxu1 }
 0x3df   : > { %2379 = vmatmul.f32.gmra.mxu0 %v6018_v38  ;;  %v1770_v12 = vmax.f32 %v1709_v3, 0.0  ;;  %v1826_v24 = vadd.f32 %v6391_v52, %v1825_v5 }
 0x3e1   : > { %v1919_v8 = vmax.f32 %v1826_v24, 0.0  ;;  %1872 = vmatmul.f32.gmra.mxu1 %v1770_v12 }
 0x3e3   : > { %1989 = vmatmul.f32.gmra.mxu2 %v1919_v8 }
 0x3e4   : > { %v1711_v14 = vpop.f32.mrf.mxu0 }
 0x3e5   : > { %v1712_v18 = vadd.f32 %v6227_v31, %v1711_v14 }
 0x3e6   : > { %v1828_v19 = vpop.f32.mrf.mxu1 }
 0x3e7   : > { %2382 = vmatmul.f32.gmra.mxu0 %v6034_v54  ;;  %v1771_v38 = vmax.f32 %v1712_v18, 0.0  ;;  %v1829_v41 = vadd.f32 %v6391_v52, %v1828_v19 }
 0x3e9   : > { %v1920_v27 = vmax.f32 %v1829_v41, 0.0  ;;  %1875 = vmatmul.f32.gmra.mxu1 %v1771_v38 }
 0x3eb   : > { %1992 = vmatmul.f32.gmra.mxu2 %v1920_v27 }
 0x3ec   : > { %v1714_v25 = vpop.f32.mrf.mxu0 }
 0x3ed   : > { %v1715_v28 = vadd.f32 %v6227_v31, %v1714_v25 }
 0x3ee   : > { %v1831_v29 = vpop.f32.mrf.mxu1 }
 0x3ef   : > { %2385 = vmatmul.f32.gmra.mxu0 %v6047_v9  ;;  %v1772_v42 = vmax.f32 %v1715_v28, 0.0  ;;  %v1832_v54 = vadd.f32 %v6391_v52, %v1831_v29  ;;  %v2119_v9 = vld [vmem:[%s8231_s15 + $0x20] sm:$0xff] }
 0x3f0   : > { %2146 = vmatpush.msra.mxu3 %v2119_v9 }
 0x3f1   : > { %v1921_v43 = vmax.f32 %v1832_v54, 0.0  ;;  %1878 = vmatmul.f32.gmra.mxu1 %v1772_v42 }
 0x3f3   : > { %1995 = vmatmul.f32.gmra.mxu2 %v1921_v43 }
 0x3f4   : > { %v1717_v32 = vpop.f32.mrf.mxu0 }
 0x3f5   : > { %v1718_v37 = vadd.f32 %v6227_v31, %v1717_v32 }
 0x3f6   : > { %v1834_v50 = vpop.f32.mrf.mxu1 }
 0x3f7   : > { %2388 = vmatmul.f32.gmra.mxu0 %v6063_v21  ;;  %v1773_v2 = vmax.f32 %v1718_v37, 0.0  ;;  %v1835_v6 = vadd.f32 %v6391_v52, %v1834_v50 }
 0x3f9   : > { %v1922_v10 = vmax.f32 %v1835_v6, 0.0  ;;  %1881 = vmatmul.f32.gmra.mxu1 %v1773_v2 }
 0x3fb   : > { %1998 = vmatmul.f32.gmra.mxu2 %v1922_v10 }
 0x3fc   : > { %v1720_v13 = vpop.f32.mrf.mxu0 }
 0x3fd   : > { %v1721_v20 = vadd.f32 %v6227_v31, %v1720_v13 }
 0x3fe   : > { %v1837_v47 = vpop.f32.mrf.mxu1 }
 0x3ff   : > { %2391 = vmatmul.f32.gmra.mxu0 %v6076_v39  ;;  %v1774_v36 = vmax.f32 %v1721_v20, 0.0  ;;  %v1838_v21 = vadd.f32 %v6391_v52, %v1837_v47  ;;  %v2118_v39 = vld [vmem:[%s8231_s15 + $0x18] sm:$0xff] }
 0x400   : > { %2147 = vmatpush.msra.mxu3 %v2118_v39 }
 0x401   : > { %v1923_v49 = vmax.f32 %v1838_v21, 0.0  ;;  %1884 = vmatmul.f32.gmra.mxu1 %v1774_v36 }
 0x403   : > { %2001 = vmatmul.f32.gmra.mxu2 %v1923_v49 }
 0x404   : > { %v1723_v53 = vpop.f32.mrf.mxu0 }
 0x405   : > { %v1724_v55 = vadd.f32 %v6227_v31, %v1723_v53 }
 0x406   : > { %v1840_v61 = vpop.f32.mrf.mxu1 }
 0x407   : > { %2394 = vmatmul.f32.gmra.mxu0 %v6092_v56  ;;  %v1775_v45 = vmax.f32 %v1724_v55, 0.0  ;;  %v1841_v40 = vadd.f32 %v6391_v52, %v1840_v61  ;;  %v3696_v61 = vld [vmem:[%s8233_s19] sm:$0xff] }
 0x408   : > { %3717 = vmatpush.msra.mxu1 %v3696_v61 }
 0x409   : > { %v1924_v62 = vmax.f32 %v1841_v40, 0.0  ;;  %1887 = vmatmul.f32.gmra.mxu1 %v1775_v45  ;;  %v2115_v45 = vld [vmem:[%s8231_s15] sm:$0xff] }
 0x40b   : > { %2004 = vmatmul.f32.gmra.mxu2 %v1924_v62 }
 0x40c   : > { %v1726_v48 = vpop.f32.mrf.mxu0 }
 0x40d   : > { %v1727_v56 = vadd.f32 %v6227_v31, %v1726_v48 }
 0x40e   : > { %v1843_v3 = vpop.f32.mrf.mxu1 }
 0x40f   : > { %2397 = vmatmul.f32.gmra.mxu0 %v6105_v44  ;;  %v1776_v5 = vmax.f32 %v1727_v56, 0.0  ;;  %v1844_v12 = vadd.f32 %v6391_v52, %v1843_v3  ;;  %v2117_v44 = vld [vmem:[%s8231_s15 + $0x10] sm:$0xff] }
 0x410   : > { %2148 = vmatpush.msra.mxu3 %v2117_v44 }
 0x411   : > { %v1925_v24 = vmax.f32 %v1844_v12, 0.0  ;;  %1890 = vmatmul.f32.gmra.mxu1 %v1776_v5 }
 0x413   : > { %2007 = vmatmul.f32.gmra.mxu2 %v1925_v24 }
 0x414   : > { %v1729_v8 = vpop.f32.mrf.mxu0 }
 0x415   : > { %v1730_v14 = vadd.f32 %v6227_v31, %v1729_v8  ;;  %v6485_v8 = vld [vmem:[%s8235_s18] ss:$0 sm:$0xff] }
 0x416   : > { %v1846_v18 = vpop.f32.mrf.mxu1 }
 0x417   : > { %2400 = vmatmul.f32.gmra.mxu0 %v6121_v26  ;;  %v1777_v19 = vmax.f32 %v1730_v14, 0.0  ;;  %v1847_v38 = vadd.f32 %v6391_v52, %v1846_v18 }
 0x419   : > { %v1926_v41 = vmax.f32 %v1847_v38, 0.0  ;;  %1893 = vmatmul.f32.gmra.mxu1 %v1777_v19 }
 0x41b   : > { %2010 = vmatmul.f32.gmra.mxu2 %v1926_v41 }
 0x41c   : > { %v1732_v27 = vpop.f32.mrf.mxu0 }
 0x41d   : > { %v1733_v30 = vadd.f32 %v6227_v31, %v1732_v27  ;;  %v4782_v27 = vld [vmem:[%s5303_s28] sm:$0xff] }
 0x41e   : > { %v1849_v25 = vpop.f32.mrf.mxu1 }
 0x41f   : > { %2403 = vmatmul.f32.gmra.mxu0 %v6134_v46  ;;  %v1778_v28 = vmax.f32 %v1733_v30, 0.0  ;;  %v1850_v26 = vadd.f32 %v6391_v52, %v1849_v25  ;;  %v2116_v46 = vld [vmem:[%s8231_s15 + $0x8] sm:$0xff] }
 0x420   : > { %2149 = vmatpush.msra.mxu3 %v2116_v46 }
 0x421   : > { %v1927_v29 = vmax.f32 %v1850_v26, 0.0  ;;  %1896 = vmatmul.f32.gmra.mxu1 %v1778_v28  ;;  %v6495_v28 = vld [vmem:[%s8236_s14] ss:$0 sm:$0xff] }
 0x422   : > { %2150 = vmatpush.msra.mxu3 %v2115_v45 }
 0x423   : > { %2013 = vmatmul.f32.gmra.mxu2 %v1927_v29 }
 0x424   : > { %v1735_v42 = vpop.f32.mrf.mxu0  ;;  %4560 = vmatpush.msrb.mxu3 %v6256_v1 }
 0x425   : > { %v1736_v54 = vadd.f32 %v6227_v31, %v1735_v42 }
 0x426   : > { %v1852_v43 = vpop.f32.mrf.mxu1  ;;  %4561 = vmatpush.msrb.mxu3 %v6325_v57 }
 0x427   : > { %2406 = vmatmul.f32.gmra.mxu0 %v6150_v7  ;;  %v1779_v32 = vmax.f32 %v1736_v54, 0.0  ;;  %v1853_v37 = vadd.f32 %v6391_v52, %v1852_v43 }
 0x428   : > { %4562 = vmatpush.msrb.mxu3 %v6370_v16 }
 0x429   : > { %v1928_v50 = vmax.f32 %v1853_v37, 0.0  ;;  %1899 = vmatmul.f32.gmra.mxu1 %v1779_v32 }
 0x42a   : > { %4563 = vmatpush.msrb.mxu3 %v6405_v11  ;;  %v2281_v11 = vpop.xlane.xlu0 %2280 }
 0x42b   : > { %2016 = vmatmul.f32.gmra.mxu2 %v1928_v50  ;;  %v2477_v18 = vadd.f32 %v6485_v8, %v2281_v11  ;;  %v2285_v50 = vpop.xlane.xlu1 %2284 }
 0x42c   : > { %v1738_v2 = vpop.f32.mrf.mxu0  ;;  %4564 = vmatpush.msrb.mxu3 %v6435_v0 }
 0x42d   : > { %v1739_v6 = vadd.f32 %v6227_v31, %v1738_v2 }
 0x42e   : > { %v1855_v10 = vpop.f32.mrf.mxu1  ;;  %4565 = vmatpush.msrb.mxu3 %v3696_v61 }
 0x42f   : > { %2409 = vmatmul.f32.gmra.mxu0 %v6163_v15  ;;  %v1780_v9 = vmax.f32 %v1739_v6, 0.0  ;;  %v1856_v7 = vadd.f32 %v6391_v52, %v1855_v10  ;;  %v4783_v10 = vld [vmem:[%s5303_s28 + $0x8] sm:$0xff] }
 0x431   : > { %v1929_v13 = vmax.f32 %v1856_v7, 0.0  ;;  %1902 = vmatmul.f32.gmra.mxu1 %v1780_v9  ;;  %v3117_v9 = vlaneseq }
 0x432   : > { %v2283_v30 = vpop.xlane.xlu0 %2282 }
 0x433   : > { %2019 = vmatmul.f32.gmra.mxu2 %v1929_v13 }
 0x434   : > { %v1741_v20 = vpop.f32.mrf.mxu0 }
 0x435   : > { %v1742_v47 = vadd.f32 %v6227_v31, %v1741_v20 }
 0x436   : > { %v1858_v36 = vpop.f32.mrf.mxu1 }
 0x437   : > { %2412 = vmatmul.f32.gmra.mxu0 %v6179_v35  ;;  %v1781_v21 = vmax.f32 %v1742_v47, 0.0  ;;  %v1859_v49 = vadd.f32 %v6391_v52, %v1858_v36  ;;  %v2479_v47 = vadd.f32 %v6485_v8, %v2285_v50 }
 0x439   : > { %v1930_v53 = vmax.f32 %v1859_v49, 0.0  ;;  %1905 = vmatmul.f32.gmra.mxu1 %v1781_v21 }
 0x43b   : > { %2022 = vmatmul.f32.gmra.mxu2 %v1930_v53 }
 0x43c   : > { %v1744_v55 = vpop.f32.mrf.mxu0 }
 0x43d   : > { %v1745_v15 = vadd.f32 %v6227_v31, %v1744_v55  ;;  %v6508_v55 = vand.u32 127, %v3117_v9 }
 0x43e   : > { %v1861_v40 = vpop.f32.mrf.mxu1 }
 0x43f   : > { %2415 = vmatmul.f32.gmra.mxu0 %v6192_v59  ;;  %v1782_v35 = vmax.f32 %v1745_v15, 0.0  ;;  %v1862_v62 = vadd.f32 %v6391_v52, %v1861_v40  ;;  %vm3119_vm4 = vcmp.lt.s32.totalorder %v6508_v55, 4 }
 0x441   : > { %v1931_v39 = vmax.f32 %v1862_v62, 0.0  ;;  %1908 = vmatmul.f32.gmra.mxu1 %v1782_v35 }
 0x443   : > { %2025 = vmatmul.f32.gmra.mxu2 %v1931_v39 }
 0x444   : > { %v1747_v48 = vpop.f32.mrf.mxu0 }
 0x445   : > { %v1748_v56 = vadd.f32 %v6227_v31, %v1747_v48 }
 0x446   : > { %v1864_v3 = vpop.f32.mrf.mxu1 }
 0x447   : > { %2418 = vmatmul.f32.gmra.mxu0 %v6205_v17  ;;  %v1783_v59 = vmax.f32 %v1748_v56, 0.0  ;;  %v1865_v5 = vadd.f32 %v6391_v52, %v1864_v3  ;;  %v4784_v3 = vld [vmem:[%s5303_s28 + $0x10] sm:$0xff] }
 0x449   : > { %v1932_v1 = vmax.f32 %v1865_v5, 0.0  ;;  %1911 = vmatmul.f32.gmra.mxu1 %v1783_v59  ;;  %v2287_v59 = vpop.xlane.xlu1 %2286 }
 0x44b   : > { %2028 = vmatmul.f32.gmra.mxu2 %v1932_v1 }
 0x44c   : > { %v1750_v57 = vpop.f32.mrf.mxu0 }
 0x44d   : > { %v1751_v12 = vadd.f32 %v6227_v31, %v1750_v57 }
 0x44e   : > { %v1867_v16 = vpop.f32.mrf.mxu1 }
 0x44f   : > { %2421 = vmatmul.f32.gmra.mxu0 %v6217_v51  ;;  %v1784_v24 = vmax.f32 %v1751_v12, 0.0  ;;  %v1868_v17 = vadd.f32 %v6391_v52, %v1867_v16 }
 0x451   : > { %v1933_v0 = vmax.f32 %v1868_v17, 0.0  ;;  %1914 = vmatmul.f32.gmra.mxu1 %v1784_v24  ;;  %v2480_v17 = vadd.f32 %v6485_v8, %v2287_v59 }
 0x453   : > { %2031 = vmatmul.f32.gmra.mxu2 %v1933_v0 }
 0x454   : > { %v2377_v14 = vpop.f32.mrf.mxu0 }
 0x455   : > { %v2509_v31 = vmul.f32 2.0, %v2377_v14 }
 0x456   : > { %v1870_v19 = vpop.f32.mrf.mxu1 }
 0x457   : > { %2424 = vmatmul.f32.gmra.mxu0 %v6233_v33  ;;  %v2541_v51 = vsub.f32 %v2477_v18, %v2509_v31  ;;  %v1871_v38 = vadd.f32 %v6391_v52, %v1870_v19  ;;  %v2478_v33 = vadd.f32 %v6485_v8, %v2283_v30 }
 0x459   : > { %v2573_v41 = vmax.f32 %v2541_v51, 0.0  ;;  %v1934_v44 = vmax.f32 %v1871_v38, 0.0  ;;  %4480 = vmatmul.msk.f32.vlgmr.msra.gmra.mxu1 %vm915_vm0, %v4782_v27  ;;  %v2289_v27 = vpop.xlane.xlu2 %2288 }
 0x45b   : > { %v2605_v25 = vadd.f32 1.0, %v2573_v41  ;;  %2034 = vmatmul.f32.gmra.mxu2 %v1934_v44 }
 0x45c   : > { %v2380_v26 = vpop.f32.mrf.mxu0 }
 0x45d   : > { %4654 = vrcp.f32 %v2605_v25  ;;  %v2510_v29 = vmul.f32 2.0, %v2380_v26  ;;  %v2648_v40 = vand.u32 2147483648, %v2605_v25  ;;  %v2646_v62 = vand.u32 2147483647, %v2605_v25 }
 0x45e   : > { %v1873_v42 = vpop.f32.mrf.mxu1  ;;  %v1987_v54 = vpop.f32.mrf.mxu2  ;;  %vm2642_vm2 = vweird.f32 %v2605_v25 }
 0x45f   : > { %2427 = vmatmul.f32.gmra.mxu0 %v6245_v4  ;;  %v2542_v43 = vsub.f32 %v2478_v33, %v2510_v29  ;;  %v1874_v32 = vadd.f32 %v6391_v52, %v1873_v42  ;;  %v1988_v37 = vadd.f32 %v6495_v28, %v1987_v54  ;;  %v2649_v57 = vor.u32 1.1754944e-38, %v2648_v40  ;;  %v4785_v29 = vld [vmem:[%s5303_s28 + $0x18] sm:$0xff] }
 0x460   : > { %vm2647_vm5 = vcmp.eq.f32.partialorder %v2646_v62, 8.507059e+37 }
 0x461   : > { %v2574_v46 = vmax.f32 %v2542_v43, 0.0  ;;  %v1935_v2 = vmax.f32 %v1874_v32, 0.0  ;;  %v2083_v6 = vmax.f32 %v1988_v37, 0.0  ;;  %4481 = vmatmul.msk.f32.gmra.mxu1 %vm915_vm0, %v4783_v10  ;;  %v2291_v40 = vpop.xlane.xlu2 %2290 }
 0x463   : > { %v4655_v7 = vpop.eup %4654  ;;  %v6503_v13 = vadd.f32 1.0, %v2574_v46  ;;  %2037 = vmatmul.f32.gmra.mxu2 %v1935_v2  ;;  %2151 = vmatmul.f32.vlgmr.msra.gmra.mxu3 %v2083_v6  ;;  %v2481_v2 = vadd.f32 %v6485_v8, %v2289_v27 }
 0x464   : > { %v2383_v20 = vpop.f32.mrf.mxu0  ;;  %v2638_v4 = vmul.f32 %v4655_v7, %v2605_v25  ;;  %vm2643_vm1 = vweird.f32 %v4655_v7 }
 0x465   : > { %4656 = vrcp.f32 %v6503_v13  ;;  %v2511_v36 = vmul.f32 2.0, %v2383_v20  ;;  %vm2644_vm3 = vmor %vm2642_vm2, %vm2643_vm1  ;;  %v2663_v44 = vand.u32 2147483648, %v6503_v13  ;;  %v2661_v25 = vand.u32 2147483647, %v6503_v13 }
 0x466   : > { %v1876_v21 = vpop.f32.mrf.mxu1  ;;  %v1990_v49 = vpop.f32.mrf.mxu2  ;;  %v2639_v53 = vsub.f32 1.0, %v2638_v4  ;;  %vm2657_vm7 = vweird.f32 %v6503_v13 }
 0x467   : > { %2430 = vmatmul.f32.gmra.mxu0 %v6263_v22  ;;  %v2543_v15 = vsub.f32 %v2479_v47, %v2511_v36  ;;  %v1877_v61 = vadd.f32 %v6391_v52, %v1876_v21  ;;  %v1991_v45 = vadd.f32 %v6495_v28, %v1990_v49  ;;  %v2664_v32 = vor.u32 1.1754944e-38, %v2663_v44  ;;  %v2293_v44 = vpop.xlane.xlu0 %2292 }
 0x468   : > { %v2640_v35 = vmul.f32 %v4655_v7, %v2639_v53  ;;  %vm2662_vm9 = vcmp.eq.f32.partialorder %v2661_v25, 8.507059e+37 }
 0x469   : > { %v2575_v39 = vmax.f32 %v2543_v15, 0.0  ;;  %v1936_v48 = vmax.f32 %v1877_v61, 0.0  ;;  %v2084_v56 = vmax.f32 %v1991_v45, 0.0  ;;  %4482 = vmatmul.msk.f32.gmra.mxu1 %vm915_vm0, %v4784_v3  ;;  %v4786_v45 = vld [vmem:[%s5303_s28 + $0x20] sm:$0xff] }
 0x46a   : > { %v2641_v22 = vadd.f32 %v4655_v7, %v2640_v35 }
 0x46b   : > { %v4657_v5 = vpop.eup %4656  ;;  %v6514_v1 = vadd.f32 1.0, %v2575_v39  ;;  %2040 = vmatmul.f32.gmra.mxu2 %v1936_v48  ;;  %2154 = vmatmul.f32.gmra.mxu3 %v2084_v56 }
 0x46c   : > { %v2386_v12 = vpop.f32.mrf.mxu0  ;;  %v2645_v16 = vsel %vm2644_vm3, %v4655_v7, %v2641_v22  ;;  %v2653_v24 = vmul.f32 %v4657_v5, %v6503_v13  ;;  %vm2658_vm6 = vweird.f32 %v4657_v5  ;;  %v2482_v22 = vadd.f32 %v6485_v8, %v2291_v40 }
 0x46d   : > { %4658 = vrcp.f32 %v6514_v1  ;;  %v2512_v11 = vmul.f32 2.0, %v2386_v12  ;;  %v2650_v0 = vsel %vm2647_vm5, %v2649_v57, %v2645_v16  ;;  %vm2659_vm8 = vmor %vm2657_vm7, %vm2658_vm6  ;;  %v2678_v21 = vand.u32 2147483648, %v6514_v1 }
 0x46e   : > { %v1879_v14 = vpop.f32.mrf.mxu1  ;;  %v1993_v18 = vpop.f32.mrf.mxu2  ;;  %v6523_v31 = vsel %vm3119_vm4, %v2650_v0, 0.0  ;;  %v2654_v19 = vsub.f32 1.0, %v2653_v24  ;;  %v2676_v53 = vand.u32 2147483647, %v6514_v1  ;;  %vm2672_vm11 = vweird.f32 %v6514_v1 }
 0x46f   : > { %2433 = vmatmul.f32.gmra.mxu0 %v6275_v23  ;;  %v2544_v51 = vsub.f32 %v2480_v17, %v2512_v11  ;;  %v1880_v38 = vadd.f32 %v6391_v52, %v1879_v14  ;;  %v1994_v41 = vadd.f32 %v6495_v28, %v1993_v18  ;;  %3152 = vadd.xlane.f32.xlu2 %v6523_v31  ;;  %v2679_v48 = vor.u32 1.1754944e-38, %v2678_v21  ;;  %v2295_v21 = vpop.xlane.xlu1 %2294 }
 0x470   : > { %v2655_v30 = vmul.f32 %v4657_v5, %v2654_v19  ;;  %vm2677_vm13 = vcmp.eq.f32.partialorder %v2676_v53, 8.507059e+37 }
 0x471   : > { %v2576_v23 = vmax.f32 %v2544_v51, 0.0  ;;  %v1937_v26 = vmax.f32 %v1880_v38, 0.0  ;;  %v2085_v33 = vmax.f32 %v1994_v41, 0.0  ;;  %4483 = vmatmul.msk.f32.gmra.mxu1 %vm915_vm0, %v4785_v29  ;;  %v4787_v41 = vld [vmem:[%s5303_s28 + $0x28] sm:$0xff] }
 0x472   : > { %v2656_v42 = vadd.f32 %v4657_v5, %v2655_v30 }
 0x473   : > { %v4659_v54 = vpop.eup %4658  ;;  %v6533_v43 = vadd.f32 1.0, %v2576_v23  ;;  %2043 = vmatmul.f32.gmra.mxu2 %v1937_v26  ;;  %2157 = vmatmul.f32.gmra.mxu3 %v2085_v33 }
 0x474   : > { %v2389_v37 = vpop.f32.mrf.mxu0  ;;  %v2660_v50 = vsel %vm2659_vm8, %v4657_v5, %v2656_v42  ;;  %v2668_v46 = vmul.f32 %v4659_v54, %v6514_v1  ;;  %vm2673_vm10 = vweird.f32 %v4659_v54  ;;  %v2483_v42 = vadd.f32 %v6485_v8, %v2293_v44 }
 0x475   : > { %4660 = vrcp.f32 %v6533_v43  ;;  %v2513_v6 = vmul.f32 2.0, %v2389_v37  ;;  %v2665_v10 = vsel %vm2662_vm9, %v2664_v32, %v2660_v50  ;;  %vm2674_vm12 = vmor %vm2672_vm11, %vm2673_vm10  ;;  %v2693_v14 = vand.u32 2147483648, %v6533_v43 }
 0x476   : > { %v1882_v9 = vpop.f32.mrf.mxu1  ;;  %v1996_v7 = vpop.f32.mrf.mxu2  ;;  %v6541_v13 = vsel %vm3119_vm4, %v2665_v10, 0.0  ;;  %v2669_v20 = vsub.f32 1.0, %v2668_v46  ;;  %v2691_v19 = vand.u32 2147483647, %v6533_v43  ;;  %vm2687_vm15 = vweird.f32 %v6533_v43 }
 0x477   : > { %2436 = vmatmul.f32.gmra.mxu0 %v6287_v34  ;;  %v2545_v4 = vsub.f32 %v2481_v2, %v2513_v6  ;;  %v1883_v47 = vadd.f32 %v6391_v52, %v1882_v9  ;;  %v1997_v36 = vadd.f32 %v6495_v28, %v1996_v7  ;;  %3154 = vadd.xlane.f32.xlu0 %v6541_v13  ;;  %v2694_v23 = vor.u32 1.1754944e-38, %v2693_v14  ;;  %v2297_v14 = vpop.xlane.xlu2 %2296 }
 0x478   : > { %v2670_v49 = vmul.f32 %v4659_v54, %v2669_v20  ;;  %vm2692_vm2 = vcmp.eq.f32.partialorder %v2691_v19, 8.507059e+37 }
 0x479   : > { %v2577_v15 = vmax.f32 %v2545_v4, 0.0  ;;  %v1938_v34 = vmax.f32 %v1883_v47, 0.0  ;;  %v2086_v61 = vmax.f32 %v1997_v36, 0.0  ;;  %4484 = vmatmul.msk.f32.gmra.mxu1 %vm915_vm0, %v4786_v45  ;;  %v4788_v36 = vld [vmem:[%s5303_s28 + $0x30] sm:$0xff] }
 0x47a   : > { %v2671_v35 = vadd.f32 %v4659_v54, %v2670_v49 }
 0x47b   : > { %v4661_v62 = vpop.eup %4660  ;;  %v6551_v39 = vadd.f32 1.0, %v2577_v15  ;;  %2046 = vmatmul.f32.gmra.mxu2 %v1938_v34  ;;  %2160 = vmatmul.f32.gmra.mxu3 %v2086_v61 }
 0x47c   : > { %v2392_v56 = vpop.f32.mrf.mxu0  ;;  %v2675_v3 = vsel %vm2674_vm12, %v4659_v54, %v2671_v35  ;;  %v2683_v59 = vmul.f32 %v4661_v62, %v6533_v43  ;;  %vm2688_vm14 = vweird.f32 %v4661_v62  ;;  %v2484_v35 = vadd.f32 %v6485_v8, %v2295_v21 }
 0x47d   : > { %4662 = vrcp.f32 %v6551_v39  ;;  %v2514_v5 = vmul.f32 2.0, %v2392_v56  ;;  %v2680_v57 = vsel %vm2677_vm13, %v2679_v48, %v2675_v3  ;;  %vm2689_vm1 = vmor %vm2687_vm15, %vm2688_vm14  ;;  %v2708_v9 = vand.u32 2147483648, %v6551_v39 }
 0x47e   : > { %v1885_v12 = vpop.f32.mrf.mxu1  ;;  %v1999_v1 = vpop.f32.mrf.mxu2  ;;  %v6559_v16 = vsel %vm3119_vm4, %v2680_v57, 0.0  ;;  %v2684_v24 = vsub.f32 1.0, %v2683_v59  ;;  %v2706_v20 = vand.u32 2147483647, %v6551_v39  ;;  %vm2702_vm5 = vweird.f32 %v6551_v39 }
 0x47f   : > { %2439 = vmatmul.f32.gmra.mxu0 %v6299_v58  ;;  %v2546_v17 = vsub.f32 %v2482_v22, %v2514_v5  ;;  %v1886_v11 = vadd.f32 %v6391_v52, %v1885_v12  ;;  %v2000_v0 = vadd.f32 %v6495_v28, %v1999_v1  ;;  %3156 = vadd.xlane.f32.xlu1 %v6559_v16  ;;  %v2709_v34 = vor.u32 1.1754944e-38, %v2708_v9 }
 0x480   : > { %v2685_v18 = vmul.f32 %v4661_v62, %v2684_v24  ;;  %vm2707_vm7 = vcmp.eq.f32.partialorder %v2706_v20, 8.507059e+37  ;;  %v2299_v20 = vpop.xlane.xlu0 %2298 }
 0x481   : > { %v2578_v51 = vmax.f32 %v2546_v17, 0.0  ;;  %v1939_v58 = vmax.f32 %v1886_v11, 0.0  ;;  %v2087_v38 = vmax.f32 %v2000_v0, 0.0  ;;  %4485 = vmatmul.msk.f32.gmra.mxu1 %vm915_vm0, %v4787_v41  ;;  %v4789_v0 = vld [vmem:[%s5303_s28 + $0x38] sm:$0xff] }
 0x482   : > { %v2686_v27 = vadd.f32 %v4661_v62, %v2685_v18 }
 0x483   : > { %v4663_v30 = vpop.eup %4662  ;;  %v6569_v25 = vadd.f32 1.0, %v2578_v51  ;;  %2049 = vmatmul.f32.gmra.mxu2 %v1939_v58  ;;  %2163 = vmatmul.f32.gmra.mxu3 %v2087_v38 }
 0x484   : > { %v2395_v26 = vpop.f32.mrf.mxu0  ;;  %v2690_v33 = vsel %vm2689_vm1, %v4661_v62, %v2686_v27  ;;  %v2698_v29 = vmul.f32 %v4663_v30, %v6551_v39  ;;  %vm2703_vm3 = vweird.f32 %v4663_v30  ;;  %v2485_v27 = vadd.f32 %v6485_v8, %v2297_v14 }
 0x485   : > { %4664 = vrcp.f32 %v6569_v25  ;;  %v2515_v54 = vmul.f32 2.0, %v2395_v26  ;;  %v2695_v32 = vsel %vm2692_vm2, %v2694_v23, %v2690_v33  ;;  %vm2704_vm6 = vmor %vm2702_vm5, %vm2703_vm3  ;;  %v2723_v12 = vand.u32 2147483648, %v6569_v25  ;;  %v4790_v33 = vld [vmem:[%s6005_s6 + $0xc0] sm:$0xff] }
 0x486   : > { %v1888_v37 = vpop.f32.mrf.mxu1  ;;  %v2002_v43 = vpop.f32.mrf.mxu2  ;;  %v6577_v50 = vsel %vm3119_vm4, %v2695_v32, 0.0  ;;  %v2699_v46 = vsub.f32 1.0, %v2698_v29  ;;  %v2721_v24 = vand.u32 2147483647, %v6569_v25  ;;  %vm2717_vm9 = vweird.f32 %v6569_v25 }
 0x487   : > { %2442 = vmatmul.f32.gmra.mxu0 %v6311_v60  ;;  %v2547_v2 = vsub.f32 %v2483_v42, %v2515_v54  ;;  %v1889_v6 = vadd.f32 %v6391_v52, %v1888_v37  ;;  %v2003_v10 = vadd.f32 %v6495_v28, %v2002_v43  ;;  %3158 = vadd.xlane.f32.xlu2 %v6577_v50  ;;  %v2724_v58 = vor.u32 1.1754944e-38, %v2723_v12 }
 0x488   : > { %v2700_v7 = vmul.f32 %v4663_v30, %v2699_v46  ;;  %vm2722_vm11 = vcmp.eq.f32.partialorder %v2721_v24, 8.507059e+37 }
 0x489   : > { %v2579_v4 = vmax.f32 %v2547_v2, 0.0  ;;  %v1940_v60 = vmax.f32 %v1889_v6, 0.0  ;;  %v2088_v47 = vmax.f32 %v2003_v10, 0.0  ;;  %4486 = vmatmul.msk.f32.gmra.mxu1 %vm915_vm0, %v4788_v36 }
 0x48a   : > { %v2701_v49 = vadd.f32 %v4663_v30, %v2700_v7  ;;  %v4791_v7 = vld [vmem:[%s5303_s28 + $0x40] sm:$0xff] }
 0x48b   : > { %v4665_v53 = vpop.eup %4664  ;;  %v6587_v15 = vadd.f32 1.0, %v2579_v4  ;;  %2052 = vmatmul.f32.gmra.mxu2 %v1940_v60  ;;  %2166 = vmatmul.f32.gmra.mxu3 %v2088_v47 }
 0x48c   : > { %v2398_v61 = vpop.f32.mrf.mxu0  ;;  %v2705_v45 = vsel %vm2704_vm6, %v4663_v30, %v2701_v49  ;;  %v2713_v40 = vmul.f32 %v4665_v53, %v6569_v25  ;;  %vm2718_vm8 = vweird.f32 %v4665_v53 }
 0x48d   : > { %4666 = vrcp.f32 %v6587_v15  ;;  %v2516_v62 = vmul.f32 2.0, %v2398_v61  ;;  %v2710_v48 = vsel %vm2707_vm7, %v2709_v34, %v2705_v45  ;;  %vm2719_vm10 = vmor %vm2717_vm9, %vm2718_vm8  ;;  %v2738_v43 = vand.u32 2147483648, %v6587_v15 }
 0x48e   : > { %v1891_v56 = vpop.f32.mrf.mxu1  ;;  %v2005_v39 = vpop.f32.mrf.mxu2  ;;  %v6595_v3 = vsel %vm3119_vm4, %v2710_v48, 0.0  ;;  %v2714_v59 = vsub.f32 1.0, %v2713_v40  ;;  %v2736_v2 = vand.u32 2147483647, %v6587_v15  ;;  %vm2732_vm13 = vweird.f32 %v6587_v15 }
 0x48f   : > { %2445 = vmatmul.f32.gmra.mxu0 %v6329_v63  ;;  %v2548_v22 = vsub.f32 %v2484_v35, %v2516_v62  ;;  %v1892_v5 = vadd.f32 %v6391_v52, %v1891_v56  ;;  %v2006_v57 = vadd.f32 %v6495_v28, %v2005_v39  ;;  %3160 = vadd.xlane.f32.xlu0 %v6595_v3  ;;  %v2739_v36 = vor.u32 1.1754944e-38, %v2738_v43  ;;  %v4792_v35 = vld [vmem:[%s6005_s6 + $0xc8] sm:$0xff] }
 0x490   : > { %v2715_v1 = vmul.f32 %v4665_v53, %v2714_v59  ;;  %vm2737_vm15 = vcmp.eq.f32.partialorder %v2736_v2, 8.507059e+37  ;;  %v2486_v34 = vadd.f32 %v6485_v8, %v2299_v20 }
 0x491   : > { %v2580_v17 = vmax.f32 %v2548_v22, 0.0  ;;  %v1941_v63 = vmax.f32 %v1892_v5, 0.0  ;;  %v2089_v11 = vmax.f32 %v2006_v57, 0.0  ;;  %4487 = vmatmul.msk.f32.gmra.mxu1 %vm915_vm0, %v4789_v0 }
 0x492   : > { %v2716_v18 = vadd.f32 %v4665_v53, %v2715_v1 }
 0x493   : > { %v4667_v19 = vpop.eup %4666  ;;  %v6605_v51 = vadd.f32 1.0, %v2580_v17  ;;  %2055 = vmatmul.f32.gmra.mxu2 %v1941_v63  ;;  %2169 = vmatmul.f32.gmra.mxu3 %v2089_v11  ;;  %v4793_v17 = vld [vmem:[%s5303_s28 + $0x48] sm:$0xff]  ;;  %v2301_v63 = vpop.xlane.xlu1 %2300 }
 0x494   : > { %v2401_v38 = vpop.f32.mrf.mxu0  ;;  %v2720_v41 = vsel %vm2719_vm10, %v4665_v53, %v2716_v18  ;;  %v2728_v44 = vmul.f32 %v4667_v19, %v6587_v15  ;;  %vm2733_vm12 = vweird.f32 %v4667_v19 }
 0x495   : > { %4668 = vrcp.f32 %v6605_v51  ;;  %v2517_v30 = vmul.f32 2.0, %v2401_v38  ;;  %v2725_v23 = vsel %vm2722_vm11, %v2724_v58, %v2720_v41  ;;  %vm2734_vm14 = vmor %vm2732_vm13, %vm2733_vm12  ;;  %v2753_v22 = vand.u32 2147483648, %v6605_v51 }
 0x496   : > { %v1894_v25 = vpop.f32.mrf.mxu1  ;;  %v2008_v26 = vpop.f32.mrf.mxu2  ;;  %v6613_v29 = vsel %vm3119_vm4, %v2725_v23, 0.0  ;;  %v2729_v42 = vsub.f32 1.0, %v2728_v44  ;;  %v2751_v57 = vand.u32 2147483647, %v6605_v51  ;;  %vm2747_vm2 = vweird.f32 %v6605_v51  ;;  %v4794_v23 = vld [vmem:[%s6005_s6 + $0xd0] sm:$0xff] }
 0x497   : > { %2448 = vmatmul.f32.gmra.mxu0 %v4790_v33  ;;  %v2549_v54 = vsub.f32 %v2485_v27, %v2517_v30  ;;  %v1895_v32 = vadd.f32 %v6391_v52, %v1894_v25  ;;  %v2009_v37 = vadd.f32 %v6495_v28, %v2008_v26  ;;  %3162 = vadd.xlane.f32.xlu1 %v6613_v29  ;;  %v2754_v18 = vor.u32 1.1754944e-38, %v2753_v22 }
 0x498   : > { %v2730_v46 = vmul.f32 %v4667_v19, %v2729_v42  ;;  %vm2752_vm5 = vcmp.eq.f32.partialorder %v2751_v57, 8.507059e+37  ;;  %v2487_v41 = vadd.f32 %v6485_v8, %v2301_v63 }
 0x499   : > { %v2581_v6 = vmax.f32 %v2549_v54, 0.0  ;;  %v1942_v10 = vmax.f32 %v1895_v32, 0.0  ;;  %v2090_v9 = vmax.f32 %v2009_v37, 0.0  ;;  %4488 = vmatmul.msk.f32.gmra.mxu1 %vm915_vm0, %v4791_v7 }
 0x49a   : > { %v2731_v4 = vadd.f32 %v4667_v19, %v2730_v46 }
 0x49b   : > { %v4669_v60 = vpop.eup %4668  ;;  %v6623_v47 = vadd.f32 1.0, %v2581_v6  ;;  %2058 = vmatmul.f32.gmra.mxu2 %v1942_v10  ;;  %2172 = vmatmul.f32.gmra.mxu3 %v2090_v9  ;;  %v4795_v10 = vld [vmem:[%s5303_s28 + $0x50] sm:$0xff]  ;;  %v2303_v9 = vpop.xlane.xlu2 %2302 }
 0x49c   : > { %v2404_v21 = vpop.f32.mrf.mxu0  ;;  %v2735_v49 = vsel %vm2734_vm14, %v4667_v19, %v2731_v4  ;;  %v2743_v53 = vmul.f32 %v4669_v60, %v6605_v51  ;;  %vm2748_vm1 = vweird.f32 %v4669_v60 }
 0x49d   : > { %4670 = vrcp.f32 %v6623_v47  ;;  %v2518_v61 = vmul.f32 2.0, %v2404_v21  ;;  %v2740_v45 = vsel %vm2737_vm15, %v2739_v36, %v2735_v49  ;;  %vm2749_vm3 = vmor %vm2747_vm2, %vm2748_vm1  ;;  %v2768_v32 = vand.u32 2147483648, %v6623_v47 }
 0x49e   : > { %v1897_v15 = vpop.f32.mrf.mxu1  ;;  %v2011_v40 = vpop.f32.mrf.mxu2  ;;  %v6631_v62 = vsel %vm3119_vm4, %v2740_v45, 0.0  ;;  %v2744_v48 = vsub.f32 1.0, %v2743_v53  ;;  %v2766_v43 = vand.u32 2147483647, %v6623_v47  ;;  %vm2762_vm7 = vweird.f32 %v6623_v47  ;;  %v4796_v45 = vld [vmem:[%s6005_s6 + $0xd8] sm:$0xff] }
 0x49f   : > { %2451 = vmatmul.f32.gmra.mxu0 %v4792_v35  ;;  %v2550_v56 = vsub.f32 %v2486_v34, %v2518_v61  ;;  %v1898_v39 = vadd.f32 %v6391_v52, %v1897_v15  ;;  %v2012_v59 = vadd.f32 %v6495_v28, %v2011_v40  ;;  %3164 = vadd.xlane.f32.xlu2 %v6631_v62  ;;  %v2769_v4 = vor.u32 1.1754944e-38, %v2768_v32 }
 0x4a0   : > { %v2745_v5 = vmul.f32 %v4669_v60, %v2744_v48  ;;  %vm2767_vm9 = vcmp.eq.f32.partialorder %v2766_v43, 8.507059e+37  ;;  %v2488_v49 = vadd.f32 %v6485_v8, %v2303_v9  ;;  %v6672_v48 = vld [vmem:[%s8234_s12] ss:$0 sm:$0xff] }
 0x4a1   : > { %v2582_v12 = vmax.f32 %v2550_v56, 0.0  ;;  %v1943_v1 = vmax.f32 %v1898_v39, 0.0  ;;  %v2091_v24 = vmax.f32 %v2012_v59, 0.0  ;;  %4489 = vmatmul.msk.f32.gmra.mxu1 %vm915_vm0, %v4793_v17  ;;  %v2305_v17 = vpop.xlane.xlu0 %2304 }
 0x4a2   : > { %v2746_v11 = vadd.f32 %v4669_v60, %v2745_v5 }
 0x4a3   : > { %v4671_v0 = vpop.eup %4670  ;;  %v6641_v14 = vadd.f32 1.0, %v2582_v12  ;;  %2061 = vmatmul.f32.gmra.mxu2 %v1943_v1  ;;  %2175 = vmatmul.f32.gmra.mxu3 %v2091_v24  ;;  %v4798_v24 = vld [vmem:[%s5303_s28 + $0x58] sm:$0xff]  ;;  %v6681_v63 = vpop.xlane.xlu2 %2308 }
 0x4a4   : > { %v2407_v19 = vpop.f32.mrf.mxu0  ;;  %v2750_v58 = vsel %vm2749_vm3, %v4669_v60, %v2746_v11  ;;  %v2758_v38 = vmul.f32 %v4671_v0, %v6623_v47  ;;  %vm2763_vm6 = vweird.f32 %v4671_v0 }
 0x4a5   : > { %4672 = vrcp.f32 %v6641_v14  ;;  %v2519_v44 = vmul.f32 2.0, %v2407_v19  ;;  %v2755_v27 = vsel %vm2752_vm5, %v2754_v18, %v2750_v58  ;;  %vm2764_vm8 = vmor %vm2762_vm7, %vm2763_vm6  ;;  %v2783_v59 = vand.u32 2147483648, %v6641_v14 }
 0x4a6   : > { %v1900_v51 = vpop.f32.mrf.mxu1  ;;  %v2014_v30 = vpop.f32.mrf.mxu2  ;;  %v6649_v25 = vsel %vm3119_vm4, %v2755_v27, 0.0  ;;  %v2759_v26 = vsub.f32 1.0, %v2758_v38  ;;  %v2781_v5 = vand.u32 2147483647, %v6641_v14  ;;  %vm2777_vm11 = vweird.f32 %v6641_v14 }
 0x4a7   : > { %2454 = vmatmul.f32.gmra.mxu0 %v4794_v23  ;;  %v2551_v33 = vsub.f32 %v2487_v41, %v2519_v44  ;;  %v1901_v42 = vadd.f32 %v6391_v52, %v1900_v51  ;;  %v2015_v54 = vadd.f32 %v6495_v28, %v2014_v30  ;;  %3166 = vadd.xlane.f32.xlu0 %v6649_v25  ;;  %v2784_v19 = vor.u32 1.1754944e-38, %v2783_v59  ;;  %v4799_v23 = vld [vmem:[%s6005_s6 + $0xe0] sm:$0xff] }
 0x4a8   : > { %v2760_v37 = vmul.f32 %v4671_v0, %v2759_v26  ;;  %vm2782_vm13 = vcmp.eq.f32.partialorder %v2781_v5, 8.507059e+37  ;;  %v2489_v44 = vadd.f32 %v6485_v8, %v2305_v17 }
 0x4a9   : > { %v2583_v46 = vmax.f32 %v2551_v33, 0.0  ;;  %v1944_v2 = vmax.f32 %v1901_v42, 0.0  ;;  %v2092_v6 = vmax.f32 %v2015_v54, 0.0  ;;  %4490 = vmatmul.msk.f32.gmra.mxu1 %vm915_vm0, %v4795_v10 }
 0x4aa   : > { %v2761_v7 = vadd.f32 %v4671_v0, %v2760_v37 }
 0x4ab   : > { %v4673_v52 = vpop.eup %4672  ;;  %v6659_v20 = vadd.f32 1.0, %v2583_v46  ;;  %2064 = vmatmul.f32.gmra.mxu2 %v1944_v2  ;;  %2178 = vmatmul.f32.gmra.mxu3 %v2092_v6  ;;  %v2307_v2 = vpop.xlane.xlu1 %2306 }
 0x4ac   : > { %v2410_v60 = vpop.f32.mrf.mxu0  ;;  %v2765_v36 = vsel %vm2764_vm8, %v4671_v0, %v2761_v7  ;;  %v2773_v21 = vmul.f32 %v4673_v52, %v6641_v14  ;;  %vm2778_vm10 = vweird.f32 %v4673_v52  ;;  %v4800_v7 = vld [vmem:[%s5303_s28 + $0x60] sm:$0xff] }
 0x4ad   : > { %4674 = vrcp.f32 %v6659_v20  ;;  %v2520_v53 = vmul.f32 2.0, %v2410_v60  ;;  %v2770_v34 = vsel %vm2767_vm9, %v2769_v4, %v2765_v36  ;;  %vm2779_vm12 = vmor %vm2777_vm11, %vm2778_vm10  ;;  %v2798_v37 = vand.u32 2147483648, %v6659_v20  ;;  %v6704_v4 = vpop.xlane.xlu2 %2314 }
 0x4ae   : > { %v1903_v47 = vpop.f32.mrf.mxu1  ;;  %v2017_v61 = vpop.f32.mrf.mxu2  ;;  %v6667_v15 = vsel %vm3119_vm4, %v2770_v34, 0.0  ;;  %v2774_v40 = vsub.f32 1.0, %v2773_v21  ;;  %v2796_v46 = vand.u32 2147483647, %v6659_v20  ;;  %vm2792_vm15 = vweird.f32 %v6659_v20 }
 0x4af   : > { %2457 = vmatmul.f32.gmra.mxu0 %v4796_v45  ;;  %v2552_v35 = vsub.f32 %v2488_v49, %v2520_v53  ;;  %v1904_v56 = vadd.f32 %v6672_v48, %v1903_v47  ;;  %v2018_v39 = vadd.f32 %v6495_v28, %v2017_v61  ;;  %3168 = vadd.xlane.f32.xlu1 %v6667_v15  ;;  %v2799_v49 = vor.u32 1.1754944e-38, %v2798_v37 }
 0x4b0   : > { %v2775_v22 = vmul.f32 %v4673_v52, %v2774_v40  ;;  %vm2797_vm2 = vcmp.eq.f32.partialorder %v2796_v46, 8.507059e+37  ;;  %v2490_v61 = vadd.f32 %v6485_v8, %v2307_v2 }
 0x4b1   : > { %v2584_v57 = vmax.f32 %v2552_v35, 0.0  ;;  %v1945_v12 = vmax.f32 %v1904_v56, 0.0  ;;  %v2093_v1 = vmax.f32 %v2018_v39, 0.0  ;;  %4491 = vmatmul.msk.f32.gmra.mxu1 %vm915_vm0, %v4798_v24  ;;  %v4801_v56 = vld [vmem:[%s6005_s6 + $0xe8] sm:$0xff] }
 0x4b2   : > { %v2776_v11 = vadd.f32 %v4673_v52, %v2775_v22 }
 0x4b3   : > { %v4675_v0 = vpop.eup %4674  ;;  %v6684_v18 = vadd.f32 1.0, %v2584_v57  ;;  %2067 = vmatmul.f32.gmra.mxu2 %v1945_v12  ;;  %2181 = vmatmul.f32.gmra.mxu3 %v2093_v1  ;;  %v6723_v17 = vpop.xlane.xlu1 %2312 }
 0x4b4   : > { %v2413_v58 = vpop.f32.mrf.mxu0  ;;  %v2780_v38 = vsel %vm2779_vm12, %v4673_v52, %v2776_v11  ;;  %v2788_v41 = vmul.f32 %v4675_v0, %v6659_v20  ;;  %vm2793_vm14 = vweird.f32 %v4675_v0  ;;  %v6702_v52 = vpop.xlane.xlu0 %2310 }
 0x4b5   : > { %4676 = vrcp.f32 %v6684_v18  ;;  %v2521_v27 = vmul.f32 2.0, %v2413_v58  ;;  %v2785_v14 = vsel %vm2782_vm13, %v2784_v19, %v2780_v38  ;;  %vm2794_vm1 = vmor %vm2792_vm15, %vm2793_vm14  ;;  %v2813_v12 = vand.u32 2147483648, %v6684_v18  ;;  %v4802_v58 = vld [vmem:[%s5303_s28 + $0x68] sm:$0xff] }
 0x4b6   : > { %v1906_v51 = vpop.f32.mrf.mxu1  ;;  %v2020_v30 = vpop.f32.mrf.mxu2  ;;  %v6693_v26 = vsel %vm3119_vm4, %v2785_v14, 0.0  ;;  %v2789_v33 = vsub.f32 1.0, %v2788_v41  ;;  %v2811_v24 = vand.u32 2147483647, %v6684_v18  ;;  %vm2807_vm5 = vweird.f32 %v6684_v18 }
 0x4b7   : > { %2460 = vmatmul.f32.gmra.mxu0 %v4799_v23  ;;  %v2553_v42 = vsub.f32 %v2489_v44, %v2521_v27  ;;  %v1907_v54 = vadd.f32 %v6672_v48, %v1906_v51  ;;  %v2021_v32 = vadd.f32 %v6495_v28, %v2020_v30  ;;  %3170 = vadd.xlane.f32.xlu2 %v6693_v26  ;;  %v6729_v41 = vpop.xlane.xlu2 %2320  ;;  %v2814_v51 = vor.u32 1.1754944e-38, %v2813_v12 }
 0x4b8   : > { %v2790_v43 = vmul.f32 %v4675_v0, %v2789_v33  ;;  %vm2812_vm7 = vcmp.eq.f32.partialorder %v2811_v24, 8.507059e+37 }
 0x4b9   : > { %v2585_v6 = vmax.f32 %v2553_v42, 0.0  ;;  %v1946_v10 = vmax.f32 %v1907_v54, 0.0  ;;  %v2094_v9 = vmax.f32 %v2021_v32, 0.0  ;;  %4492 = vmatmul.msk.f32.gmra.mxu1 %vm915_vm0, %v4800_v7  ;;  %v2491_v42 = vadd.f32 %v6485_v8, %v6681_v63 }
 0x4ba   : > { %v2791_v60 = vadd.f32 %v4675_v0, %v2790_v43  ;;  %v4803_v43 = vld [vmem:[%s6005_s6 + $0xf0] sm:$0xff] }
 0x4bb   : > { %v4677_v36 = vpop.eup %4676  ;;  %v6707_v21 = vadd.f32 1.0, %v2585_v6  ;;  %2070 = vmatmul.f32.gmra.mxu2 %v1946_v10  ;;  %2184 = vmatmul.f32.gmra.mxu3 %v2094_v9 }
 0x4bc   : > { %v2416_v53 = vpop.f32.mrf.mxu0  ;;  %v2795_v34 = vsel %vm2794_vm1, %v4675_v0, %v2791_v60  ;;  %v2803_v47 = vmul.f32 %v4677_v36, %v6684_v18  ;;  %vm2808_vm3 = vweird.f32 %v4677_v36  ;;  %v6727_v38 = vpop.xlane.xlu0 %2316 }
 0x4bd   : > { %4678 = vrcp.f32 %v6707_v21  ;;  %v2522_v45 = vmul.f32 2.0, %v2416_v53  ;;  %v2800_v20 = vsel %vm2797_vm2, %v2799_v49, %v2795_v34  ;;  %vm2809_vm6 = vmor %vm2807_vm5, %vm2808_vm3  ;;  %v2828_v63 = vand.u32 2147483648, %v6707_v21 }
 0x4be   : > { %v1909_v40 = vpop.f32.mrf.mxu1  ;;  %v2023_v35 = vpop.f32.mrf.mxu2  ;;  %v6716_v39 = vsel %vm3119_vm4, %v2800_v20, 0.0  ;;  %v2804_v59 = vsub.f32 1.0, %v2803_v47  ;;  %v2826_v60 = vand.u32 2147483647, %v6707_v21  ;;  %v4804_v47 = vld [vmem:[%s5303_s28 + $0x70] sm:$0xff]  ;;  %vm2822_vm9 = vweird.f32 %v6707_v21 }
 0x4bf   : > { %2463 = vmatmul.f32.gmra.mxu0 %v4801_v56  ;;  %v2554_v22 = vsub.f32 %v2490_v61, %v2522_v45  ;;  %v1910_v5 = vadd.f32 %v6672_v48, %v1909_v40  ;;  %v2024_v57 = vadd.f32 %v6495_v28, %v2023_v35  ;;  %3172 = vadd.xlane.f32.xlu0 %v6716_v39  ;;  %v6755_v45 = vpop.xlane.xlu2 %2326  ;;  %v2829_v56 = vor.u32 1.1754944e-38, %v2828_v63 }
 0x4c0   : > { %v2805_v1 = vmul.f32 %v4677_v36, %v2804_v59  ;;  %vm2827_vm11 = vcmp.eq.f32.partialorder %v2826_v60, 8.507059e+37 }
 0x4c1   : > { %v2586_v11 = vmax.f32 %v2554_v22, 0.0  ;;  %v1947_v0 = vmax.f32 %v1910_v5, 0.0  ;;  %v2095_v19 = vmax.f32 %v2024_v57, 0.0  ;;  %4493 = vmatmul.msk.f32.gmra.mxu1 %vm915_vm0, %v4802_v58  ;;  %v2492_v57 = vadd.f32 %v6485_v8, %v6702_v52 }
 0x4c2   : > { %v2806_v44 = vadd.f32 %v4677_v36, %v2805_v1 }
 0x4c3   : > { %v4679_v27 = vpop.eup %4678  ;;  %v6732_v14 = vadd.f32 1.0, %v2586_v11  ;;  %2073 = vmatmul.f32.gmra.mxu2 %v1947_v0  ;;  %2187 = vmatmul.f32.gmra.mxu3 %v2095_v19  ;;  %v4805_v11 = vld [vmem:[%s6005_s6 + $0xf8] sm:$0xff] }
 0x4c4   : > { %v2419_v30 = vpop.f32.mrf.mxu0  ;;  %v2810_v23 = vsel %vm2809_vm6, %v4677_v36, %v2806_v44  ;;  %v2818_v33 = vmul.f32 %v4679_v27, %v6707_v21  ;;  %vm2823_vm8 = vweird.f32 %v4679_v27  ;;  %v6749_v36 = vpop.xlane.xlu1 %2318 }
 0x4c5   : > { %4680 = vrcp.f32 %v6732_v14  ;;  %v2523_v18 = vmul.f32 2.0, %v2419_v30  ;;  %v2815_v54 = vsel %vm2812_vm7, %v2814_v51, %v2810_v23  ;;  %v6753_v61 = vpop.xlane.xlu0 %2322  ;;  %vm2824_vm10 = vmor %vm2822_vm9, %vm2823_vm8  ;;  %v2843_v8 = vand.u32 2147483648, %v6732_v14 }
 0x4c6   : > { %v1912_v32 = vpop.f32.mrf.mxu1  ;;  %v2026_v37 = vpop.f32.mrf.mxu2  ;;  %v6742_v46 = vsel %vm3119_vm4, %v2815_v54, 0.0  ;;  %v2819_v2 = vsub.f32 1.0, %v2818_v33  ;;  %v2841_v51 = vand.u32 2147483647, %v6732_v14  ;;  %vm2837_vm13 = vweird.f32 %v6732_v14 }
 0x4c7   : > { %2466 = vmatmul.f32.gmra.mxu0 %v4803_v43  ;;  %v2555_v6 = vsub.f32 %v2491_v42, %v2523_v18  ;;  %v1913_v10 = vadd.f32 %v6672_v48, %v1912_v32  ;;  %v2027_v9 = vadd.f32 %v6495_v28, %v2026_v37  ;;  %3174 = vadd.xlane.f32.xlu1 %v6742_v46  ;;  %v4806_v18 = vld [vmem:[%s5303_s28 + $0x78] sm:$0xff]  ;;  %v2844_v43 = vor.u32 1.1754944e-38, %v2843_v8 }
 0x4c8   : > { %v2820_v7 = vmul.f32 %v4679_v27, %v2819_v2  ;;  %vm2842_vm15 = vcmp.eq.f32.partialorder %v2841_v51, 8.507059e+37 }
 0x4c9   : > { %v2587_v49 = vmax.f32 %v2555_v6, 0.0  ;;  %v1948_v53 = vmax.f32 %v1913_v10, 0.0  ;;  %v2096_v34 = vmax.f32 %v2027_v9, 0.0  ;;  %4494 = vmatmul.msk.f32.gmra.mxu1 %vm915_vm0, %v4804_v47  ;;  %v6791_v9 = vld [vmem:[%s8235_s18] ss:$0 sm:$0xff] }
 0x4ca   : > { %v2821_v20 = vadd.f32 %v4679_v27, %v2820_v7  ;;  %v6803_v47 = vld [vmem:[%s8236_s14] ss:$0 sm:$0xff]  ;;  %v2494_v8 = vadd.f32 %v6791_v9, %v6704_v4 }
 0x4cb   : > { %v4681_v40 = vpop.eup %4680  ;;  %v6758_v35 = vadd.f32 1.0, %v2587_v49  ;;  %2076 = vmatmul.f32.gmra.mxu2 %v1948_v53  ;;  %2190 = vmatmul.f32.gmra.mxu3 %v2096_v34 }
 0x4cc   : > { %v2422_v59 = vpop.f32.mrf.mxu0  ;;  %v2825_v22 = vsel %vm2824_vm10, %v4679_v27, %v2821_v20  ;;  %v2833_v5 = vmul.f32 %v4681_v40, %v6732_v14  ;;  %vm2838_vm12 = vweird.f32 %v4681_v40  ;;  %v6775_v30 = vpop.xlane.xlu1 %2324  ;;  %v2493_v14 = vadd.f32 %v6791_v9, %v6723_v17 }
 0x4cd   : > { %4682 = vrcp.f32 %v6758_v35  ;;  %v2524_v21 = vmul.f32 2.0, %v2422_v59  ;;  %v2830_v12 = vsel %vm2827_vm11, %v2829_v56, %v2825_v22  ;;  %v6779_v54 = vpop.xlane.xlu0 %2328  ;;  %vm2839_vm14 = vmor %vm2837_vm13, %vm2838_vm12  ;;  %v2858_v17 = vand.u32 2147483648, %v6758_v35 }
 0x4ce   : > { %v1915_v1 = vpop.f32.mrf.mxu1  ;;  %v2029_v24 = vpop.f32.mrf.mxu2  ;;  %v6768_v0 = vsel %vm3119_vm4, %v2830_v12, 0.0  ;;  %v2834_v19 = vsub.f32 1.0, %v2833_v5  ;;  %v2856_v56 = vand.u32 2147483647, %v6758_v35  ;;  %vm2852_vm2 = vweird.f32 %v6758_v35 }
 0x4cf   : > { %2469 = vmatmul.f32.gmra.mxu0 %v4805_v11  ;;  %v2556_v58 = vsub.f32 %v2492_v57, %v2524_v21  ;;  %v1916_v44 = vadd.f32 %v6672_v48, %v1915_v1  ;;  %v2030_v27 = vadd.f32 %v6495_v28, %v2029_v24  ;;  %3176 = vadd.xlane.f32.xlu2 %v6768_v0  ;;  %v6781_v48 = vpop.xlane.xlu2 %2332  ;;  %v4809_v57 = vld [vmem:[%s5303_s28 + $0x80] sm:$0xff] }
 0x4d0   : > { %v2835_v52 = vmul.f32 %v4681_v40, %v2834_v19  ;;  %v2859_v19 = vor.u32 1.1754944e-38, %v2858_v17  ;;  %vm2857_vm5 = vcmp.eq.f32.partialorder %v2856_v56, 8.507059e+37 }
 0x4d1   : > { %v2588_v23 = vmax.f32 %v2556_v58, 0.0  ;;  %v1949_v33 = vmax.f32 %v1916_v44, 0.0  ;;  %v2097_v42 = vmax.f32 %v2030_v27, 0.0  ;;  %4495 = vmatmul.msk.f32.gmra.mxu1 %vm915_vm0, %v4806_v18  ;;  %v6832_v18 = vadd.f32 %v6791_v9, %v6749_v36 }
 0x4d2   : > { %v2836_v28 = vadd.f32 %v4681_v40, %v2835_v52  ;;  %v6844_v36 = vadd.f32 %v6791_v9, %v6753_v61  ;;  %v6862_v61 = vadd.f32 %v6791_v9, %v6779_v54 }
 0x4d3   : > { %v4683_v32 = vpop.eup %4682  ;;  %v6784_v37 = vadd.f32 1.0, %v2588_v23  ;;  %2079 = vmatmul.f32.gmra.mxu2 %v1949_v33  ;;  %2193 = vmatmul.f32.gmra.mxu3 %v2097_v42 }
 0x4d4   : > { %v2425_v2 = vpop.f32.mrf.mxu0  ;;  %v2840_v6 = vsel %vm2839_vm14, %v4681_v40, %v2836_v28  ;;  %v2848_v10 = vmul.f32 %v4683_v32, %v6758_v35  ;;  %vm2853_vm1 = vweird.f32 %v4683_v32  ;;  %v2331_v59 = vpop.xlane.xlu1 %2330  ;;  %v6824_v35 = vadd.f32 %v6791_v9, %v6727_v38 }
 0x4d5   : > { %4684 = vrcp.f32 %v6784_v37  ;;  %v2525_v63 = vmul.f32 2.0, %v2425_v2  ;;  %v2845_v7 = vsel %vm2842_vm15, %v2844_v43, %v2840_v6  ;;  %v6811_v21 = vpop.xlane.xlu0 %2334  ;;  %vm2854_vm3 = vmor %vm2852_vm2, %vm2853_vm1  ;;  %v2873_v38 = vand.u32 2147483648, %v6784_v37 }
 0x4d6   : > { %v2032_v60 = vpop.f32.mrf.mxu2  ;;  %v6798_v49 = vsel %vm3119_vm4, %v2845_v7, 0.0  ;;  %v2849_v53 = vsub.f32 1.0, %v2848_v10  ;;  %v2871_v2 = vand.u32 2147483647, %v6784_v37  ;;  %v3719_v6 = vpop.f32.mrf.mxu1  ;;  %v6848_v10 = vadd.f32 %v6791_v9, %v6775_v30 }
 0x4d7   : > { %v2557_v34 = vsub.f32 %v2493_v14, %v2525_v63  ;;  %v2033_v20 = vadd.f32 %v6803_v47, %v2032_v60  ;;  %3178 = vadd.xlane.f32.xlu0 %v6798_v49  ;;  %v6813_v12 = vpop.xlane.xlu2 %2338  ;;  %4007 = vst [vmem:[%s6851_s5] sm:$0xff] %v3719_v6  ;;  %v6858_v60 = vadd.f32 %v6791_v9, %v6755_v45  ;;  %vm2867_vm7 = vweird.f32 %v6784_v37  ;;  %v6880_v45 = vld [vmem:[%s8155_s16] ss:$0 sm:$0xff] }
 0x4d8   : > { %v2850_v40 = vmul.f32 %v4683_v32, %v2849_v53  ;;  %v6872_v17 = vadd.f32 %v6791_v9, %v2331_v59  ;;  %v2874_v54 = vor.u32 1.1754944e-38, %v2873_v38  ;;  %vm2872_vm9 = vcmp.eq.f32.partialorder %v2871_v2, 8.507059e+37 }
 0x4d9   : > { %v2589_v22 = vmax.f32 %v2557_v34, 0.0  ;;  %v2098_v5 = vmax.f32 %v2033_v20, 0.0  ;;  %4496 = vmatmul.msk.f32.gmra.mxu1 %vm915_vm0, %v4809_v57 }
 0x4da   : > { %v2851_v1 = vadd.f32 %v4683_v32, %v2850_v40 }
 0x4db   : > { %v4685_v24 = vpop.eup %4684  ;;  %v6816_v11 = vadd.f32 1.0, %v2589_v22  ;;  %2196 = vmatmul.f32.gmra.mxu3 %v2098_v5 }
 0x4dc   : > { %v2428_v58 = vpop.f32.mrf.mxu0  ;;  %v2855_v44 = vsel %vm2854_vm3, %v4683_v32, %v2851_v1  ;;  %v2863_v27 = vmul.f32 %v4685_v24, %v6784_v37  ;;  %v6839_v32 = vadd.f32 %v6791_v9, %v6729_v41  ;;  %vm2868_vm6 = vweird.f32 %v4685_v24  ;;  %v2337_v14 = vpop.xlane.xlu1 %2336  ;;  %v4810_v41 = vld [vmem:[%s5303_s28 + $0x88] sm:$0xff] }
 0x4dd   : > { %4686 = vrcp.f32 %v6816_v11  ;;  %v2526_v52 = vmul.f32 2.0, %v2428_v58  ;;  %v2860_v51 = vsel %vm2857_vm5, %v2859_v19, %v2855_v44  ;;  %v6864_v30 = vpop.xlane.xlu0 %2340  ;;  %vm2869_vm8 = vmor %vm2867_vm7, %vm2868_vm6  ;;  %v6885_v37 = vadd.f32 %v6791_v9, %v6781_v48 }
 0x4de   : > { %v2035_v23 = vpop.f32.mrf.mxu2  ;;  %v6828_v33 = vsel %vm3119_vm4, %v2860_v51, 0.0  ;;  %v2864_v42 = vsub.f32 1.0, %v2863_v27  ;;  %v2886_v1 = vand.u32 2147483647, %v6816_v11  ;;  %v2888_v27 = vand.u32 2147483648, %v6816_v11 }
 0x4df   : > { %v2558_v4 = vsub.f32 %v2494_v8, %v2526_v52  ;;  %v2036_v28 = vadd.f32 %v6803_v47, %v2035_v23  ;;  %3180 = vadd.xlane.f32.xlu1 %v6828_v33  ;;  %vm2882_vm11 = vweird.f32 %v6816_v11 }
 0x4e0   : > { %v2865_v43 = vmul.f32 %v4685_v24, %v2864_v42  ;;  %v6911_v42 = vadd.f32 %v6791_v9, %v6811_v21  ;;  %vm6923_vm12 = vcmp.eq.f32.partialorder %v2886_v1, 8.507059e+37  ;;  %v4811_v21 = vld [vmem:[%s5303_s28 + $0x90] sm:$0xff] }
 0x4e1   : > { %v2590_v63 = vmax.f32 %v2558_v4, 0.0  ;;  %v2099_v7 = vmax.f32 %v2036_v28, 0.0  ;;  %4497 = vmatmul.msk.f32.gmra.mxu1 %vm915_vm0, %v4810_v41  ;;  %v6914_v4 = vadd.f32 %v6791_v9, %v2337_v14  ;;  %v2889_v41 = vor.u32 1.1754944e-38, %v2888_v27 }
 0x4e2   : > { %v6866_v53 = vpop.xlane.xlu2 %3152  ;;  %v2866_v34 = vadd.f32 %v4685_v24, %v2865_v43 }
 0x4e3   : > { %v6869_v20 = vpop.eup %4686  ;;  %v6874_v40 = vadd.f32 1.0, %v2590_v63  ;;  %4688 = vrcp.f32 %v6866_v53  ;;  %2199 = vmatmul.f32.gmra.mxu3 %v2099_v7  ;;  %v3225_v19 = vand.u32 2147483647, %v6866_v53  ;;  %v3227_v8 = vand.u32 2147483648, %v6866_v53 }
 0x4e4   : > { %v2431_v56 = vpop.f32.mrf.mxu0  ;;  %v2870_v59 = vsel %vm2869_vm8, %v4685_v24, %v2866_v34  ;;  %v2878_v22 = vmul.f32 %v6869_v20, %v6816_v11  ;;  %vm2883_vm10 = vweird.f32 %v6869_v20  ;;  %v6929_v6 = vpop.xlane.xlu1 %2342  ;;  %vm3221_vm13 = vweird.f32 %v6866_v53 }
 0x4e5   : > { %4690 = vrcp.f32 %v6874_v40  ;;  %v2527_v5 = vmul.f32 2.0, %v2431_v56  ;;  %v2875_v57 = vsel %vm2872_vm9, %v2874_v54, %v2870_v59  ;;  %vm6939_vm14 = vcmp.eq.f32.partialorder %v3225_v19, 8.507059e+37  ;;  %vm2884_vm15 = vmor %vm2882_vm11, %vm2883_vm10 }
 0x4e6   : > { %v2038_v58 = vpop.f32.mrf.mxu2  ;;  %v2152_v48 = vpop.f32.mrf.mxu3  ;;  %v6901_v24 = vsel %vm3119_vm4, %v2875_v57, 0.0  ;;  %v2879_v44 = vsub.f32 1.0, %v2878_v22  ;;  %v3228_v56 = vor.u32 1.1754944e-38, %v3227_v8  ;;  %v2901_v19 = vand.u32 2147483647, %v6874_v40 }
 0x4e7   : > { %v2559_v52 = vsub.f32 %v6824_v35, %v2527_v5  ;;  %v2039_v51 = vadd.f32 %v6803_v47, %v2038_v58  ;;  %v2153_v23 = vadd.f32 %v6880_v45, %v2152_v48  ;;  %3182 = vadd.xlane.f32.xlu2 %v6901_v24  ;;  %vm2897_vm2 = vweird.f32 %v6874_v40 }
 0x4e8   : > { %v2880_v28 = vmul.f32 %v6869_v20, %v2879_v44  ;;  %v2903_v44 = vand.u32 2147483648, %v6874_v40  ;;  %vm6983_vm6 = vcmp.eq.f32.partialorder %v2901_v19, 8.507059e+37 }
 0x4e9   : > { %v6918_v38 = vpop.eup %4688  ;;  %v2591_v35 = vmax.f32 %v2559_v52, 0.0  ;;  %v2100_v43 = vmax.f32 %v2039_v51, 0.0  ;;  %3815 = vst.msk [vmem:[%s6897_s3] sm:$0xff] %vm915_vm0, %v2153_v23  ;;  %4498 = vmatmul.msk.f32.gmra.mxu1 %vm915_vm0, %v4811_v21 }
 0x4ea   : > { %v3217_v14 = vmul.f32 %v6918_v38, %v6866_v53  ;;  %v6934_v63 = vpop.xlane.xlu0 %3154  ;;  %v2881_v7 = vadd.f32 %v6869_v20, %v2880_v28  ;;  %vm3222_vm1 = vweird.f32 %v6918_v38 }
 0x4eb   : > { %v6937_v34 = vpop.eup %4690  ;;  %v6943_v59 = vadd.f32 1.0, %v2591_v35  ;;  %4692 = vrcp.f32 %v6934_v63  ;;  %2202 = vmatmul.f32.gmra.mxu3 %v2100_v43  ;;  %v3722_v35 = vpop.f32.mrf.mxu1  ;;  %v3240_v2 = vand.u32 2147483647, %v6934_v63  ;;  %v3242_v21 = vand.u32 2147483648, %v6934_v63  ;;  %vm3223_vm3 = vmor %vm3221_vm13, %vm3222_vm1 }
 0x4ec   : > { %v3218_v22 = vsub.f32 1.0, %v3217_v14  ;;  %v2434_v5 = vpop.f32.mrf.mxu0  ;;  %v2885_v57 = vsel %vm2884_vm15, %v6869_v20, %v2881_v7  ;;  %v2893_v1 = vmul.f32 %v6937_v34, %v6874_v40  ;;  %4008 = vst [vmem:[%s6851_s5 + $0x8] sm:$0xff] %v3722_v35  ;;  %vm2898_vm5 = vweird.f32 %v6937_v34 }
 0x4ed   : > { %4694 = vrcp.f32 %v6943_v59  ;;  %v2528_v58 = vmul.f32 2.0, %v2434_v5  ;;  %v2890_v48 = vsel %vm6923_vm12, %v2889_v41, %v2885_v57  ;;  %v4812_v5 = vld [vmem:[%s5303_s28 + $0x98] sm:$0xff]  ;;  %vm3236_vm7 = vweird.f32 %v6934_v63  ;;  %vm2899_vm9 = vmor %vm2897_vm2, %vm2898_vm5 }
 0x4ee   : > { %v3219_v11 = vmul.f32 %v6918_v38, %v3218_v22  ;;  %v2041_v27 = vpop.f32.mrf.mxu2  ;;  %v2155_v20 = vpop.f32.mrf.mxu3  ;;  %v6962_v8 = vsel %vm3119_vm4, %v2890_v48, 0.0  ;;  %v2894_v52 = vsub.f32 1.0, %v2893_v1  ;;  %v2904_v48 = vor.u32 1.1754944e-38, %v2903_v44 }
 0x4ef   : > { %v2560_v51 = vsub.f32 %v6832_v18, %v2528_v58  ;;  %v2042_v23 = vadd.f32 %v6803_v47, %v2041_v27  ;;  %v2156_v28 = vadd.f32 %v6880_v45, %v2155_v20  ;;  %3184 = vadd.xlane.f32.xlu0 %v6962_v8  ;;  %vm7004_vm8 = vcmp.eq.f32.partialorder %v3240_v2, 8.507059e+37 }
 0x4f0   : > { %v3220_v43 = vadd.f32 %v6918_v38, %v3219_v11  ;;  %v2895_v14 = vmul.f32 %v6937_v34, %v2894_v52  ;;  %v3243_v44 = vor.u32 1.1754944e-38, %v3242_v21  ;;  %vm2912_vm10 = vweird.f32 %v6943_v59 }
 0x4f1   : > { %v6974_v18 = vpop.eup %4692  ;;  %v2592_v7 = vmax.f32 %v2560_v51, 0.0  ;;  %v2101_v41 = vmax.f32 %v2042_v23, 0.0  ;;  %3816 = vst.msk [vmem:[%s6897_s3 + $0x8] sm:$0xff] %vm915_vm0, %v2156_v28  ;;  %4499 = vmatmul.msk.f32.gmra.mxu1 %vm915_vm0, %v4812_v5  ;;  %v2916_v5 = vand.u32 2147483647, %v6943_v59 }
 0x4f2   : > { %v3224_v57 = vsel %vm3223_vm3, %v6918_v38, %v3220_v43  ;;  %v3232_v1 = vmul.f32 %v6974_v18, %v6934_v63  ;;  %v6992_v53 = vpop.xlane.xlu1 %3156  ;;  %v2896_v58 = vadd.f32 %v6937_v34, %v2895_v14  ;;  %vm3237_vm11 = vweird.f32 %v6974_v18 }
 0x4f3   : > { %v6995_v11 = vpop.eup %4694  ;;  %v3229_v19 = vsel %vm6939_vm14, %v3228_v56, %v3224_v57  ;;  %v7000_v27 = vadd.f32 1.0, %v2592_v7  ;;  %4696 = vrcp.f32 %v6992_v53  ;;  %2205 = vmatmul.f32.gmra.mxu3 %v2101_v41  ;;  %v3255_v40 = vand.u32 2147483647, %v6992_v53  ;;  %vm3238_vm12 = vmor %vm3236_vm7, %vm3237_vm11  ;;  %v3725_v52 = vpop.f32.mrf.mxu1 }
 0x4f4   : > { %v3230_v38 = vmul.f32 %v3229_v19, %v6523_v31  ;;  %v3233_v20 = vsub.f32 1.0, %v3232_v1  ;;  %v2437_v51 = vpop.f32.mrf.mxu0  ;;  %v2900_v56 = vsel %vm2899_vm9, %v6937_v34, %v2896_v58  ;;  %v2908_v31 = vmul.f32 %v6995_v11, %v6943_v59  ;;  %4009 = vst [vmem:[%s6851_s5 + $0x10] sm:$0xff] %v3725_v52 }
 0x4f5   : > { %4698 = vrcp.f32 %v7000_v27  ;;  %v2529_v54 = vmul.f32 2.0, %v2437_v51  ;;  %v2905_v34 = vsel %vm6983_vm6, %v2904_v48, %v2900_v56  ;;  %v3257_v41 = vand.u32 2147483648, %v6992_v53  ;;  %v4813_v48 = vld [vmem:[%s5303_s28 + $0xa0] sm:$0xff] }
 0x4f6   : > { %3975 = vst [vmem:[%s7018_s10] sm:$0xff] %v3230_v38  ;;  %v3234_v23 = vmul.f32 %v6974_v18, %v3233_v20  ;;  %v2044_v28 = vpop.f32.mrf.mxu2  ;;  %v2158_v35 = vpop.f32.mrf.mxu3  ;;  %v7031_v14 = vsel %vm3119_vm4, %v2905_v34, 0.0  ;;  %v2909_v22 = vsub.f32 1.0, %v2908_v31  ;;  %vm3251_vm13 = vweird.f32 %v6992_v53 }
 0x4f7   : > { %v2561_v43 = vsub.f32 %v6839_v32, %v2529_v54  ;;  %v2045_v2 = vadd.f32 %v6803_v47, %v2044_v28  ;;  %v2159_v21 = vadd.f32 %v6880_v45, %v2158_v35  ;;  %3186 = vadd.xlane.f32.xlu1 %v7031_v14  ;;  %v2918_v58 = vand.u32 2147483648, %v6943_v59 }
 0x4f8   : > { %v3235_v7 = vadd.f32 %v6974_v18, %v3234_v23  ;;  %vm7052_vm14 = vcmp.eq.f32.partialorder %v3255_v40, 8.507059e+37  ;;  %v2910_v51 = vmul.f32 %v6995_v11, %v2909_v22  ;;  %vm2913_vm15 = vweird.f32 %v6995_v11 }
 0x4f9   : > { %v7037_v57 = vpop.eup %4696  ;;  %v2593_v32 = vmax.f32 %v2561_v43, 0.0  ;;  %v2102_v1 = vmax.f32 %v2045_v2, 0.0  ;;  %3817 = vst.msk [vmem:[%s6897_s3 + $0x10] sm:$0xff] %vm915_vm0, %v2159_v21  ;;  %4500 = vmatmul.msk.f32.gmra.mxu1 %vm915_vm0, %v4813_v48  ;;  %v3258_v40 = vor.u32 1.1754944e-38, %v3257_v41  ;;  %vm7068_vm1 = vcmp.eq.f32.partialorder %v2916_v5, 8.507059e+37  ;;  %vm2914_vm3 = vmor %vm2912_vm10, %vm2913_vm15 }
 0x4fa   : > { %v3239_v19 = vsel %vm3238_vm12, %v6974_v18, %v3235_v7  ;;  %v3247_v38 = vmul.f32 %v7037_v57, %v6992_v53  ;;  %v7056_v63 = vpop.xlane.xlu2 %3158  ;;  %v2919_v43 = vor.u32 1.1754944e-38, %v2918_v58  ;;  %vm3252_vm2 = vweird.f32 %v7037_v57 }
 0x4fb   : > { %v7059_v54 = vpop.eup %4698  ;;  %v3244_v56 = vsel %vm7004_vm8, %v3243_v44, %v3239_v19  ;;  %v7063_v31 = vadd.f32 1.0, %v2593_v32  ;;  %4700 = vrcp.f32 %v7056_v63  ;;  %2208 = vmatmul.f32.gmra.mxu3 %v2102_v1  ;;  %v2911_v44 = vadd.f32 %v6995_v11, %v2910_v51  ;;  %vm3253_vm7 = vmor %vm3251_vm13, %vm3252_vm2 }
 0x4fc   : > { %v3245_v18 = vmul.f32 %v3244_v56, %v6541_v13  ;;  %v3248_v23 = vsub.f32 1.0, %v3247_v38  ;;  %v2440_v28 = vpop.f32.mrf.mxu0  ;;  %v2923_v2 = vmul.f32 %v7059_v54, %v7000_v27  ;;  %vm2927_vm5 = vweird.f32 %v7000_v27  ;;  %v4814_v56 = vld [vmem:[%s5303_s28 + $0xa8] sm:$0xff] }
 0x4fd   : > { %v2530_v34 = vmul.f32 2.0, %v2440_v28  ;;  %4702 = vrcp.f32 %v7063_v31  ;;  %v2915_v32 = vsel %vm2914_vm3, %v6995_v11, %v2911_v44  ;;  %vm3266_vm6 = vweird.f32 %v7056_v63 }
 0x4fe   : > { %3976 = vst [vmem:[%s7018_s10 + $0x8] sm:$0xff] %v3245_v18  ;;  %v3249_v21 = vmul.f32 %v7037_v57, %v3248_v23  ;;  %v2047_v13 = vpop.f32.mrf.mxu2  ;;  %v2161_v7 = vpop.f32.mrf.mxu3  ;;  %v3270_v58 = vand.u32 2147483647, %v7056_v63  ;;  %v2920_v59 = vsel %vm7068_vm1, %v2919_v43, %v2915_v32  ;;  %v2924_v48 = vsub.f32 1.0, %v2923_v2 }
 0x4ff   : > { %v2562_v41 = vsub.f32 %v6844_v36, %v2530_v34  ;;  %v2048_v22 = vadd.f32 %v6803_v47, %v2047_v13  ;;  %v2162_v5 = vadd.f32 %v6880_v45, %v2161_v7  ;;  %v7104_v11 = vsel %vm3119_vm4, %v2920_v59, 0.0 }
 0x500   : > { %v3250_v1 = vadd.f32 %v7037_v57, %v3249_v21  ;;  %v2931_v51 = vand.u32 2147483647, %v7000_v27  ;;  %3188 = vadd.xlane.f32.xlu2 %v7104_v11  ;;  %v2925_v28 = vmul.f32 %v7059_v54, %v2924_v48  ;;  %v2933_v35 = vand.u32 2147483648, %v7000_v27 }
 0x501   : > { %v7094_v19 = vpop.eup %4700  ;;  %v2594_v36 = vmax.f32 %v2562_v41, 0.0  ;;  %v2103_v38 = vmax.f32 %v2048_v22, 0.0  ;;  %3818 = vst.msk [vmem:[%s6897_s3 + $0x18] sm:$0xff] %vm915_vm0, %v2162_v5  ;;  %4501 = vmatmul.msk.f32.gmra.mxu1 %vm915_vm0, %v4814_v56  ;;  %v3272_v34 = vand.u32 2147483648, %v7056_v63  ;;  %vm2928_vm8 = vweird.f32 %v7059_v54 }
 0x502   : > { %v3254_v18 = vsel %vm3253_vm7, %v7037_v57, %v3250_v1  ;;  %v3262_v23 = vmul.f32 %v7094_v19, %v7056_v63  ;;  %v7113_v53 = vpop.xlane.xlu0 %3160  ;;  %vm7125_vm9 = vcmp.eq.f32.partialorder %v3270_v58, 8.507059e+37  ;;  %vm3267_vm10 = vweird.f32 %v7094_v19  ;;  %vm2929_vm11 = vmor %vm2927_vm5, %vm2928_vm8 }
 0x503   : > { %v3259_v52 = vsel %vm7052_vm14, %v3258_v40, %v3254_v18  ;;  %4704 = vrcp.f32 %v7113_v53  ;;  %2211 = vmatmul.f32.gmra.mxu3 %v2103_v38  ;;  %v7122_v57 = vpop.eup %4702  ;;  %v7129_v21 = vadd.f32 1.0, %v2594_v36  ;;  %v3285_v40 = vand.u32 2147483647, %v7113_v53  ;;  %v3728_v36 = vpop.f32.mrf.mxu1  ;;  %vm3268_vm13 = vmor %vm3266_vm6, %vm3267_vm10 }
 0x504   : > { %v3260_v44 = vmul.f32 %v3259_v52, %v6559_v16  ;;  %v3263_v43 = vsub.f32 1.0, %v3262_v23  ;;  %v2443_v20 = vpop.f32.mrf.mxu0  ;;  %v2926_v7 = vadd.f32 %v7059_v54, %v2925_v28  ;;  %v3287_v16 = vand.u32 2147483648, %v7113_v53  ;;  %4010 = vst [vmem:[%s6851_s5 + $0x18] sm:$0xff] %v3728_v36  ;;  %v4815_v28 = vld [vmem:[%s5303_s28 + $0xb0] sm:$0xff] }
 0x505   : > { %v2531_v13 = vmul.f32 2.0, %v2443_v20  ;;  %vm2932_vm12 = vcmp.eq.f32.partialorder %v2931_v51, 8.507059e+37  ;;  %v2934_v32 = vor.u32 1.1754944e-38, %v2933_v35  ;;  %4706 = vrcp.f32 %v7129_v21 }
 0x506   : > { %3977 = vst [vmem:[%s7018_s10 + $0x10] sm:$0xff] %v3260_v44  ;;  %v3264_v41 = vmul.f32 %v7094_v19, %v3263_v43  ;;  %v2050_v22 = vpop.f32.mrf.mxu2  ;;  %v2164_v5 = vpop.f32.mrf.mxu3  ;;  %v2930_v48 = vsel %vm2929_vm11, %v7059_v54, %v2926_v7  ;;  %v2938_v27 = vmul.f32 %v7122_v57, %v7063_v31  ;;  %vm3281_vm14 = vweird.f32 %v7113_v53 }
 0x507   : > { %v2563_v1 = vsub.f32 %v6848_v10, %v2531_v13  ;;  %v2051_v58 = vadd.f32 %v6803_v47, %v2050_v22  ;;  %v2165_v59 = vadd.f32 %v6880_v45, %v2164_v5  ;;  %v2935_v56 = vsel %vm2932_vm12, %v2934_v32, %v2930_v48 }
 0x508   : > { %v3265_v38 = vadd.f32 %v7094_v19, %v3264_v41  ;;  %v3273_v10 = vor.u32 1.1754944e-38, %v3272_v34  ;;  %v7160_v23 = vsel %vm3119_vm4, %v2935_v56, 0.0  ;;  %v2939_v34 = vsub.f32 1.0, %v2938_v27 }
 0x509   : > { %v7150_v51 = vpop.eup %4704  ;;  %v2595_v18 = vmax.f32 %v2563_v1, 0.0  ;;  %v2104_v54 = vmax.f32 %v2051_v58, 0.0  ;;  %3819 = vst.msk [vmem:[%s6897_s3 + $0x20] sm:$0xff] %vm915_vm0, %v2165_v59  ;;  %4502 = vmatmul.msk.f32.gmra.mxu1 %vm915_vm0, %v4815_v28  ;;  %3190 = vadd.xlane.f32.xlu0 %v7160_v23  ;;  %vm7173_vm15 = vcmp.eq.f32.partialorder %v3285_v40, 8.507059e+37  ;;  %v3288_v20 = vor.u32 1.1754944e-38, %v3287_v16 }
 0x50a   : > { %v3269_v35 = vsel %vm3268_vm13, %v7094_v19, %v3265_v38  ;;  %v3277_v52 = vmul.f32 %v7150_v51, %v7113_v53  ;;  %v7169_v63 = vpop.xlane.xlu1 %3162  ;;  %vm2942_vm1 = vweird.f32 %v7063_v31  ;;  %v2940_v2 = vmul.f32 %v7122_v57, %v2939_v34 }
 0x50b   : > { %v3274_v44 = vsel %vm7125_vm9, %v3273_v10, %v3269_v35  ;;  %4708 = vrcp.f32 %v7169_v63  ;;  %2214 = vmatmul.f32.gmra.mxu3 %v2104_v54  ;;  %v7179_v7 = vadd.f32 1.0, %v2595_v18  ;;  %vm2943_vm2 = vweird.f32 %v7122_v57  ;;  %v7185_v5 = vpop.eup %4706  ;;  %v3731_v56 = vpop.f32.mrf.mxu1 }
 0x50c   : > { %v3275_v19 = vmul.f32 %v3274_v44, %v6577_v50  ;;  %v3278_v13 = vsub.f32 1.0, %v3277_v52  ;;  %v2446_v41 = vpop.f32.mrf.mxu0  ;;  %v2946_v40 = vand.u32 2147483647, %v7063_v31  ;;  %vm3282_vm3 = vweird.f32 %v7150_v51  ;;  %vm7202_vm5 = vmor %vm2942_vm1, %vm2943_vm2  ;;  %4011 = vst [vmem:[%s6851_s5 + $0x20] sm:$0xff] %v3731_v56  ;;  %v4816_v52 = vld [vmem:[%s5303_s28 + $0xb8] sm:$0xff] }
 0x50d   : > { %v2532_v22 = vmul.f32 2.0, %v2446_v41  ;;  %v3300_v50 = vand.u32 2147483647, %v7169_v63  ;;  %v2948_v58 = vand.u32 2147483648, %v7063_v31  ;;  %v2941_v38 = vadd.f32 %v7122_v57, %v2940_v2  ;;  %vm3283_vm7 = vmor %vm3281_vm14, %vm3282_vm3 }
 0x50e   : > { %3978 = vst [vmem:[%s7018_s10 + $0x18] sm:$0xff] %v3275_v19  ;;  %v3279_v16 = vmul.f32 %v7150_v51, %v3278_v13  ;;  %v2053_v32 = vpop.f32.mrf.mxu2  ;;  %v2167_v1 = vpop.f32.mrf.mxu3  ;;  %4710 = vrcp.f32 %v7179_v7  ;;  %vm2947_vm6 = vcmp.eq.f32.partialorder %v2946_v40, 8.507059e+37  ;;  %v2953_v35 = vmul.f32 %v7185_v5, %v7129_v21 }
 0x50f   : > { %v2564_v59 = vsub.f32 %v6858_v60, %v2532_v22  ;;  %v2054_v48 = vadd.f32 %v6803_v47, %v2053_v32  ;;  %v2168_v36 = vadd.f32 %v6880_v45, %v2167_v1  ;;  %v2949_v60 = vor.u32 1.1754944e-38, %v2948_v58 }
 0x510   : > { %v3280_v27 = vadd.f32 %v7150_v51, %v3279_v16  ;;  %v2945_v31 = vsel %vm7202_vm5, %v7122_v57, %v2941_v38  ;;  %v3302_v44 = vand.u32 2147483648, %v7169_v63  ;;  %v7230_v41 = vadd.f32 %v6791_v9, %v6813_v12 }
 0x511   : > { %v7207_v18 = vpop.eup %4708  ;;  %v2596_v54 = vmax.f32 %v2564_v59, 0.0  ;;  %v2105_v28 = vmax.f32 %v2054_v48, 0.0  ;;  %3820 = vst.msk [vmem:[%s6897_s3 + $0x28] sm:$0xff] %vm915_vm0, %v2168_v36  ;;  %4503 = vmatmul.msk.f32.gmra.mxu1 %vm915_vm0, %v4816_v52  ;;  %v2950_v19 = vsel %vm2947_vm6, %v2949_v60, %v2945_v31  ;;  %vm3296_vm8 = vweird.f32 %v7169_v63 }
 0x512   : > { %v3284_v34 = vsel %vm3283_vm7, %v7150_v51, %v3280_v27  ;;  %v3292_v53 = vmul.f32 %v7207_v18, %v7169_v63  ;;  %v7226_v13 = vpop.xlane.xlu2 %3164  ;;  %v7236_v22 = vsel %vm3119_vm4, %v2950_v19, 0.0  ;;  %v7241_v51 = vadd.f32 %v6791_v9, %v6864_v30 }
 0x513   : > { %v3289_v57 = vsel %vm7173_vm15, %v3288_v20, %v3284_v34  ;;  %4712 = vrcp.f32 %v7226_v13  ;;  %2217 = vmatmul.f32.gmra.mxu3 %v2105_v28  ;;  %3192 = vadd.xlane.f32.xlu1 %v7236_v22  ;;  %vm7246_vm9 = vcmp.eq.f32.partialorder %v3300_v50, 8.507059e+37  ;;  %v7250_v20 = vadd.f32 1.0, %v2596_v54  ;;  %v3734_v36 = vpop.f32.mrf.mxu1 }
 0x514   : > { %v3290_v2 = vmul.f32 %v3289_v57, %v6595_v3  ;;  %v3293_v40 = vsub.f32 1.0, %v3292_v53  ;;  %v2449_v12 = vpop.f32.mrf.mxu0  ;;  %v2954_v32 = vsub.f32 1.0, %v2953_v35  ;;  %v7252_v1 = vpop.eup %4710  ;;  %vm3297_vm10 = vweird.f32 %v7207_v18  ;;  %4012 = vst [vmem:[%s6851_s5 + $0x28] sm:$0xff] %v3734_v36 }
 0x515   : > { %v2533_v16 = vmul.f32 2.0, %v2449_v12  ;;  %v3303_v9 = vor.u32 1.1754944e-38, %v3302_v44  ;;  %vm2957_vm11 = vweird.f32 %v7129_v21  ;;  %vm2958_vm12 = vweird.f32 %v7185_v5  ;;  %vm3298_vm13 = vmor %vm3296_vm8, %vm3297_vm10 }
 0x516   : > { %3979 = vst [vmem:[%s7018_s10 + $0x20] sm:$0xff] %v3290_v2  ;;  %v3294_v3 = vmul.f32 %v7207_v18, %v3293_v40  ;;  %v2056_v30 = vpop.f32.mrf.mxu2  ;;  %v2170_v58 = vpop.f32.mrf.mxu3  ;;  %v2961_v48 = vand.u32 2147483647, %v7129_v21  ;;  %v2955_v27 = vmul.f32 %v7185_v5, %v2954_v32  ;;  %v2963_v10 = vand.u32 2147483648, %v7129_v21  ;;  %vm2959_vm14 = vmor %vm2957_vm11, %vm2958_vm12 }
 0x517   : > { %v2057_v50 = vadd.f32 %v6803_v47, %v2056_v30  ;;  %v2171_v59 = vadd.f32 %v6880_v45, %v2170_v58  ;;  %v2565_v56 = vsub.f32 %v6862_v61, %v2533_v16  ;;  %4714 = vrcp.f32 %v7250_v20  ;;  %v4817_v61 = vld [vmem:[%s5303_s28 + $0xc0] sm:$0xff] }
 0x518   : > { %v3295_v38 = vadd.f32 %v7207_v18, %v3294_v3  ;;  %v3315_v54 = vand.u32 2147483647, %v7226_v13  ;;  %v3317_v28 = vand.u32 2147483648, %v7226_v13  ;;  %v2956_v63 = vadd.f32 %v7185_v5, %v2955_v27 }
 0x519   : > { %v7267_v60 = vpop.eup %4712  ;;  %v2106_v31 = vmax.f32 %v2057_v50, 0.0  ;;  %3821 = vst.msk [vmem:[%s6897_s3 + $0x30] sm:$0xff] %vm915_vm0, %v2171_v59  ;;  %4504 = vmatmul.msk.f32.gmra.mxu1 %vm915_vm0, %v4817_v61  ;;  %v2968_v53 = vmul.f32 %v7252_v1, %v7179_v7  ;;  %vm2962_vm15 = vcmp.eq.f32.partialorder %v2961_v48, 8.507059e+37  ;;  %v2597_v2 = vmax.f32 %v2565_v56, 0.0 }
 0x51a   : > { %v3299_v35 = vsel %vm3298_vm13, %v7207_v18, %v3295_v38  ;;  %v3307_v52 = vmul.f32 %v7267_v60, %v7226_v13  ;;  %v7284_v34 = vpop.xlane.xlu0 %3166  ;;  %v2964_v18 = vor.u32 1.1754944e-38, %v2963_v10  ;;  %v2960_v40 = vsel %vm2959_vm14, %v7185_v5, %v2956_v63 }
 0x51b   : > { %v3304_v44 = vsel %vm7246_vm9, %v3303_v9, %v3299_v35  ;;  %4716 = vrcp.f32 %v7284_v34  ;;  %2220 = vmatmul.f32.gmra.mxu3 %v2106_v31  ;;  %vm3311_vm1 = vweird.f32 %v7226_v13  ;;  %vm3312_vm2 = vweird.f32 %v7267_v60  ;;  %v3737_v27 = vpop.f32.mrf.mxu1  ;;  %v4818_v31 = vld [vmem:[%s5303_s28 + $0xc8] sm:$0xff] }
 0x51c   : > { %v3305_v19 = vmul.f32 %v3304_v44, %v6613_v29  ;;  %v3308_v57 = vsub.f32 1.0, %v3307_v52  ;;  %v2452_v12 = vpop.f32.mrf.mxu0  ;;  %vm7299_vm3 = vcmp.eq.f32.partialorder %v3315_v54, 8.507059e+37  ;;  %v2965_v21 = vsel %vm2962_vm15, %v2964_v18, %v2960_v40  ;;  %vm3313_vm6 = vmor %vm3311_vm1, %vm3312_vm2  ;;  %4013 = vst [vmem:[%s6851_s5 + $0x30] sm:$0xff] %v3737_v27 }
 0x51d   : > { %v7307_v29 = vsel %vm3119_vm4, %v2965_v21, 0.0  ;;  %v2534_v32 = vmul.f32 2.0, %v2452_v12  ;;  %v2969_v9 = vsub.f32 1.0, %v2968_v53  ;;  %v7309_v30 = vpop.eup %4714  ;;  %v3318_v58 = vor.u32 1.1754944e-38, %v3317_v28 }
 0x51e   : > { %3980 = vst [vmem:[%s7018_s10 + $0x28] sm:$0xff] %v3305_v19  ;;  %v3309_v16 = vmul.f32 %v7267_v60, %v3308_v57  ;;  %v2059_v3 = vpop.f32.mrf.mxu2  ;;  %v2173_v5 = vpop.f32.mrf.mxu3  ;;  %3194 = vadd.xlane.f32.xlu2 %v7307_v29  ;;  %vm2972_vm5 = vweird.f32 %v7179_v7  ;;  %v7316_v36 = vadd.f32 1.0, %v2597_v2  ;;  %vm2973_vm7 = vweird.f32 %v7252_v1 }
 0x51f   : > { %v2060_v50 = vadd.f32 %v6803_v47, %v2059_v3  ;;  %v2174_v59 = vadd.f32 %v6880_v45, %v2173_v5  ;;  %v2566_v38 = vsub.f32 %v6872_v17, %v2534_v32  ;;  %v2970_v56 = vmul.f32 %v7252_v1, %v2969_v9  ;;  %vm2974_vm9 = vmor %vm2972_vm5, %vm2973_vm7 }
 0x520   : > { %v3310_v48 = vadd.f32 %v7267_v60, %v3309_v16  ;;  %v2976_v28 = vand.u32 2147483647, %v7179_v7  ;;  %v2978_v17 = vand.u32 2147483648, %v7179_v7  ;;  %vm3326_vm8 = vweird.f32 %v7284_v34 }
 0x521   : > { %v7320_v10 = vpop.eup %4716  ;;  %v2107_v54 = vmax.f32 %v2060_v50, 0.0  ;;  %3822 = vst.msk [vmem:[%s6897_s3 + $0x38] sm:$0xff] %vm915_vm0, %v2174_v59  ;;  %4505 = vmatmul.msk.f32.gmra.mxu1 %vm915_vm0, %v4818_v31  ;;  %v3330_v13 = vand.u32 2147483647, %v7284_v34  ;;  %v2598_v53 = vmax.f32 %v2566_v38, 0.0  ;;  %v2971_v44 = vadd.f32 %v7252_v1, %v2970_v56 }
 0x522   : > { %v3314_v61 = vsel %vm3313_vm6, %v7267_v60, %v3310_v48  ;;  %v3322_v35 = vmul.f32 %v7320_v10, %v7284_v34  ;;  %v7338_v52 = vpop.xlane.xlu1 %3168  ;;  %v2983_v60 = vmul.f32 %v7309_v30, %v7250_v20  ;;  %v2979_v57 = vor.u32 1.1754944e-38, %v2978_v17 }
 0x523   : > { %v3319_v63 = vsel %vm7299_vm3, %v3318_v58, %v3314_v61  ;;  %2223 = vmatmul.f32.gmra.mxu3 %v2107_v54  ;;  %4718 = vrcp.f32 %v7338_v52  ;;  %v3332_v40 = vand.u32 2147483648, %v7284_v34  ;;  %v2975_v12 = vsel %vm2974_vm9, %v7252_v1, %v2971_v44  ;;  %v3740_v48 = vpop.f32.mrf.mxu1 }
 0x524   : > { %v3320_v18 = vmul.f32 %v3319_v63, %v6631_v62  ;;  %v3323_v19 = vsub.f32 1.0, %v3322_v35  ;;  %v2455_v2 = vpop.f32.mrf.mxu0  ;;  %4720 = vrcp.f32 %v7316_v36  ;;  %vm2977_vm10 = vcmp.eq.f32.partialorder %v2976_v28, 8.507059e+37  ;;  %4014 = vst [vmem:[%s6851_s5 + $0x38] sm:$0xff] %v3740_v48  ;;  %v4820_v48 = vld [vmem:[%s5303_s28 + $0xd8] sm:$0xff] }
 0x525   : > { %vm3327_vm11 = vweird.f32 %v7320_v10  ;;  %v2980_v43 = vsel %vm2977_vm10, %v2979_v57, %v2975_v12  ;;  %v2535_v21 = vmul.f32 2.0, %v2455_v2  ;;  %vm7358_vm12 = vcmp.eq.f32.partialorder %v3330_v13, 8.507059e+37 }
 0x526   : > { %3981 = vst [vmem:[%s7018_s10 + $0x30] sm:$0xff] %v3320_v18  ;;  %v3324_v62 = vmul.f32 %v7320_v10, %v3323_v19  ;;  %v2062_v7 = vpop.f32.mrf.mxu2  ;;  %v2176_v16 = vpop.f32.mrf.mxu3  ;;  %v7362_v3 = vadd.f32 1.0, %v2598_v53  ;;  %v7366_v1 = vsel %vm3119_vm4, %v2980_v43, 0.0  ;;  %v2984_v59 = vsub.f32 1.0, %v2983_v60  ;;  %vm7377_vm13 = vmor %vm3326_vm8, %vm3327_vm11 }
 0x527   : > { %v2063_v5 = vadd.f32 %v6803_v47, %v2062_v7  ;;  %3196 = vadd.xlane.f32.xlu0 %v7366_v1  ;;  %v2567_v58 = vsub.f32 %v6885_v37, %v2535_v21  ;;  %v2177_v50 = vadd.f32 %v6880_v45, %v2176_v16  ;;  %v3333_v56 = vor.u32 1.1754944e-38, %v3332_v40  ;;  %v4819_v37 = vld [vmem:[%s5303_s28 + $0xd0] sm:$0xff] }
 0x528   : > { %v3325_v9 = vadd.f32 %v7320_v10, %v3324_v62  ;;  %vm2988_vm14 = vweird.f32 %v7309_v30  ;;  %v2991_v54 = vand.u32 2147483647, %v7250_v20  ;;  %v2985_v31 = vmul.f32 %v7309_v30, %v2984_v59 }
 0x529   : > { %v2108_v27 = vmax.f32 %v2063_v5, 0.0  ;;  %4506 = vmatmul.msk.f32.gmra.mxu1 %vm915_vm0, %v4819_v37  ;;  %v7386_v28 = vpop.eup %4718  ;;  %v2599_v17 = vmax.f32 %v2567_v58, 0.0  ;;  %3823 = vst.msk [vmem:[%s6897_s3 + $0x40] sm:$0xff] %vm915_vm0, %v2177_v50  ;;  %v2993_v61 = vand.u32 2147483648, %v7250_v20  ;;  %vm3341_vm15 = vweird.f32 %v7338_v52  ;;  %v4822_v50 = vld [vmem:[%s5303_s28 + $0xe0] sm:$0xff] }
 0x52a   : > { %v3329_v34 = vsel %vm7377_vm13, %v7320_v10, %v3325_v9  ;;  %v7395_v35 = vpop.xlane.xlu2 %3170  ;;  %v7397_v13 = vpop.eup %4720  ;;  %v3337_v53 = vmul.f32 %v7386_v28, %v7338_v52  ;;  %v3345_v10 = vand.u32 2147483647, %v7338_v52  ;;  %4722 = vrcp.f32 %v7362_v3 }
 0x52b   : > { %v3334_v63 = vsel %vm7358_vm12, %v3333_v56, %v3329_v34  ;;  %2226 = vmatmul.f32.gmra.mxu3 %v2108_v27  ;;  %v2986_v60 = vadd.f32 %v7309_v30, %v2985_v31  ;;  %vm2987_vm1 = vweird.f32 %v7250_v20  ;;  %v3347_v57 = vand.u32 2147483648, %v7338_v52  ;;  %v3743_v9 = vpop.f32.mrf.mxu1 }
 0x52c   : > { %v3335_v44 = vmul.f32 %v3334_v63, %v6649_v25  ;;  %v2458_v18 = vpop.f32.mrf.mxu0  ;;  %v3338_v19 = vsub.f32 1.0, %v3337_v53  ;;  %vm2989_vm2 = vmor %vm2987_vm1, %vm2988_vm14  ;;  %v2994_v2 = vor.u32 1.1754944e-38, %v2993_v61  ;;  %4724 = vrcp.f32 %v7395_v35  ;;  %4015 = vst [vmem:[%s6851_s5 + $0x40] sm:$0xff] %v3743_v9 }
 0x52d   : > { %v7414_v40 = vadd.f32 1.0, %v2599_v17  ;;  %v2990_v25 = vsel %vm2989_vm2, %v7309_v30, %v2986_v60  ;;  %vm2992_vm3 = vcmp.eq.f32.partialorder %v2991_v54, 8.507059e+37  ;;  %v2536_v12 = vmul.f32 2.0, %v2458_v18 }
 0x52e   : > { %3982 = vst [vmem:[%s7018_s10 + $0x38] sm:$0xff] %v3335_v44  ;;  %v2065_v62 = vpop.f32.mrf.mxu2  ;;  %v2179_v20 = vpop.f32.mrf.mxu3  ;;  %v3339_v43 = vmul.f32 %v7386_v28, %v3338_v19  ;;  %vm3342_vm5 = vweird.f32 %v7386_v28  ;;  %v2995_v21 = vsel %vm2992_vm3, %v2994_v2, %v2990_v25  ;;  %v3360_v32 = vand.u32 2147483647, %v7395_v35 }
 0x52f   : > { %v2066_v7 = vadd.f32 %v6803_v47, %v2065_v62  ;;  %v7422_v16 = vsel %vm3119_vm4, %v2995_v21, 0.0  ;;  %v2568_v30 = vsub.f32 %v6911_v42, %v2536_v12  ;;  %v2180_v5 = vadd.f32 %v6880_v45, %v2179_v20  ;;  %vm3343_vm7 = vmor %vm3341_vm15, %vm3342_vm5 }
 0x530   : > { %v3340_v58 = vadd.f32 %v7386_v28, %v3339_v43  ;;  %vm7428_vm6 = vcmp.eq.f32.partialorder %v3345_v10, 8.507059e+37  ;;  %3198 = vadd.xlane.f32.xlu1 %v7422_v16  ;;  %v2998_v59 = vmul.f32 %v7397_v13, %v7316_v36  ;;  %v7438_v42 = vpop.eup %4722  ;;  %v3348_v38 = vor.u32 1.1754944e-38, %v3347_v57 }
 0x531   : > { %v2109_v47 = vmax.f32 %v2066_v7, 0.0  ;;  %4507 = vmatmul.msk.f32.gmra.mxu1 %vm915_vm0, %v4820_v48  ;;  %4726 = vrcp.f32 %v7414_v40  ;;  %v3362_v56 = vand.u32 2147483648, %v7395_v35  ;;  %v2600_v27 = vmax.f32 %v2568_v30, 0.0  ;;  %3824 = vst.msk [vmem:[%s6897_s3 + $0x48] sm:$0xff] %vm915_vm0, %v2180_v5 }
 0x532   : > { %v7448_v54 = vpop.xlane.xlu0 %3172  ;;  %v7450_v37 = vpop.eup %4724  ;;  %v3344_v34 = vsel %vm3343_vm7, %v7386_v28, %v3340_v58  ;;  %vm3356_vm8 = vweird.f32 %v7395_v35  ;;  %v2999_v17 = vsub.f32 1.0, %v2998_v59  ;;  %vm7459_vm9 = vcmp.eq.f32.partialorder %v3360_v32, 8.507059e+37 }
 0x533   : > { %4728 = vrcp.f32 %v7448_v54  ;;  %2229 = vmatmul.f32.gmra.mxu3 %v2109_v47  ;;  %v3349_v52 = vsel %vm7428_vm6, %v3348_v38, %v3344_v34  ;;  %v3352_v31 = vmul.f32 %v7450_v37, %v7395_v35  ;;  %v3006_v63 = vand.u32 2147483647, %v7316_v36  ;;  %v3746_v58 = vpop.f32.mrf.mxu1 }
 0x534   : > { %v3008_v28 = vand.u32 2147483648, %v7316_v36  ;;  %v2461_v53 = vpop.f32.mrf.mxu0  ;;  %v3350_v10 = vmul.f32 %v3349_v52, %v6667_v15  ;;  %v7466_v44 = vadd.f32 1.0, %v2600_v27  ;;  %v3000_v60 = vmul.f32 %v7397_v13, %v2999_v17  ;;  %v7477_v15 = vld [vmem:[%s8236_s14] ss:$0 sm:$0xff]  ;;  %4016 = vst [vmem:[%s6851_s5 + $0x48] sm:$0xff] %v3746_v58 }
 0x535   : > { %vm3003_vm10 = vweird.f32 %v7397_v13  ;;  %v3353_v18 = vsub.f32 1.0, %v3352_v31  ;;  %vm3357_vm11 = vweird.f32 %v7450_v37  ;;  %v3363_v19 = vor.u32 1.1754944e-38, %v3362_v56 }
 0x536   : > { %vm3002_vm12 = vweird.f32 %v7316_v36  ;;  %v2068_v57 = vpop.f32.mrf.mxu2  ;;  %v2182_v2 = vpop.f32.mrf.mxu3  ;;  %3983 = vst [vmem:[%s7018_s10 + $0x40] sm:$0xff] %v3350_v10  ;;  %v3001_v25 = vadd.f32 %v7397_v13, %v3000_v60  ;;  %v2537_v12 = vmul.f32 2.0, %v2461_v53  ;;  %vm3007_vm14 = vcmp.eq.f32.partialorder %v3006_v63, 8.507059e+37  ;;  %vm3358_vm1 = vmor %vm3356_vm8, %vm3357_vm11 }
 0x537   : > { %v2069_v62 = vadd.f32 %v7477_v15, %v2068_v57  ;;  %v2183_v20 = vadd.f32 %v6880_v45, %v2182_v2  ;;  %v7481_v43 = vpop.eup %4726  ;;  %v3354_v36 = vmul.f32 %v7450_v37, %v3353_v18  ;;  %vm7486_vm13 = vmor %vm3002_vm12, %vm3003_vm10  ;;  %v3009_v7 = vor.u32 1.1754944e-38, %v3008_v28 }
 0x538   : > { %vm3371_vm15 = vweird.f32 %v7448_v54  ;;  %v3013_v32 = vmul.f32 %v7438_v42, %v7362_v3  ;;  %4730 = vrcp.f32 %v7466_v44  ;;  %v3005_v45 = vsel %vm7486_vm13, %v7397_v13, %v3001_v25 }
 0x539   : > { %v7493_v30 = vpop.eup %4728  ;;  %v2569_v5 = vsub.f32 %v6914_v4, %v2537_v12  ;;  %v2110_v9 = vmax.f32 %v2069_v62, 0.0  ;;  %3825 = vst.msk [vmem:[%s6897_s3 + $0x50] sm:$0xff] %vm915_vm0, %v2183_v20  ;;  %4508 = vmatmul.msk.f32.gmra.mxu1 %vm915_vm0, %v4822_v50  ;;  %v3355_v47 = vadd.f32 %v7450_v37, %v3354_v36  ;;  %v3010_v59 = vsel %vm3007_vm14, %v3009_v7, %v3005_v45 }
 0x53a   : > { %v3367_v48 = vmul.f32 %v7493_v30, %v7448_v54  ;;  %v3375_v38 = vand.u32 2147483647, %v7448_v54  ;;  %v7508_v56 = vpop.xlane.xlu1 %3174  ;;  %v7517_v4 = vsel %vm3119_vm4, %v3010_v59, 0.0  ;;  %v3377_v13 = vand.u32 2147483648, %v7448_v54 }
 0x53b   : > { %v2601_v27 = vmax.f32 %v2569_v5, 0.0  ;;  %v3014_v34 = vsub.f32 1.0, %v3013_v32  ;;  %2232 = vmatmul.f32.gmra.mxu3 %v2110_v9  ;;  %v3359_v17 = vsel %vm3358_vm1, %v7450_v37, %v3355_v47  ;;  %3200 = vadd.xlane.f32.xlu2 %v7517_v4  ;;  %vm3018_vm2 = vweird.f32 %v7438_v42  ;;  %v4824_v32 = vld [vmem:[%s5303_s28 + $0xe8] sm:$0xff]  ;;  %v3749_v9 = vpop.f32.mrf.mxu1 }
 0x53c   : > { %v3368_v52 = vsub.f32 1.0, %v3367_v48  ;;  %v3023_v31 = vand.u32 2147483648, %v7362_v3  ;;  %v2464_v35 = vpop.f32.mrf.mxu0  ;;  %v3364_v63 = vsel %vm7459_vm9, %v3363_v19, %v3359_v17  ;;  %v3021_v53 = vand.u32 2147483647, %v7362_v3  ;;  %4017 = vst [vmem:[%s6851_s5 + $0x50] sm:$0xff] %v3749_v9 }
 0x53d   : > { %v3015_v28 = vmul.f32 %v7438_v42, %v3014_v34  ;;  %4732 = vrcp.f32 %v7508_v56  ;;  %v3365_v37 = vmul.f32 %v3364_v63, %v6693_v26  ;;  %vm3372_vm3 = vweird.f32 %v7493_v30 }
 0x53e   : > { %v3369_v10 = vmul.f32 %v7493_v30, %v3368_v52  ;;  %vm7532_vm5 = vcmp.eq.f32.partialorder %v3375_v38, 8.507059e+37  ;;  %v2071_v18 = vpop.f32.mrf.mxu2  ;;  %v2185_v61 = vpop.f32.mrf.mxu3  ;;  %v3378_v19 = vor.u32 1.1754944e-38, %v3377_v13  ;;  %v7538_v2 = vadd.f32 1.0, %v2601_v27  ;;  %vm3373_vm8 = vmor %vm3371_vm15, %vm3372_vm3 }
 0x53f   : > { %v7536_v57 = vpop.eup %4730  ;;  %v3016_v25 = vadd.f32 %v7438_v42, %v3015_v28  ;;  %vm3017_vm6 = vweird.f32 %v7362_v3  ;;  %3984 = vst [vmem:[%s7018_s10 + $0x48] sm:$0xff] %v3365_v37  ;;  %v3024_v12 = vor.u32 1.1754944e-38, %v3023_v31  ;;  %v2538_v62 = vmul.f32 2.0, %v2464_v35  ;;  %v7555_v3 = vld [vmem:[%s8155_s16] ss:$0 sm:$0xff] }
 0x540   : > { %v3370_v26 = vadd.f32 %v7493_v30, %v3369_v10  ;;  %vm3019_vm7 = vmor %vm3017_vm6, %vm3018_vm2  ;;  %v2072_v20 = vadd.f32 %v7477_v15, %v2071_v18  ;;  %vm3022_vm9 = vcmp.eq.f32.partialorder %v3021_v53, 8.507059e+37  ;;  %v2186_v21 = vadd.f32 %v7555_v3, %v2185_v61 }
 0x541   : > { %v3020_v36 = vsel %vm3019_vm7, %v7438_v42, %v3016_v25  ;;  %v3028_v7 = vmul.f32 %v7481_v43, %v7414_v40  ;;  %4509 = vmatmul.msk.f32.gmra.mxu1 %vm915_vm0, %v4824_v32  ;;  %v3392_v42 = vand.u32 2147483648, %v7508_v56  ;;  %v2570_v5 = vsub.f32 %v7230_v41, %v2538_v62 }
 0x542   : > { %v3374_v54 = vsel %vm3373_vm8, %v7493_v30, %v3370_v26  ;;  %v3025_v45 = vsel %vm3022_vm9, %v3024_v12, %v3020_v36  ;;  %v2111_v59 = vmax.f32 %v2072_v20, 0.0  ;;  %3826 = vst.msk [vmem:[%s6897_s3 + $0x58] sm:$0xff] %vm915_vm0, %v2186_v21  ;;  %v7575_v48 = vpop.xlane.xlu2 %3176  ;;  %4734 = vrcp.f32 %v7538_v2  ;;  %v4825_v26 = vld [vmem:[%s5303_s28 + $0xf0] sm:$0xff] }
 0x543   : > { %v7565_v58 = vpop.eup %4732  ;;  %v3379_v50 = vsel %vm7532_vm5, %v3378_v19, %v3374_v54  ;;  %v7571_v47 = vsel %vm3119_vm4, %v3025_v45, 0.0  ;;  %v3029_v30 = vsub.f32 1.0, %v3028_v7  ;;  %v2602_v13 = vmax.f32 %v2570_v5, 0.0  ;;  %v3752_v45 = vpop.f32.mrf.mxu1 }
 0x544   : > { %v3380_v38 = vmul.f32 %v3379_v50, %v6716_v39  ;;  %3202 = vadd.xlane.f32.xlu0 %v7571_v47  ;;  %v3382_v41 = vmul.f32 %v7565_v58, %v7508_v56  ;;  %v2467_v27 = vpop.f32.mrf.mxu0  ;;  %vm3386_vm10 = vweird.f32 %v7508_v56  ;;  %vm3033_vm11 = vweird.f32 %v7481_v43  ;;  %2235 = vmatmul.f32.gmra.mxu3 %v2111_v59  ;;  %4018 = vst [vmem:[%s6851_s5 + $0x58] sm:$0xff] %v3752_v45 }
 0x545   : > { %v3030_v34 = vmul.f32 %v7481_v43, %v3029_v30  ;;  %v3036_v17 = vand.u32 2147483647, %v7414_v40  ;;  %v3390_v52 = vand.u32 2147483647, %v7508_v56  ;;  %v3038_v31 = vand.u32 2147483648, %v7414_v40 }
 0x546   : > { %3985 = vst [vmem:[%s7018_s10 + $0x50] sm:$0xff] %v3380_v38  ;;  %v3383_v39 = vsub.f32 1.0, %v3382_v41  ;;  %4736 = vrcp.f32 %v7575_v48  ;;  %v2074_v35 = vpop.f32.mrf.mxu2  ;;  %v2188_v63 = vpop.f32.mrf.mxu3  ;;  %vm3387_vm12 = vweird.f32 %v7565_v58  ;;  %v3393_v28 = vor.u32 1.1754944e-38, %v3392_v42  ;;  %v4826_v56 = vld [vmem:[%s8235_s18] ss:$0 sm:$0xff] }
 0x547   : > { %v3031_v53 = vadd.f32 %v7481_v43, %v3030_v34  ;;  %vm3032_vm13 = vweird.f32 %v7414_v40  ;;  %v7595_v10 = vadd.f32 1.0, %v2602_v13  ;;  %vm3037_vm15 = vcmp.eq.f32.partialorder %v3036_v17, 8.507059e+37  ;;  %vm7613_vm1 = vmor %vm3386_vm10, %vm3387_vm12 }
 0x548   : > { %v3384_v37 = vmul.f32 %v7565_v58, %v3383_v39  ;;  %vm3034_vm14 = vmor %vm3032_vm13, %vm3033_vm11  ;;  %v3039_v60 = vor.u32 1.1754944e-38, %v3038_v31  ;;  %v3405_v61 = vand.u32 2147483647, %v7575_v48  ;;  %v2539_v19 = vmul.f32 2.0, %v2467_v27  ;;  %v7604_v40 = vpop.eup %4734 }
 0x549   : > { %v3035_v18 = vsel %vm3034_vm14, %v7481_v43, %v3031_v53  ;;  %v2075_v25 = vadd.f32 %v7477_v15, %v2074_v35  ;;  %4510 = vmatmul.msk.f32.gmra.mxu1 %vm915_vm0, %v4825_v26  ;;  %v3407_v20 = vand.u32 2147483648, %v7575_v48  ;;  %v2189_v36 = vadd.f32 %v7555_v3, %v2188_v63 }
 0x54a   : > { %v3385_v12 = vadd.f32 %v7565_v58, %v3384_v37  ;;  %v3040_v62 = vsel %vm3037_vm15, %v3039_v60, %v3035_v18  ;;  %v2571_v7 = vsub.f32 %v7241_v51, %v2539_v19  ;;  %v3043_v54 = vmul.f32 %v7536_v57, %v7466_v44  ;;  %v7635_v51 = vpop.xlane.xlu0 %3178 }
 0x54b   : > { %v7619_v21 = vsel %vm3119_vm4, %v3040_v62, 0.0  ;;  %v2112_v32 = vmax.f32 %v2075_v25, 0.0  ;;  %v2508_v5 = vadd.f32 %v4826_v56, %v6929_v6  ;;  %vm3391_vm2 = vcmp.eq.f32.partialorder %v3390_v52, 8.507059e+37  ;;  %3827 = vst.msk [vmem:[%s6897_s3 + $0x60] sm:$0xff] %vm915_vm0, %v2189_v36 }
 0x54c   : > { %v4737_v42 = vpop.eup %4736  ;;  %v3389_v9 = vsel %vm7613_vm1, %v7565_v58, %v3385_v12  ;;  %3204 = vadd.xlane.f32.xlu1 %v7619_v21  ;;  %vm3401_vm3 = vweird.f32 %v7575_v48  ;;  %4738 = vrcp.f32 %v7595_v10  ;;  %v3051_v6 = vand.u32 2147483647, %v7466_v44  ;;  %v2470_v30 = vpop.f32.mrf.mxu0 }
 0x54d   : > { %v3394_v50 = vsel %vm3391_vm2, %v3393_v28, %v3389_v9  ;;  %v3397_v59 = vmul.f32 %v4737_v42, %v7575_v48  ;;  %2238 = vmatmul.f32.gmra.mxu3 %v2112_v32  ;;  %v2603_v38 = vmax.f32 %v2571_v7, 0.0  ;;  %v3044_v41 = vsub.f32 1.0, %v3043_v54  ;;  %v3755_v12 = vpop.f32.mrf.mxu1 }
 0x54e   : > { %v3395_v58 = vmul.f32 %v3394_v50, %v6742_v46  ;;  %v3053_v13 = vand.u32 2147483648, %v7466_v44  ;;  %v2077_v27 = vpop.f32.mrf.mxu2  ;;  %v2191_v34 = vpop.f32.mrf.mxu3  ;;  %vm7643_vm5 = vcmp.eq.f32.partialorder %v3405_v61, 8.507059e+37  ;;  %v3408_v52 = vor.u32 1.1754944e-38, %v3407_v20  ;;  %4019 = vst [vmem:[%s6851_s5 + $0x60] sm:$0xff] %v3755_v12 }
 0x54f   : > { %v3398_v17 = vsub.f32 1.0, %v3397_v59  ;;  %4740 = vrcp.f32 %v7635_v51  ;;  %vm3402_vm6 = vweird.f32 %v4737_v42  ;;  %v3045_v31 = vmul.f32 %v7536_v57, %v3044_v41 }
 0x550   : > { %3986 = vst [vmem:[%s7018_s10 + $0x58] sm:$0xff] %v3395_v58  ;;  %vm3047_vm7 = vweird.f32 %v7466_v44  ;;  %vm3048_vm8 = vweird.f32 %v7536_v57  ;;  %vm7652_vm9 = vcmp.eq.f32.partialorder %v3051_v6, 8.507059e+37  ;;  %v2540_v63 = vmul.f32 2.0, %v2470_v30  ;;  %vm3403_vm11 = vmor %vm3401_vm3, %vm3402_vm6 }
 0x551   : > { %v3399_v46 = vmul.f32 %v4737_v42, %v3398_v17  ;;  %v2078_v28 = vadd.f32 %v7477_v15, %v2077_v27  ;;  %v7657_v53 = vadd.f32 1.0, %v2603_v38  ;;  %v3046_v37 = vadd.f32 %v7536_v57, %v3045_v31  ;;  %vm3049_vm10 = vmor %vm3047_vm7, %vm3048_vm8 }
 0x552   : > { %v3054_v60 = vor.u32 1.1754944e-38, %v3053_v13  ;;  %v2192_v18 = vadd.f32 %v7555_v3, %v2191_v34  ;;  %v7661_v61 = vpop.eup %4738  ;;  %v2572_v19 = vsub.f32 %v2508_v5, %v2540_v63  ;;  %v3058_v26 = vmul.f32 %v7604_v40, %v7538_v2  ;;  %v7676_v56 = vpop.xlane.xlu1 %3180 }
 0x553   : > { %v3400_v44 = vadd.f32 %v4737_v42, %v3399_v46  ;;  %v2113_v25 = vmax.f32 %v2078_v28, 0.0  ;;  %v3050_v62 = vsel %vm3049_vm10, %v7536_v57, %v3046_v37  ;;  %vm3416_vm12 = vweird.f32 %v7635_v51 }
 0x554   : > { %v3420_v20 = vand.u32 2147483647, %v7635_v51  ;;  %v3422_v36 = vand.u32 2147483648, %v7635_v51  ;;  %3828 = vst.msk [vmem:[%s6897_s3 + $0x68] sm:$0xff] %vm915_vm0, %v2192_v18  ;;  %v3055_v32 = vsel %vm7652_vm9, %v3054_v60, %v3050_v62  ;;  %v2604_v54 = vmax.f32 %v2572_v19, 0.0 }
 0x555   : > { %v4741_v43 = vpop.eup %4740  ;;  %v3404_v7 = vsel %vm3403_vm11, %v4737_v42, %v3400_v44  ;;  %v3059_v45 = vsub.f32 1.0, %v3058_v26  ;;  %2241 = vmatmul.f32.gmra.mxu3 %v2113_v25  ;;  %4742 = vrcp.f32 %v7657_v53  ;;  %v7684_v48 = vsel %vm3119_vm4, %v3055_v32, 0.0  ;;  %v3758_v35 = vpop.f32.mrf.mxu1 }
 0x556   : > { %v3409_v57 = vsel %vm7643_vm5, %v3408_v52, %v3404_v7  ;;  %v3412_v42 = vmul.f32 %v4741_v43, %v7635_v51  ;;  %v2194_v5 = vpop.f32.mrf.mxu3  ;;  %3206 = vadd.xlane.f32.xlu2 %v7684_v48  ;;  %vm3063_vm13 = vweird.f32 %v7604_v40  ;;  %v3066_v59 = vand.u32 2147483647, %v7538_v2  ;;  %v2080_v6 = vpop.f32.mrf.mxu2  ;;  %4020 = vst [vmem:[%s6851_s5 + $0x68] sm:$0xff] %v3758_v35 }
 0x557   : > { %v3410_v9 = vmul.f32 %v3409_v57, %v6768_v0  ;;  %v3060_v50 = vmul.f32 %v7604_v40, %v3059_v45  ;;  %vm7692_vm14 = vcmp.eq.f32.partialorder %v3420_v20, 8.507059e+37  ;;  %v3068_v38 = vand.u32 2147483648, %v7538_v2 }
 0x558   : > { %v3413_v30 = vsub.f32 1.0, %v3412_v42  ;;  %4744 = vrcp.f32 %v7676_v56  ;;  %vm3417_vm15 = vweird.f32 %v4741_v43  ;;  %v7699_v0 = vadd.f32 1.0, %v2604_v54 }
 0x559   : > { %3987 = vst [vmem:[%s7018_s10 + $0x60] sm:$0xff] %v3410_v9  ;;  %v3061_v41 = vadd.f32 %v7604_v40, %v3060_v50  ;;  %vm3062_vm1 = vweird.f32 %v7538_v2  ;;  %v3069_v27 = vor.u32 1.1754944e-38, %v3068_v38  ;;  %v2081_v34 = vadd.f32 %v7477_v15, %v2080_v6  ;;  %vm3418_vm5 = vmor %vm3416_vm12, %vm3417_vm15 }
 0x55a   : > { %v3414_v13 = vmul.f32 %v4741_v43, %v3413_v30  ;;  %vm3064_vm2 = vmor %vm3062_vm1, %vm3063_vm13  ;;  %v2195_v17 = vadd.f32 %v7555_v3, %v2194_v5  ;;  %v3423_v39 = vor.u32 1.1754944e-38, %v3422_v36  ;;  %vm3067_vm3 = vcmp.eq.f32.partialorder %v3066_v59, 8.507059e+37  ;;  %v7708_v46 = vpop.xlane.xlu2 %3182 }
 0x55b   : > { %v3065_v52 = vsel %vm3064_vm2, %v7604_v40, %v3061_v41  ;;  %v3073_v31 = vmul.f32 %v7661_v61, %v7595_v10  ;;  %v7710_v2 = vpop.eup %4742  ;;  %v3435_v37 = vand.u32 2147483647, %v7676_v56  ;;  %v2114_v15 = vmax.f32 %v2081_v34, 0.0 }
 0x55c   : > { %v3415_v63 = vadd.f32 %v4741_v43, %v3414_v13  ;;  %v3070_v28 = vsel %vm3067_vm3, %v3069_v27, %v3065_v52  ;;  %3829 = vst.msk [vmem:[%s6897_s3 + $0x70] sm:$0xff] %vm915_vm0, %v2195_v17  ;;  %4746 = vrcp.f32 %v7699_v0  ;;  %v3437_v60 = vand.u32 2147483648, %v7676_v56  ;;  %v4827_v52 = vld [vmem:[%s5303_s28 + $0xf8] sm:$0xff]  ;;  %s4105_s28 = sshll.u32 %s4102_s17, 4  ;;  %s4106_s28 = int_to_ptr.hbm [resolvable:$true] %s4105_s28 }
 0x55d   : > { %v7721_v40 = vsel %vm3119_vm4, %v3070_v28, 0.0  ;;  %v3074_v18 = vsub.f32 1.0, %v3073_v31  ;;  %vm3078_vm6 = vweird.f32 %v7661_v61  ;;  %v3083_v51 = vand.u32 2147483648, %v7595_v10  ;;  %2244 = vmatmul.f32.gmra.mxu3 %v2114_v15  ;;  %v3761_v59 = vpop.f32.mrf.mxu1  ;;  %s4873_s11 = sshra.s32 %s4106_s28, 4  ;;  %s4874_s11 = int_to_ptr.hbm [resolvable:$true] %s4873_s11 }
 0x55e   : > { %v4745_v44 = vpop.eup %4744  ;;  %v3419_v19 = vsel %vm3418_vm5, %v4741_v43, %v3415_v63  ;;  %3208 = vadd.xlane.f32.xlu0 %v7721_v40  ;;  %4748 = vrcp.f32 %v7708_v46  ;;  %v2197_v25 = vpop.f32.mrf.mxu3  ;;  %v3081_v20 = vand.u32 2147483647, %v7595_v10  ;;  %vm3431_vm7 = vweird.f32 %v7676_v56  ;;  %4021 = vst [vmem:[%s6851_s5 + $0x70] sm:$0xff] %v3761_v59  ;;  %s4875_s12 = scalar_lea.hbm %s4874_s11, 256  ;;  %p4880_p3 = scmp.lt.s32.totalorder %s4874_s11, %s8161_s22 }
 0x55f   : > { %v3424_v26 = vsel %vm7692_vm14, %v3423_v39, %v3419_v19  ;;  %v3427_v12 = vmul.f32 %v4745_v44, %v7676_v56  ;;  %v3075_v62 = vmul.f32 %v7661_v61, %v3074_v18  ;;  %vm7736_vm8 = vcmp.eq.f32.partialorder %v3435_v37, 8.507059e+37  ;;  %p4876_p0 = scmp.ne.s32.totalorder %s4874_s11, %s4875_s12  ;;  %p4881_p4 = scmp.lt.s32.totalorder %s4879_s13, %s4875_s12 }
 0x560   : > { %v3425_v36 = vmul.f32 %v3424_v26, %v6798_v49  ;;  %vm3077_vm9 = vweird.f32 %v7595_v10  ;;  %v2198_v54 = vadd.f32 %v7555_v3, %v2197_v25  ;;  %vm3432_vm10 = vweird.f32 %v4745_v44 }
 0x561   : > { %v3428_v7 = vsub.f32 1.0, %v3427_v12  ;;  %v3076_v32 = vadd.f32 %v7661_v61, %v3075_v62  ;;  %v3438_v45 = vor.u32 1.1754944e-38, %v3437_v60  ;;  %vm3079_vm11 = vmor %vm3077_vm9, %vm3078_vm6  ;;  %v3084_v49 = vor.u32 1.1754944e-38, %v3083_v51  ;;  %p4877_p1 = pnand %p4876_p0, %p5259_p5  ;;  %p4882_p7 = por %p4881_p4, %p4880_p3 }
 0x562   : > { %3988 = vst [vmem:[%s7018_s10 + $0x68] sm:$0xff] %v3425_v36  ;;  %v3088_v57 = vmul.f32 %v7710_v2, %v7657_v53  ;;  %v7748_v42 = vpop.xlane.xlu0 %3184  ;;  %v7750_v5 = vpop.eup %4746  ;;  %vm3082_vm12 = vcmp.eq.f32.partialorder %v3081_v20, 8.507059e+37  ;;  %v3450_v50 = vand.u32 2147483647, %v7708_v46  ;;  %vm3446_vm13 = vweird.f32 %v7708_v46  ;;  %vm3433_vm14 = vmor %vm3431_vm7, %vm3432_vm10 }
 0x563   : > { %v3429_v9 = vmul.f32 %v4745_v44, %v3428_v7  ;;  %v3080_v10 = vsel %vm3079_vm11, %v7661_v61, %v3076_v32  ;;  %3830 = vst.msk [vmem:[%s6897_s3 + $0x78] sm:$0xff] %vm915_vm0, %v2198_v54  ;;  %4750 = vrcp.f32 %v7748_v42  ;;  %v3098_v13 = vand.u32 2147483648, %v7657_v53  ;;  %p4878_p2 = pneg %p4877_p1 }
 0x564   : > { %v4749_v6 = vpop.eup %4748  ;;  %v3085_v30 = vsel %vm3082_vm12, %v3084_v49, %v3080_v10  ;;  %v3089_v58 = vsub.f32 1.0, %v3088_v57  ;;  %v3452_v27 = vand.u32 2147483648, %v7708_v46  ;;  %vm3093_vm15 = vweird.f32 %v7710_v2 }
 0x565   : > { %v3430_v38 = vadd.f32 %v4745_v44, %v3429_v9  ;;  %v7761_v41 = vsel %vm3119_vm4, %v3085_v30, 0.0  ;;  %v3442_v61 = vmul.f32 %v4749_v6, %v7708_v46  ;;  %v3096_v17 = vand.u32 2147483647, %v7657_v53  ;;  %4511 = vmatmul.msk.f32.vlgmr.msrb.gmra.mxu3 %vm915_vm0, %v4827_v52  ;;  %v3764_v20 = vpop.f32.mrf.mxu1  ;;  %p4883_p8 = pnand %p4882_p7, %p4878_p2 }
 0x566   : > { %3210 = vadd.xlane.f32.xlu1 %v7761_v41  ;;  %v3090_v34 = vmul.f32 %v7710_v2, %v3089_v58  ;;  %v2200_v39 = vpop.f32.mrf.mxu3  ;;  %vm7775_vm1 = vcmp.eq.f32.partialorder %v3450_v50, 8.507059e+37  ;;  %vm3092_vm2 = vweird.f32 %v7657_v53  ;;  %v3103_v15 = vmul.f32 %v7750_v5, %v7699_v0  ;;  %4022 = vst [vmem:[%s6851_s5 + $0x78] sm:$0xff] %v3764_v20 }
 0x567   : > { %v3434_v31 = vsel %vm3433_vm14, %v4745_v44, %v3430_v38  ;;  %v3443_v35 = vsub.f32 1.0, %v3442_v61  ;;  %v2201_v37 = vadd.f32 %v7555_v3, %v2200_v39  ;;  %vm3447_vm3 = vweird.f32 %v4749_v6  ;;  %vm3094_vm5 = vmor %vm3092_vm2, %vm3093_vm15 }
 0x568   : > { %v3439_v63 = vsel %vm7736_vm8, %v3438_v45, %v3434_v31  ;;  %v3091_v28 = vadd.f32 %v7710_v2, %v3090_v34  ;;  %v3099_v44 = vor.u32 1.1754944e-38, %v3098_v13  ;;  %v3453_v19 = vor.u32 1.1754944e-38, %v3452_v27  ;;  %vm3448_vm8 = vmor %vm3446_vm13, %vm3447_vm3 }
 0x569   : > { %v3440_v60 = vmul.f32 %v3439_v63, %v6828_v33  ;;  %v3444_v18 = vmul.f32 %v4749_v6, %v3443_v35  ;;  %v4751_v53 = vpop.eup %4750  ;;  %vm3097_vm6 = vcmp.eq.f32.partialorder %v3096_v17, 8.507059e+37  ;;  %3831 = vst.msk [vmem:[%s6897_s3 + $0x80] sm:$0xff] %vm915_vm0, %v2201_v37  ;;  %v3104_v25 = vsub.f32 1.0, %v3103_v15 }
 0x56a   : > { %v3095_v51 = vsel %vm3094_vm5, %v7710_v2, %v3091_v28  ;;  %v3457_v33 = vmul.f32 %v4751_v53, %v7748_v42  ;;  %vm3108_vm7 = vweird.f32 %v7750_v5  ;;  %v7795_v62 = vpop.xlane.xlu1 %3186  ;;  %v3111_v43 = vand.u32 2147483647, %v7699_v0 }
 0x56b   : > { %3989 = vst [vmem:[%s7018_s10 + $0x70] sm:$0xff] %v3440_v60  ;;  %v3445_v26 = vadd.f32 %v4749_v6, %v3444_v18  ;;  %v3100_v12 = vsel %vm3097_vm6, %v3099_v44, %v3095_v51  ;;  %v3105_v36 = vmul.f32 %v7750_v5, %v3104_v25  ;;  %v3113_v7 = vand.u32 2147483648, %v7699_v0 }
 0x56c   : > { %v7802_v2 = vsel %vm3119_vm4, %v3100_v12, 0.0  ;;  %v3458_v54 = vsub.f32 1.0, %v3457_v33  ;;  %v3465_v45 = vand.u32 2147483647, %v7748_v42  ;;  %4752 = vrcp.f32 %v7795_v62 }
 0x56d   : > { %v3449_v32 = vsel %vm3448_vm8, %v4749_v6, %v3445_v26  ;;  %3212 = vadd.xlane.f32.xlu2 %v7802_v2  ;;  %v3467_v49 = vand.u32 2147483648, %v7748_v42  ;;  %v3106_v57 = vadd.f32 %v7750_v5, %v3105_v36  ;;  %vm3107_vm9 = vweird.f32 %v7699_v0  ;;  %v3767_v13 = vpop.f32.mrf.mxu1 }
 0x56e   : > { %v3454_v46 = vsel %vm7775_vm1, %v3453_v19, %v3449_v32  ;;  %v2203_v9 = vpop.f32.mrf.mxu3  ;;  %v3459_v50 = vmul.f32 %v4751_v53, %v3458_v54  ;;  %vm3462_vm10 = vweird.f32 %v4751_v53  ;;  %vm3109_vm11 = vmor %vm3107_vm9, %vm3108_vm7  ;;  %v3114_v59 = vor.u32 1.1754944e-38, %v3113_v7  ;;  %4023 = vst [vmem:[%s6851_s5 + $0x80] sm:$0xff] %v3767_v13 }
 0x56f   : > { %v3455_v10 = vmul.f32 %v3454_v46, %v6901_v24  ;;  %v3110_v6 = vsel %vm3109_vm11, %v7750_v5, %v3106_v57  ;;  %vm3112_vm12 = vcmp.eq.f32.partialorder %v3111_v43, 8.507059e+37  ;;  %v2204_v30 = vadd.f32 %v7555_v3, %v2203_v9 }
 0x570   : > { %v3460_v58 = vadd.f32 %v4751_v53, %v3459_v50  ;;  %vm3461_vm13 = vweird.f32 %v7748_v42  ;;  %v3115_v0 = vsel %vm3112_vm12, %v3114_v59, %v3110_v6  ;;  %v3468_v38 = vor.u32 1.1754944e-38, %v3467_v49 }
 0x571   : > { %3990 = vst [vmem:[%s7018_s10 + $0x78] sm:$0xff] %v3455_v10  ;;  %vm3463_vm14 = vmor %vm3461_vm13, %vm3462_vm10  ;;  %v7825_v24 = vsel %vm3119_vm4, %v3115_v0, 0.0  ;;  %vm3466_vm15 = vcmp.eq.f32.partialorder %v3465_v45, 8.507059e+37  ;;  %v3482_v52 = vand.u32 2147483648, %v7795_v62  ;;  %v3480_v56 = vand.u32 2147483647, %v7795_v62 }
 0x572   : > { %3832 = vst.msk [vmem:[%s6897_s3 + $0x88] sm:$0xff] %vm915_vm0, %v2204_v30  ;;  %v4753_v61 = vpop.eup %4752  ;;  %v3464_v5 = vsel %vm3463_vm14, %v4751_v53, %v3460_v58  ;;  %3214 = vadd.xlane.f32.xlu0 %v7825_v24  ;;  %vm3476_vm1 = vweird.f32 %v7795_v62 }
 0x573   : > { %v3469_v27 = vsel %vm3466_vm15, %v3468_v38, %v3464_v5  ;;  %v3472_v42 = vmul.f32 %v4753_v61, %v7795_v62  ;;  %v7833_v34 = vpop.xlane.xlu2 %3188  ;;  %vm3477_vm4 = vweird.f32 %v4753_v61  ;;  %v3483_v63 = vor.u32 1.1754944e-38, %v3482_v52 }
 0x574   : > { %v3470_v55 = vmul.f32 %v3469_v27, %v6962_v8  ;;  %4754 = vrcp.f32 %v7833_v34  ;;  %vm3478_vm2 = vmor %vm3476_vm1, %vm3477_vm4  ;;  %vm3481_vm3 = vcmp.eq.f32.partialorder %v3480_v56, 8.507059e+37 }
 0x575   : > { %v3473_v17 = vsub.f32 1.0, %v3472_v42  ;;  %v3770_v28 = vpop.f32.mrf.mxu1 }
 0x576   : > { %v2206_v39 = vpop.f32.mrf.mxu3  ;;  %3991 = vst [vmem:[%s7018_s10 + $0x80] sm:$0xff] %v3470_v55 }
 0x577   : > { %v2207_v31 = vadd.f32 %v7555_v3, %v2206_v39  ;;  %v3474_v35 = vmul.f32 %v4753_v61, %v3473_v17  ;;  %4024 = vst [vmem:[%s6851_s5 + $0x88] sm:$0xff] %v3770_v28 }
 0x579   : > { %3833 = vst.msk [vmem:[%s6897_s3 + $0x90] sm:$0xff] %vm915_vm0, %v2207_v31  ;;  %v3475_v8 = vadd.f32 %v4753_v61, %v3474_v35 }
 0x57a   : > { %v4755_v37 = vpop.eup %4754 }
 0x57b   : > { %v3479_v15 = vsel %vm3478_vm2, %v4753_v61, %v3475_v8  ;;  %v3487_v18 = vmul.f32 %v4755_v37, %v7833_v34 }
 0x57c   : > { %v3484_v60 = vsel %vm3481_vm3, %v3483_v63, %v3479_v15  ;;  %v7853_v44 = vpop.xlane.xlu0 %3190 }
 0x57d   : > { %v3485_v53 = vmul.f32 %v3484_v60, %v7031_v14  ;;  %4756 = vrcp.f32 %v7853_v44  ;;  %v3488_v51 = vsub.f32 1.0, %v3487_v18 }
 0x57e   : > { %v2209_v19 = vpop.f32.mrf.mxu3 }
 0x57f   : > { %v2210_v25 = vadd.f32 %v7555_v3, %v2209_v19 }
 0x580   : > { %4886 = shalt.err (!%p4883_p8)
}
 0x581   : > { %s8186_s1 = smov 128   ;;  %s8188_s18 = smov 8   ;;  %3992 = vst [vmem:[%s7018_s10 + $0x88] sm:$0xff] %v3485_v53  ;;  %v3497_v14 = vand.u32 2147483648, %v7833_v34  ;;  %v3489_v26 = vmul.f32 %v4755_v37, %v3488_v51  ;;  %vm3492_vm5 = vweird.f32 %v4755_v37  ;;  %v3495_v12 = vand.u32 2147483647, %v7833_v34  ;;  %v3773_v54 = vpop.f32.mrf.mxu1 }
 0x582   : > { %4571 = dma.vmem_to_hbm [thread:$0]  (%p5259_p5), %s4104_s7, 4096, %s4106_s28, %s7861_s29, %s8186_s1, %s8186_s1, %s8188_s18   ;;  %vm3491_vm6 = vweird.f32 %v7833_v34 }
 0x583   : > { %s4119_s13 = scalar_lea.hbm %s8162_s23, %s7845_s9  ;;  %3834 = vst.msk [vmem:[%s6897_s3 + $0x98] sm:$0xff] %vm915_vm0, %v2210_v25  ;;  %v3490_v33 = vadd.f32 %v4755_v37, %v3489_v26  ;;  %s4136_s7 = scalar_lea.hbm %s8163_s24, %s7845_s9  ;;  %v7893_v62 = vpop.eup %4756  ;;  %vm3493_vm7 = vmor %vm3491_vm6, %vm3492_vm5  ;;  %v3498_v20 = vor.u32 1.1754944e-38, %v3497_v14  ;;  %vm3496_vm8 = vcmp.eq.f32.partialorder %v3495_v12, 8.507059e+37 }
 0x584   : > { %s7886_s14 = sshll.u32 %s4119_s13, 4  ;;  %s4137_s0 = sshll.u32 %s6005_s6, 4  ;;  %v3502_v43 = vmul.f32 %v7893_v62, %v7853_v44  ;;  %s4138_s0 = int_to_ptr.vmem [resolvable:$true] %s4137_s0  ;;  %s4123_s14 = int_to_ptr.hbm [resolvable:$true] %s7886_s14 }
 0x585   : > { %s4139_s17 = sshll.u32 %s4136_s7, 4  ;;  %v3494_v36 = vsel %vm3493_vm7, %v4755_v37, %v3490_v33  ;;  %s8285_s11 = sand.u32 1, %s5240_s8   ;;  %s4140_s17 = int_to_ptr.hbm [resolvable:$true] %s4139_s17 }
 0x586   : > { %v3499_v7 = vsel %vm3496_vm8, %v3498_v20, %v3494_v36  ;;  %v2212_v32 = vpop.f32.mrf.mxu3  ;;  %s7900_s12 = scalar_lea.sflag [#allocation10], %s8285_s11  ;;  %s4901_s13 = sshra.s32 %s4140_s17, 4  ;;  %s4902_s13 = int_to_ptr.hbm [resolvable:$true] %s4901_s13 }
 0x587   : > { %s4903_s15 = scalar_lea.hbm %s4902_s13, 256  ;;  %s4907_s7 = scalar_lea.hbm %s8163_s24, 512 }
 0x588   : > { %p4904_p9 = scmp.ne.s32.totalorder %s4902_s13, %s4903_s15  ;;  %p4908_p12 = scmp.lt.s32.totalorder %s4902_s13, %s8163_s24 }
 0x589   : > { %p4909_p13 = scmp.lt.s32.totalorder %s4907_s7, %s4903_s15 }
 0x58a   : > { %p4905_p10 = pnand %p4904_p9, %p5259_p5 }
 0x58b   : > { %p4910_p0 = por %p4909_p13, %p4908_p12 }
 0x58c   : > { %p4906_p11 = pneg %p4905_p10 }
 0x58e   : > { %p4911_p1 = pnand %p4910_p0, %p4906_p11 }
 0x590   : > { %4914 = shalt.err (!%p4911_p1)
}
 0x591   : > { %s8286_s8 = smov 8   ;;  %s8287_s11 = smov 128   ;;  %v3500_v45 = vmul.f32 %v3499_v7, %v7104_v11  ;;  %v3503_v46 = vsub.f32 1.0, %v3502_v43  ;;  %v7917_v49 = vpop.xlane.xlu1 %3192  ;;  %v2213_v57 = vadd.f32 %v7555_v3, %v2212_v32  ;;  %4025 = vst [vmem:[%s6851_s5 + $0x90] sm:$0xff] %v3773_v54  ;;  %v3512_v9 = vand.u32 2147483648, %v7853_v44 }
 0x592   : > { %4573 = dma.vmem_to_hbm [thread:$0]  (%p5259_p5), %s4138_s0, 4096, %s4140_s17, %s7900_s12, %s8287_s11, %s8287_s11, %s8286_s8   ;;  %4758 = vrcp.f32 %v7917_v49  ;;  %vm3507_vm9 = vweird.f32 %v7893_v62  ;;  %v3510_v10 = vand.u32 2147483647, %v7853_v44  ;;  %vm3506_vm10 = vweird.f32 %v7853_v44 }
 0x593   : > { %s4085_s13 = scalar_lea.hbm %s8160_s21, %s7845_s9  ;;  %s4086_s0 = sshll.u32 %s5411_s4, 4  ;;  %3993 = vst [vmem:[%s7018_s10 + $0x90] sm:$0xff] %v3500_v45  ;;  %v3504_v11 = vmul.f32 %v7893_v62, %v3503_v46  ;;  %s4087_s0 = int_to_ptr.vmem [resolvable:$true] %s4086_s0 }
 0x594   : > { %s7928_s17 = sshll.u32 %s4085_s13, 4  ;;  %3835 = vst.msk [vmem:[%s6897_s3 + $0xa0] sm:$0xff] %vm915_vm0, %v2213_v57  ;;  %s4120_s15 = sshll.u32 %s5882_s30, 4  ;;  %s4089_s17 = int_to_ptr.hbm [resolvable:$true] %s7928_s17  ;;  %s4121_s15 = int_to_ptr.vmem [resolvable:$true] %s4120_s15 }
 0x595   : > { %v3505_v50 = vadd.f32 %v7893_v62, %v3504_v11  ;;  %s4045_s4 = scalar_lea.sflag [#allocation4], %s5394_s27  ;;  %s4929_s6 = sshra.s32 %s4089_s17, 4  ;;  %s4930_s6 = int_to_ptr.hbm [resolvable:$true] %s4929_s6 }
 0x596   : > { %s4931_s28 = scalar_lea.hbm %s4930_s6, 256  ;;  %s4935_s1 = scalar_lea.hbm %s8160_s21, 512 }
 0x597   : > { %p4932_p2 = scmp.ne.s32.totalorder %s4930_s6, %s4931_s28  ;;  %p4936_p7 = scmp.lt.s32.totalorder %s4930_s6, %s8160_s21 }
 0x598   : > { %p4937_p8 = scmp.lt.s32.totalorder %s4935_s1, %s4931_s28 }
 0x599   : > { %p4933_p3 = pnand %p4932_p2, %p5259_p5 }
 0x59a   : > { %p4938_p9 = por %p4937_p8, %p4936_p7 }
 0x59b   : > { %p4934_p4 = pneg %p4933_p3 }
 0x59d   : > { %p4939_p10 = pnand %p4938_p9, %p4934_p4 }
 0x59f   : > { %4942 = shalt.err (!%p4939_p10)
}
 0x5a0   : > { %4570 = dma.vmem_to_hbm [thread:$0]  (%p5259_p5), %s4087_s0, 4096, %s4089_s17, %s4045_s4, %s8287_s11, %s8287_s11, %s8286_s8   ;;  %vm7959_vm11 = vmor %vm3506_vm10, %vm3507_vm9  ;;  %v3513_v6 = vor.u32 1.1754944e-38, %v3512_v9  ;;  %vm3511_vm12 = vcmp.eq.f32.partialorder %v3510_v10, 8.507059e+37 }
 0x5a1   : > { %v3509_v30 = vsel %vm7959_vm11, %v7893_v62, %v3505_v50  ;;  %s4957_s19 = sshra.s32 %s4123_s14, 4  ;;  %s4963_s4 = scalar_lea.hbm %s8162_s23, 512  ;;  %s4958_s19 = int_to_ptr.hbm [resolvable:$true] %s4957_s19 }
 0x5a2   : > { %s4959_s30 = scalar_lea.hbm %s4958_s19, 256  ;;  %p4964_p0 = scmp.lt.s32.totalorder %s4958_s19, %s8162_s23 }
 0x5a3   : > { %p4960_p11 = scmp.ne.s32.totalorder %s4958_s19, %s4959_s30  ;;  %p4965_p1 = scmp.lt.s32.totalorder %s4963_s4, %s4959_s30 }
 0x5a5   : > { %p4961_p12 = pnand %p4960_p11, %p5259_p5  ;;  %p4966_p2 = por %p4965_p1, %p4964_p0 }
 0x5a7   : > { %p4962_p13 = pneg %p4961_p12 }
 0x5a9   : > { %p4967_p3 = pnand %p4966_p2, %p4962_p13 }
 0x5ab   : > { %4970 = shalt.err (!%p4967_p3)
}
 0x5ac   : > { %4572 = dma.vmem_to_hbm [thread:$0]  (%p5259_p5), %s4121_s15, 4096, %s4123_s14, %s7861_s29, %s8287_s11, %s8287_s11, %s8286_s8   ;;  %v4759_v58 = vpop.eup %4758  ;;  %v3514_v0 = vsel %vm3511_vm12, %v3513_v6, %v3509_v30  ;;  %v2215_v38 = vpop.f32.mrf.mxu3  ;;  %v3527_v55 = vand.u32 2147483648, %v7917_v49  ;;  %v3525_v39 = vand.u32 2147483647, %v7917_v49  ;;  %vm3521_vm14 = vweird.f32 %v7917_v49 }
 0x5ad   : > { %v3515_v61 = vmul.f32 %v3514_v0, %v7160_v23  ;;  %v3517_v5 = vmul.f32 %v4759_v58, %v7917_v49  ;;  %v2216_v13 = vadd.f32 %v7555_v3, %v2215_v38  ;;  %v3776_v27 = vpop.f32.mrf.mxu1  ;;  %v3195_v34 = vpop.xlane.xlu2 %3194  ;;  %vm3522_vm13 = vweird.f32 %v4759_v58  ;;  %s4170_s18 = scalar_lea.hbm %s8165_s26, %s7845_s9  ;;  %s4171_s1 = sshll.u32 %s6851_s5, 4  ;;  %s4172_s1 = int_to_ptr.vmem [resolvable:$true] %s4171_s1 }
 0x5ae   : > { %4026 = vst [vmem:[%s6851_s5 + $0x98] sm:$0xff] %v3776_v27  ;;  %4760 = vrcp.f32 %v3195_v34  ;;  %vm3523_vm15 = vmor %vm3521_vm14, %vm3522_vm13  ;;  %v3528_v52 = vor.u32 1.1754944e-38, %v3527_v55  ;;  %vm3526_vm4 = vcmp.eq.f32.partialorder %v3525_v39, 8.507059e+37  ;;  %v3197_v60 = vpop.xlane.xlu0 %3196  ;;  %v3542_v44 = vand.u32 2147483648, %v3195_v34  ;;  %v3199_v43 = vpop.xlane.xlu1 %3198  ;;  %s8063_s13 = sshll.u32 %s4170_s18, 4  ;;  %s4991_s4 = scalar_lea.hbm %s8165_s26, 512  ;;  %s4174_s13 = int_to_ptr.hbm [resolvable:$true] %s8063_s13 }
 0x5af   : > { %3994 = vst [vmem:[%s7018_s10 + $0x98] sm:$0xff] %v3515_v61  ;;  %v3518_v42 = vsub.f32 1.0, %v3517_v5  ;;  %4762 = vrcp.f32 %v3197_v60  ;;  %v3540_v19 = vand.u32 2147483647, %v3195_v34  ;;  %vm3536_vm2 = vweird.f32 %v3195_v34  ;;  %s4985_s19 = sshra.s32 %s4174_s13, 4  ;;  %s4986_s19 = int_to_ptr.hbm [resolvable:$true] %s4985_s19 }
 0x5b0   : > { %3836 = vst.msk [vmem:[%s6897_s3 + $0xa8] sm:$0xff] %vm915_vm0, %v2216_v13  ;;  %v3543_v26 = vor.u32 1.1754944e-38, %v3542_v44  ;;  %4764 = vrcp.f32 %v3199_v43  ;;  %v3557_v32 = vand.u32 2147483648, %v3197_v60  ;;  %v3555_v46 = vand.u32 2147483647, %v3197_v60  ;;  %s4987_s30 = scalar_lea.hbm %s4986_s19, 256  ;;  %p4992_p9 = scmp.lt.s32.totalorder %s4986_s19, %s8165_s26 }
 0x5b1   : > { %v3519_v17 = vmul.f32 %v4759_v58, %v3518_v42  ;;  %vm3541_vm5 = vcmp.eq.f32.partialorder %v3540_v19, 8.507059e+37  ;;  %vm3551_vm7 = vweird.f32 %v3197_v60  ;;  %v3572_v0 = vand.u32 2147483648, %v3199_v43  ;;  %p4988_p4 = scmp.ne.s32.totalorder %s4986_s19, %s4987_s30  ;;  %p4993_p10 = scmp.lt.s32.totalorder %s4991_s4, %s4987_s30 }
 0x5b2   : > { %vm3556_vm9 = vcmp.eq.f32.partialorder %v3555_v46, 8.507059e+37  ;;  %v3570_v13 = vand.u32 2147483647, %v3199_v43  ;;  %vm3566_vm11 = vweird.f32 %v3199_v43 }
 0x5b3   : > { %v3520_v23 = vadd.f32 %v4759_v58, %v3519_v17  ;;  %p4989_p7 = pnand %p4988_p4, %p5259_p5  ;;  %p4994_p11 = por %p4993_p10, %p4992_p9 }
 0x5b4   : > { %v2218_v31 = vpop.f32.mrf.mxu3  ;;  %v4761_v28 = vpop.eup %4760  ;;  %vm3571_vm13 = vcmp.eq.f32.partialorder %v3570_v13, 8.507059e+37 }
 0x5b5   : > { %v3524_v35 = vsel %vm3523_vm15, %v4759_v58, %v3520_v23  ;;  %v2219_v56 = vadd.f32 %v7555_v3, %v2218_v31  ;;  %v3779_v63 = vpop.f32.mrf.mxu1  ;;  %v3532_v15 = vmul.f32 %v4761_v28, %v3195_v34  ;;  %vm3537_vm1 = vweird.f32 %v4761_v28  ;;  %v4763_v12 = vpop.eup %4762  ;;  %p4990_p8 = pneg %p4989_p7 }
 0x5b6   : > { %v3529_v8 = vsel %vm3526_vm4, %v3528_v52, %v3524_v35  ;;  %4027 = vst [vmem:[%s6851_s5 + $0xa0] sm:$0xff] %v3779_v63  ;;  %vm3538_vm3 = vmor %vm3536_vm2, %vm3537_vm1  ;;  %v3547_v20 = vmul.f32 %v4763_v12, %v3197_v60  ;;  %vm3552_vm6 = vweird.f32 %v4763_v12  ;;  %v4765_v11 = vpop.eup %4764  ;;  %v3201_v38 = vpop.xlane.xlu2 %3200 }
 0x5b7   : > { %v3530_v37 = vmul.f32 %v3529_v8, %v7236_v22  ;;  %3837 = vst.msk [vmem:[%s6897_s3 + $0xb0] sm:$0xff] %vm915_vm0, %v2219_v56  ;;  %v3533_v18 = vsub.f32 1.0, %v3532_v15  ;;  %vm3553_vm8 = vmor %vm3551_vm7, %vm3552_vm6  ;;  %v3562_v59 = vmul.f32 %v4765_v11, %v3199_v43  ;;  %vm3567_vm10 = vweird.f32 %v4765_v11  ;;  %v3203_v31 = vpop.xlane.xlu0 %3202  ;;  %p4995_p12 = pnand %p4994_p11, %p4990_p8 }
 0x5b8   : > { %v3548_v7 = vsub.f32 1.0, %v3547_v20  ;;  %4766 = vrcp.f32 %v3201_v38  ;;  %vm3568_vm12 = vmor %vm3566_vm11, %vm3567_vm10  ;;  %v3587_v63 = vand.u32 2147483648, %v3201_v38  ;;  %vm3581_vm15 = vweird.f32 %v3201_v38 }
 0x5b9   : > { %3995 = vst [vmem:[%s7018_s10 + $0xa0] sm:$0xff] %v3530_v37  ;;  %v3534_v53 = vmul.f32 %v4761_v28, %v3533_v18  ;;  %v3563_v30 = vsub.f32 1.0, %v3562_v59  ;;  %4768 = vrcp.f32 %v3203_v31  ;;  %v3585_v37 = vand.u32 2147483647, %v3201_v38 }
 0x5ba   : > { %v3549_v45 = vmul.f32 %v4763_v12, %v3548_v7  ;;  %v3588_v60 = vor.u32 1.1754944e-38, %v3587_v63 }
 0x5bb   : > { %v3535_v14 = vadd.f32 %v4761_v28, %v3534_v53  ;;  %v3564_v5 = vmul.f32 %v4765_v11, %v3563_v30  ;;  %vm3586_vm1 = vcmp.eq.f32.partialorder %v3585_v37, 8.507059e+37 }
 0x5bc   : > { %v2221_v51 = vpop.f32.mrf.mxu3  ;;  %v3550_v9 = vadd.f32 %v4763_v12, %v3549_v45 }
 0x5bd   : > { %v2222_v25 = vadd.f32 %v7555_v3, %v2221_v51  ;;  %v3782_v22 = vpop.f32.mrf.mxu1  ;;  %v3539_v33 = vsel %vm3538_vm3, %v4761_v28, %v3535_v14  ;;  %v3565_v42 = vadd.f32 %v4765_v11, %v3564_v5  ;;  %vm3596_vm3 = vweird.f32 %v3203_v31 }
 0x5be   : > { %4028 = vst [vmem:[%s6851_s5 + $0xa8] sm:$0xff] %v3782_v22  ;;  %v3544_v62 = vsel %vm3541_vm5, %v3543_v26, %v3539_v33  ;;  %v3554_v10 = vsel %vm3553_vm8, %v4763_v12, %v3550_v9  ;;  %v4767_v17 = vpop.eup %4766  ;;  %v3602_v12 = vand.u32 2147483648, %v3203_v31 }
 0x5bf   : > { %3838 = vst.msk [vmem:[%s6897_s3 + $0xb8] sm:$0xff] %vm915_vm0, %v2222_v25  ;;  %v3545_v36 = vmul.f32 %v3544_v62, %v7307_v29  ;;  %v3558_v29 = vor.u32 1.1754944e-38, %v3557_v32  ;;  %v3569_v55 = vsel %vm3568_vm12, %v4765_v11, %v3565_v42  ;;  %v3577_v52 = vmul.f32 %v4767_v17, %v3201_v38  ;;  %v3205_v19 = vpop.xlane.xlu1 %3204 }
 0x5c0   : > { %vm3582_vm14 = vweird.f32 %v4767_v17  ;;  %4770 = vrcp.f32 %v3205_v19  ;;  %v3600_v62 = vand.u32 2147483647, %v3203_v31  ;;  %v3617_v9 = vand.u32 2147483648, %v3205_v19 }
 0x5c1   : > { %3996 = vst [vmem:[%s7018_s10 + $0xa8] sm:$0xff] %v3545_v36  ;;  %v3559_v50 = vsel %vm3556_vm9, %v3558_v29, %v3554_v10  ;;  %v3578_v8 = vsub.f32 1.0, %v3577_v52  ;;  %vm3583_vm4 = vmor %vm3581_vm15, %vm3582_vm14  ;;  %v3615_v10 = vand.u32 2147483647, %v3205_v19  ;;  %vm3611_vm8 = vweird.f32 %v3205_v19 }
 0x5c2   : > { %v3560_v6 = vmul.f32 %v3559_v50, %v7366_v1  ;;  %v3573_v1 = vor.u32 1.1754944e-38, %v3572_v0  ;;  %vm3601_vm6 = vcmp.eq.f32.partialorder %v3600_v62, 8.507059e+37  ;;  %v3618_v50 = vor.u32 1.1754944e-38, %v3617_v9 }
 0x5c3   : > { %v3579_v28 = vmul.f32 %v4767_v17, %v3578_v8  ;;  %vm3616_vm10 = vcmp.eq.f32.partialorder %v3615_v10, 8.507059e+37 }
 0x5c4   : > { %v2224_v54 = vpop.f32.mrf.mxu3  ;;  %3997 = vst [vmem:[%s7018_s10 + $0xb0] sm:$0xff] %v3560_v6  ;;  %v3574_v34 = vsel %vm3571_vm13, %v3573_v1, %v3569_v55 }
 0x5c5   : > { %v2225_v49 = vadd.f32 %v7555_v3, %v2224_v54  ;;  %v3785_v57 = vpop.f32.mrf.mxu1  ;;  %v3575_v39 = vmul.f32 %v3574_v34, %v7422_v16  ;;  %v3580_v15 = vadd.f32 %v4767_v17, %v3579_v28  ;;  %v4769_v16 = vpop.eup %4768 }
 0x5c6   : > { %4029 = vst [vmem:[%s6851_s5 + $0xb0] sm:$0xff] %v3785_v57  ;;  %v3592_v53 = vmul.f32 %v4769_v16, %v3203_v31  ;;  %vm3597_vm2 = vweird.f32 %v4769_v16  ;;  %v4771_v36 = vpop.eup %4770 }
 0x5c7   : > { %3839 = vst.msk [vmem:[%s6897_s3 + $0xc0] sm:$0xff] %vm915_vm0, %v2225_v49  ;;  %v3584_v44 = vsel %vm3583_vm4, %v4767_v17, %v3580_v15  ;;  %vm3598_vm5 = vmor %vm3596_vm3, %vm3597_vm2  ;;  %v3607_v7 = vmul.f32 %v4771_v36, %v3205_v19  ;;  %v8032_v49 = vld [vmem:[%s8155_s16] ss:$0 sm:$0xff]  ;;  %vm3612_vm7 = vweird.f32 %v4771_v36 }
 0x5c8   : > { %3998 = vst [vmem:[%s7018_s10 + $0xb8] sm:$0xff] %v3575_v39  ;;  %v3589_v25 = vsel %vm3586_vm1, %v3588_v60, %v3584_v44  ;;  %v3593_v26 = vsub.f32 1.0, %v3592_v53  ;;  %vm3613_vm9 = vmor %vm3611_vm8, %vm3612_vm7 }
 0x5c9   : > { %v3590_v22 = vmul.f32 %v3589_v25, %v7517_v4  ;;  %v3608_v46 = vsub.f32 1.0, %v3607_v7  ;;  %v3207_v29 = vpop.xlane.xlu2 %3206 }
 0x5ca   : > { %v3594_v33 = vmul.f32 %v4769_v16, %v3593_v26  ;;  %4772 = vrcp.f32 %v3207_v29  ;;  %v3632_v42 = vand.u32 2147483648, %v3207_v29  ;;  %v3630_v55 = vand.u32 2147483647, %v3207_v29 }
 0x5cb   : > { %3999 = vst [vmem:[%s7018_s10 + $0xc0] sm:$0xff] %v3590_v22  ;;  %v3609_v11 = vmul.f32 %v4771_v36, %v3608_v46  ;;  %vm3626_vm12 = vweird.f32 %v3207_v29 }
 0x5cc   : > { %v2227_v58 = vpop.f32.mrf.mxu3  ;;  %v3595_v20 = vadd.f32 %v4769_v16, %v3594_v33  ;;  %vm3631_vm14 = vcmp.eq.f32.partialorder %v3630_v55, 8.507059e+37 }
 0x5cd   : > { %v2228_v61 = vadd.f32 %v7555_v3, %v2227_v58  ;;  %v3788_v27 = vpop.f32.mrf.mxu1 }
 0x5ce   : > { %4030 = vst [vmem:[%s6851_s5 + $0xb8] sm:$0xff] %v3788_v27  ;;  %v3599_v43 = vsel %vm3598_vm5, %v4769_v16, %v3595_v20 }
 0x5cf   : > { %3840 = vst.msk [vmem:[%s6897_s3 + $0xc8] sm:$0xff] %vm915_vm0, %v2228_v61 }
 0x5d0   : > { %v4773_v0 = vpop.eup %4772 }
 0x5d1   : > { %v3209_v61 = vpop.xlane.xlu0 %3208  ;;  %v3622_v13 = vmul.f32 %v4773_v0, %v3207_v29  ;;  %vm3627_vm11 = vweird.f32 %v4773_v0 }
 0x5d2   : > { %4774 = vrcp.f32 %v3209_v61  ;;  %vm3628_vm13 = vmor %vm3626_vm12, %vm3627_vm11  ;;  %v3647_v37 = vand.u32 2147483648, %v3209_v61  ;;  %v3645_v16 = vand.u32 2147483647, %v3209_v61  ;;  %vm3641_vm4 = vweird.f32 %v3209_v61 }
 0x5d3   : > { %v3623_v27 = vsub.f32 1.0, %v3622_v13 }
 0x5d4   : > { %v2230_v23 = vpop.f32.mrf.mxu3  ;;  %v3648_v44 = vor.u32 1.1754944e-38, %v3647_v37  ;;  %vm3646_vm2 = vcmp.eq.f32.partialorder %v3645_v16, 8.507059e+37 }
 0x5d5   : > { %v2231_v35 = vadd.f32 %v7555_v3, %v2230_v23  ;;  %v3791_v56 = vpop.f32.mrf.mxu1  ;;  %v3624_v1 = vmul.f32 %v4773_v0, %v3623_v27  ;;  %v3633_v23 = vor.u32 1.1754944e-38, %v3632_v42 }
 0x5d6   : > { %4031 = vst [vmem:[%s6851_s5 + $0xc0] sm:$0xff] %v3791_v56 }
 0x5d7   : > { %3841 = vst.msk [vmem:[%s6897_s3 + $0xd0] sm:$0xff] %vm915_vm0, %v2231_v35  ;;  %v3625_v17 = vadd.f32 %v4773_v0, %v3624_v1 }
 0x5d8   : > { %v4775_v34 = vpop.eup %4774 }
 0x5d9   : > { %v3637_v52 = vmul.f32 %v4775_v34, %v3209_v61  ;;  %v3211_v31 = vpop.xlane.xlu1 %3210  ;;  %v3629_v56 = vsel %vm3628_vm13, %v4773_v0, %v3625_v17  ;;  %vm3642_vm15 = vweird.f32 %v4775_v34 }
 0x5da   : > { %4776 = vrcp.f32 %v3211_v31  ;;  %v3634_v8 = vsel %vm3631_vm14, %v3633_v23, %v3629_v56  ;;  %vm3643_vm1 = vmor %vm3641_vm4, %vm3642_vm15  ;;  %v3662_v33 = vand.u32 2147483648, %v3211_v31  ;;  %v3660_v20 = vand.u32 2147483647, %v3211_v31 }
 0x5db   : > { %v3638_v63 = vsub.f32 1.0, %v3637_v52  ;;  %v3635_v28 = vmul.f32 %v3634_v8, %v7684_v48  ;;  %vm3656_vm5 = vweird.f32 %v3211_v31 }
 0x5dc   : > { %v2233_v18 = vpop.f32.mrf.mxu3  ;;  %vm3661_vm7 = vcmp.eq.f32.partialorder %v3660_v20, 8.507059e+37 }
 0x5dd   : > { %v2234_v51 = vadd.f32 %v7555_v3, %v2233_v18  ;;  %v3794_v14 = vpop.f32.mrf.mxu1  ;;  %v3603_v3 = vor.u32 1.1754944e-38, %v3602_v12  ;;  %v3639_v15 = vmul.f32 %v4775_v34, %v3638_v63  ;;  %4002 = vst [vmem:[%s7018_s10 + $0xd8] sm:$0xff] %v3635_v28 }
 0x5de   : > { %4032 = vst [vmem:[%s6851_s5 + $0xc8] sm:$0xff] %v3794_v14 }
 0x5df   : > { %3842 = vst.msk [vmem:[%s6897_s3 + $0xd8] sm:$0xff] %vm915_vm0, %v2234_v51  ;;  %v3604_v4 = vsel %vm3601_vm6, %v3603_v3, %v3599_v43  ;;  %v3640_v60 = vadd.f32 %v4775_v34, %v3639_v15  ;;  %v3663_v43 = vor.u32 1.1754944e-38, %v3662_v33 }
 0x5e0   : > { %v3605_v45 = vmul.f32 %v3604_v4, %v7571_v47  ;;  %v3610_v47 = vadd.f32 %v4771_v36, %v3609_v11  ;;  %v4777_v18 = vpop.eup %4776  ;;  %v8051_v53 = vpop.xlane.xlu2 %3212 }
 0x5e1   : > { %v3644_v51 = vsel %vm3643_vm1, %v4775_v34, %v3640_v60  ;;  %v3652_v48 = vmul.f32 %v4777_v18, %v3211_v31  ;;  %4778 = vrcp.f32 %v8051_v53  ;;  %vm3657_vm3 = vweird.f32 %v4777_v18 }
 0x5e2   : > { %4000 = vst [vmem:[%s7018_s10 + $0xc8] sm:$0xff] %v3605_v45  ;;  %v3614_v59 = vsel %vm3613_vm9, %v4771_v36, %v3610_v47  ;;  %v3649_v14 = vsel %vm3646_vm2, %v3648_v44, %v3644_v51  ;;  %vm3658_vm6 = vmor %vm3656_vm5, %vm3657_vm3 }
 0x5e3   : > { %v3619_v6 = vsel %vm3616_vm10, %v3618_v50, %v3614_v59  ;;  %v3650_v22 = vmul.f32 %v3649_v14, %v7721_v40  ;;  %v3653_v26 = vsub.f32 1.0, %v3652_v48 }
 0x5e4   : > { %v2236_v32 = vpop.f32.mrf.mxu3  ;;  %v3620_v38 = vmul.f32 %v3619_v6, %v7619_v21 }
 0x5e5   : > { %v3797_v54 = vpop.f32.mrf.mxu1  ;;  %v2237_v57 = vadd.f32 %v8032_v49, %v2236_v32  ;;  %4003 = vst [vmem:[%s7018_s10 + $0xe0] sm:$0xff] %v3650_v22  ;;  %v3654_v62 = vmul.f32 %v4777_v18, %v3653_v26  ;;  %v8065_v36 = vpop.xlane.xlu0 %3214 }
 0x5e6   : > { %4033 = vst [vmem:[%s6851_s5 + $0xd0] sm:$0xff] %v3797_v54  ;;  %4780 = vrcp.f32 %v8065_v36 }
 0x5e7   : > { %3843 = vst.msk [vmem:[%s6897_s3 + $0xe0] sm:$0xff] %vm915_vm0, %v2237_v57  ;;  %v4779_v3 = vpop.eup %4778  ;;  %v3655_v40 = vadd.f32 %v4777_v18, %v3654_v62  ;;  %v3677_v57 = vand.u32 2147483648, %v8051_v53 }
 0x5e8   : > { %4001 = vst [vmem:[%s7018_s10 + $0xd0] sm:$0xff] %v3620_v38  ;;  %v3667_v7 = vmul.f32 %v4779_v3, %v8051_v53 }
 0x5e9   : > { %v3659_v32 = vsel %vm3658_vm6, %v4777_v18, %v3655_v40 }
 0x5ea   : > { %v3664_v45 = vsel %vm3661_vm7, %v3663_v43, %v3659_v32  ;;  %v3668_v46 = vsub.f32 1.0, %v3667_v7 }
 0x5ec   : > { %v2239_v30 = vpop.f32.mrf.mxu3 }
 0x5ed   : > { %v3800_v58 = vpop.f32.mrf.mxu1  ;;  %v2240_v5 = vadd.f32 %v8032_v49, %v2239_v30 }
 0x5ee   : > { %4034 = vst [vmem:[%s6851_s5 + $0xd8] sm:$0xff] %v3800_v58 }
 0x5ef   : > { %3844 = vst.msk [vmem:[%s6897_s3 + $0xe8] sm:$0xff] %vm915_vm0, %v2240_v5 }
 0x5f4   : > { %v2242_v21 = vpop.f32.mrf.mxu3 }
 0x5f5   : > { %v3803_v39 = vpop.f32.mrf.mxu1  ;;  %v2243_v35 = vadd.f32 %v8032_v49, %v2242_v21 }
 0x5f6   : > { %4035 = vst [vmem:[%s6851_s5 + $0xe0] sm:$0xff] %v3803_v39 }
 0x5f7   : > { %3845 = vst.msk [vmem:[%s6897_s3 + $0xf0] sm:$0xff] %vm915_vm0, %v2243_v35 }
 0x5fc   : > { %v2245_v25 = vpop.f32.mrf.mxu3 }
 0x5fd   : > { %v3806_v19 = vpop.f32.mrf.mxu1  ;;  %v2246_v12 = vadd.f32 %v8032_v49, %v2245_v25  ;;  %v3665_v49 = vmul.f32 %v3664_v45, %v7761_v41 }
 0x5fe   : > { %4036 = vst [vmem:[%s6851_s5 + $0xe8] sm:$0xff] %v3806_v19 }
 0x5ff   : > { %3846 = vst.msk [vmem:[%s6897_s3 + $0xf8] sm:$0xff] %vm915_vm0, %v2246_v12  ;;  %s4070_s3 = scalar_lea.sflag [#allocation13], %s5394_s27 }
 0x604   : > { %v3812_v54 = vpop.f32.mrf.mxu3 }
 0x605   : > { %v3809_v4 = vpop.f32.mrf.mxu1  ;;  %4038 = vst [vmem:[%s6851_s5 + $0xf8] sm:$0xff] %v3812_v54 }
 0x606   : > { %4037 = vst [vmem:[%s6851_s5 + $0xf0] sm:$0xff] %v3809_v4 }
 0x607   : > { %4998 = shalt.err (!%p4995_p12)
}
 0x608   : > { %4575 = dma.vmem_to_hbm [thread:$0]  (%p5259_p5), %s4172_s1, 4096, %s4174_s13, %s4070_s3, %s8287_s11, %s8287_s11, %s8286_s8   ;;  %v3669_v41 = vmul.f32 %v4779_v3, %v3668_v46  ;;  %vm3672_vm0 = vweird.f32 %v4779_v3  ;;  %v3675_v9 = vand.u32 2147483647, %v8051_v53  ;;  %v4781_v29 = vpop.eup %4780  ;;  %vm3671_vm8 = vweird.f32 %v8051_v53 }
 0x609   : > { %4004 = vst [vmem:[%s7018_s10 + $0xe8] sm:$0xff] %v3665_v49  ;;  %v3682_v10 = vmul.f32 %v4781_v29, %v8065_v36  ;;  %vm3673_vm9 = vmor %vm3671_vm8, %vm3672_vm0  ;;  %v3678_v47 = vor.u32 1.1754944e-38, %v3677_v57  ;;  %v3692_v30 = vand.u32 2147483648, %v8065_v36  ;;  %vm3687_vm11 = vweird.f32 %v4781_v29  ;;  %s4153_s29 = scalar_lea.hbm %s8164_s25, %s7845_s9  ;;  %s4154_s15 = sshll.u32 %s7018_s10, 4  ;;  %s4155_s15 = int_to_ptr.vmem [resolvable:$true] %s4154_s15 }
 0x60a   : > { %v3670_v11 = vadd.f32 %v4779_v3, %v3669_v41  ;;  %vm3676_vm10 = vcmp.eq.f32.partialorder %v3675_v9, 8.507059e+37  ;;  %v3690_v38 = vand.u32 2147483647, %v8065_v36  ;;  %vm3686_vm12 = vweird.f32 %v8065_v36  ;;  %s4156_s14 = sshll.u32 %s4153_s29, 4  ;;  %s5019_s13 = scalar_lea.hbm %s8164_s25, 512  ;;  %s4157_s14 = int_to_ptr.hbm [resolvable:$true] %s4156_s14 }
 0x60b   : > { %v3683_v59 = vsub.f32 1.0, %v3682_v10  ;;  %vm3688_vm13 = vmor %vm3686_vm12, %vm3687_vm11  ;;  %v3693_v5 = vor.u32 1.1754944e-38, %v3692_v30  ;;  %s5013_s7 = sshra.s32 %s4157_s14, 4  ;;  %s5014_s7 = int_to_ptr.hbm [resolvable:$true] %s5013_s7 }
 0x60c   : > { %v3674_v50 = vsel %vm3673_vm9, %v4779_v3, %v3670_v11  ;;  %vm3691_vm14 = vcmp.eq.f32.partialorder %v3690_v38, 8.507059e+37  ;;  %s5015_s9 = scalar_lea.hbm %s5014_s7, 256  ;;  %p5020_p2 = scmp.lt.s32.totalorder %s5014_s7, %s8164_s25 }
 0x60d   : > { %v3679_v6 = vsel %vm3676_vm10, %v3678_v47, %v3674_v50  ;;  %v3684_v0 = vmul.f32 %v4781_v29, %v3683_v59  ;;  %p5016_p13 = scmp.ne.s32.totalorder %s5014_s7, %s5015_s9  ;;  %p5021_p3 = scmp.lt.s32.totalorder %s5019_s13, %s5015_s9 }
 0x60e   : > { %v3680_v58 = vmul.f32 %v3679_v6, %v7802_v2 }
 0x60f   : > { %v3685_v61 = vadd.f32 %v4781_v29, %v3684_v0  ;;  %p5017_p0 = pnand %p5016_p13, %p5259_p5  ;;  %p5022_p4 = por %p5021_p3, %p5020_p2 }
 0x610   : > { %4005 = vst [vmem:[%s7018_s10 + $0xf0] sm:$0xff] %v3680_v58 }
 0x611   : > { %v3689_v13 = vsel %vm3688_vm13, %v4781_v29, %v3685_v61  ;;  %p5018_p1 = pneg %p5017_p0 }
 0x612   : > { %v3694_v2 = vsel %vm3691_vm14, %v3693_v5, %v3689_v13 }
 0x613   : > { %v3695_v27 = vmul.f32 %v3694_v2, %v7825_v24  ;;  %p5023_p7 = pnand %p5022_p4, %p5018_p1 }
 0x615   : > { %4006 = vst [vmem:[%s7018_s10 + $0xf8] sm:$0xff] %v3695_v27 }
 0x616   : > { %5026 = shalt.err (!%p5023_p7)
}
 0x617   : > { %4574 = dma.vmem_to_hbm [thread:$0]  (%p5259_p5), %s4155_s15, 4096, %s4157_s14, %s7900_s12, %s8287_s11, %s8287_s11, %s8286_s8  }
 0x618 PF: > { %s8290_s10 = sld [smem:[#allocation22_spill]] }
 0x619   : > { %s8291_s30 = sld [smem:[#allocation19_spill]] }
 0x61e   : > { %p4607_p8 = scmp.ge.s32.totalorder %s8290_s10, 2 }
 0x61f   : > { %s4196_s17 = sand.u32 1, %s8291_s30  }
 0x620   : > { %p4587_p9 = pnand %p4607_p8, %p5263_p6  ;;  %s4197_s4 = scalar_lea.sflag [#allocation4], %s4196_s17 }
 0x622   : > { %p4588_p10 = pneg %p4587_p9 }
 0x624   : > { %5048 = dma.done.wait (%p4588_p10), %s4197_s4, 4096  }
 0x625   : > { %5050 = vsyncadd (%p4588_p10), %s4197_s4, 4294963200  ;;  %s8293_s6 = sadd.s32 4294967294, %s8290_s10  }
 0x626   : > { %s4206_s2 = sand.u32 1, %s8293_s6  }
 0x627   : > { %s4207_s28 = scalar_lea.sflag [#allocation7], %s4206_s2 }
 0x628   : > { %5052 = dma.done.wait (%p4588_p10), %s4207_s28, 8192  }
 0x629   : > { %5054 = vsyncadd (%p4588_p10), %s4207_s28, 4294959104  ;;  %s4227_s27 = scalar_lea.sflag [#allocation10], %s4206_s2 }
 0x62a   : > { %5056 = dma.done.wait (%p4588_p10), %s4227_s27, 8192  }
 0x62b   : > { %5058 = vsyncadd (%p4588_p10), %s4227_s27, 4294959104  ;;  %s4247_s12 = scalar_lea.sflag [#allocation13], %s4196_s17 }
 0x62c   : > { %5060 = dma.done.wait (%p4588_p10), %s4247_s12, 4096  }
 0x62d   : > { %5062 = vsyncadd (%p4588_p10), %s4247_s12, 4294963200  ;;  %s8294_s28 = sld [smem:[#allocation23_spill]] }
 0x62e   : > { %s8295_s27 = sld [smem:[#allocation20_spill]] }
 0x62f   : > { %s8296_s3 = sld [smem:[#allocation21_spill]] }
 0x630   : > { %s8297_s7 = sld [smem:[#allocation24_spill]] }
 0x633   : > { %p47_p5 = scmp.ge.s32.totalorder %s8294_s28, 4  }
 0x635   :  { %49 = sbr.rel (!%p47_p5) target bundleno = 30 (0x1e), region = 233 }
 0x63a   :  { %4253 = vsyncpa [#allocation3], 1 }
 0x63b   :  { %4255 = vsyncpa [#allocation3 + $0x1], 1 }
 0x63c   :  { %4256 = vsyncpa [#allocation4], 1 }
 0x63d   :  { %4258 = vsyncpa [#allocation4 + $0x1], 1 }
 0x63e   :  { %4259 = vsyncpa [#allocation7], 1 }
 0x63f   :  { %4261 = vsyncpa [#allocation7 + $0x1], 1 }
 0x640   :  { %4262 = vsyncpa [#allocation10], 1 }
 0x641   :  { %4264 = vsyncpa [#allocation10 + $0x1], 1 }
 0x642   :  { %4265 = vsyncpa [#allocation13], 1 }
 0x643   :  { %4267 = vsyncpa [#allocation13 + $0x1], 1 }

</bundles_post_ra>
